<compile_context>
chip_gen: v6e
topology: v6e:2x2x1
jax: 0.10.0
libtpu: 0.0.40
codegen_flags: <defaults>
</compile_context>

<pallas_src>
import functools
import math

import jax
import jax.numpy as jnp
from jax.experimental import pallas as pl
from jax.experimental.pallas import tpu as pltpu

# ----------------------------- model sizes ---------------------------------
N_STATES = 16      # number of distinct states
K_ACTIONS = 8      # QGPO samples K candidate actions per state -> batched into M
BATCH = N_STATES * K_ACTIONS   # 128 rows fed to the MXU
STATE_DIM = 16     # observation dimension
ACTION_DIM = 8     # action dimension
HIDDEN = 64        # MLP hidden width (score net and energy-guidance net)
N_FREQ = 8         # Gaussian-Fourier time-embedding frequencies (-> 2*N_FREQ feats)
NUM_STEPS = 16     # Euler ODE steps (t: 1.0 -> 1e-3)
BETA_MIN = 0.1
BETA_MAX = 20.0
GUIDANCE_SCALE = 1.0
ROW_TILE = 64      # rows per grid point (2 tiles -> both v7x TensorCores)


def _qgpo_sample_kernel(
    x0_ref,      # (BT, A)    f32  initial Gaussian noise
    state_ref,   # (BT, S)    bf16 conditioning state
    w1a_ref,     # (A, 2H)    bf16 fused first-layer action weights [score | energy]
    w1s_ref,     # (S, 2H)    bf16 fused first-layer state weights
    w2w1_ref,    # (2H, 2H)   bf16 W2_cat @ W1a_cat (z-domain recursion weight)
    w2cat_ref,   # (2H, A)    bf16 fused second layer [w2 ; we1a^T]
    vec_ref,     # (2+T, 2H)  f32  rows: [lane_sel ; scale_vec ; temb_0 ; d_0..d_{T-2}]
    gb2_ref,     # (1, A)     f32  (sum_i gamma_i) * b2
    out_ref,     # (BT, A)    f32
    *, cx, ce, gamma, p0, num_steps,
):
    bt = x0_ref.shape[0]
    h2 = w2w1_ref.shape[1]

    x0 = x0_ref[...]                                                  # (BT, A) f32

    # Loop-invariant broadcasts hoisted once (JAX does not CSE broadcast_in_dim).
    lane_sel = jnp.broadcast_to(vec_ref[pl.ds(0, 1), :], (bt, h2))    # 1 on score lanes
    scale_b = jnp.broadcast_to(vec_ref[pl.ds(1, 1), :], (bt, h2))     # g*we2 on energy lanes

    # Loop-invariant state projection: one matmul for score+energy first layers.
    s_proj = jnp.dot(state_ref[...], w1s_ref[...],
                     preferred_element_type=jnp.float32)              # (BT, 2H) f32

    # z_0 = x_0 @ W1a_cat + s_proj + temb_0
    z = (jnp.dot(x0.astype(jnp.bfloat16), w1a_ref[...],
                 preferred_element_type=jnp.float32)
         + s_proj + vec_ref[pl.ds(2, 1), :])                          # (BT, 2H)

    # gamma-weighted accumulator of the hidden-domain "u" vectors.
    u_acc = jnp.zeros((bt, h2), jnp.float32)

    # Fully unrolled Euler loop, carried entirely in the 2H=128 hidden domain:
    # exactly one lane-dense (BT,128)@(128,128) matmul per step.
    for i in range(num_steps):
        # u[:, :H] = relu(z_score);   u[:, H:] = guidance * relu'(z_energy) * we2^T
        u = jnp.where(z > 0.0, lane_sel * z + scale_b, 0.0)           # (BT, 2H)
        u_acc = u_acc + gamma[i] * u
        if i + 1 < num_steps:
            m = jnp.dot(u.astype(jnp.bfloat16), w2w1_ref[...],
                        preferred_element_type=jnp.float32)           # (BT, 2H)
            z = (cx[i] * z + ce[i] * m
                 + (1.0 - cx[i]) * s_proj
                 + vec_ref[pl.ds(3 + i, 1), :])

    # Recover the action with a single (BT,128)@(128,A) matmul:
    #   x_N = (prod_j cx_j)*x0 + (sum_i gamma_i*u_i) @ W2_cat + (sum_i gamma_i)*b2
    out = (p0 * x0
           + jnp.dot(u_acc.astype(jnp.bfloat16), w2cat_ref[...],
                     preferred_element_type=jnp.float32)
           + gb2_ref[...])
    out_ref[...] = out


def qgpo_policy_forward(state, x0, params, *, guidance_scale=GUIDANCE_SCALE,
                        num_steps=NUM_STEPS):
    """state: (B, STATE_DIM) f32, x0: (B, ACTION_DIM) f32 initial noise."""
    (freqs, w1a, w1t, w1s, b1, w2, b2, we1a, we1t, we1s, be1, we2) = params
    g = float(guidance_scale)
    B = state.shape[0]

    # ---- weight fusion (parameter layout prep, done once) ------------------
    w1a_cat = jnp.concatenate([w1a, we1a], axis=1)               # (A, 2H)
    w1s_cat = jnp.concatenate([w1s, we1s], axis=1)               # (S, 2H)
    w1t_cat = jnp.concatenate([w1t, we1t], axis=1)               # (2F, 2H)
    b1_cat = jnp.concatenate([b1, be1], axis=1)                  # (1, 2H)
    # maps u = [relu(h_score) | g*relu'(h_energy)*we2^T] -> eps + g*dE/da
    w2_cat = jnp.concatenate([w2, we1a.T], axis=0)               # (2H, A)
    # z-domain recursion weights
    w2w1 = w2_cat @ w1a_cat                                      # (2H, 2H)
    b2w1 = b2 @ w1a_cat                                          # (1, 2H)

    lane_sel = jnp.concatenate(
        [jnp.ones((1, HIDDEN), jnp.float32),
         jnp.zeros((1, HIDDEN), jnp.float32)], axis=1)           # (1, 2H)
    scale_vec = jnp.concatenate(
        [jnp.zeros((1, HIDDEN), jnp.float32),
         g * we2.reshape(1, HIDDEN)], axis=1)                    # (1, 2H)

    # ---- time schedule / Euler coefficients (compile-time floats) ----------
    t_start, t_end = 1.0, 1e-3
    dt = (t_end - t_start) / num_steps                           # negative step
    cx, ce = [], []
    for i in range(num_steps):
        t = t_start + dt * i
        beta_t = BETA_MIN + t * (BETA_MAX - BETA_MIN)
        log_ab = -(BETA_MIN * t + 0.5 * (BETA_MAX - BETA_MIN) * t * t)
        sigma_t = math.sqrt(max(1.0 - math.exp(log_ab), 1e-4))
        cx.append(float(1.0 - 0.5 * dt * beta_t))
        ce.append(float(0.5 * dt * beta_t / sigma_t))
    gamma = []
    for i in range(num_steps):
        p = 1.0
        for j in range(i + 1, num_steps):
            p *= cx[j]
        gamma.append(float(ce[i] * p))
    p0 = 1.0
    for j in range(num_steps):
        p0 *= cx[j]
    g_sum = float(sum(gamma))

    # Per-step time-embedding rows temb(t_i) @ W1t_cat + b1_cat (precomputed).
    ts = t_start + dt * jnp.arange(num_steps, dtype=jnp.float32)
    temb = jnp.concatenate([jnp.sin(ts[:, None] * freqs),
                            jnp.cos(ts[:, None] * freqs)], axis=-1)   # (T, 2F)
    temb_tbl = temb @ w1t_cat + b1_cat                                # (T, 2H)
    # z-recursion drive: d_i = temb_{i+1} - cx_i*temb_i + ce_i*(b2 @ W1a_cat)
    cx_v = jnp.asarray(cx, jnp.float32)[:, None]
    ce_v = jnp.asarray(ce, jnp.float32)[:, None]
    d_tbl = temb_tbl[1:] - cx_v[:-1] * temb_tbl[:-1] + ce_v[:-1] * b2w1   # (T-1, 2H)

    # Pack the small (·,2H) operands into one table (fewer ingress DMAs).
    vec_tbl = jnp.concatenate([lane_sel, scale_vec, temb_tbl[0:1], d_tbl],
                              axis=0).astype(jnp.float32)             # (2+T, 2H)
    gb2 = (g_sum * b2).astype(jnp.float32)                            # (1, A)

    # bf16 MXU operands (f32 accumulation stays via preferred_element_type).
    bf = jnp.bfloat16
    state_bf = state.astype(bf)
    w1a_bf = w1a_cat.astype(bf)
    w1s_bf = w1s_cat.astype(bf)
    w2w1_bf = w2w1.astype(bf)
    w2cat_bf = w2_cat.astype(bf)

    kernel = functools.partial(
        _qgpo_sample_kernel,
        cx=tuple(cx), ce=tuple(ce), gamma=tuple(gamma),
        p0=float(p0), num_steps=int(num_steps),
    )

    row_tile = ROW_TILE if (B % ROW_TILE == 0) else B
    n_tiles = B // row_tile
    h2 = 2 * HIDDEN

    grid_spec = pltpu.PrefetchScalarGridSpec(
        num_scalar_prefetch=0,
        grid=(n_tiles,),
        in_specs=[
            pl.BlockSpec((row_tile, ACTION_DIM), lambda r: (r, 0)),   # x0
            pl.BlockSpec((row_tile, STATE_DIM), lambda r: (r, 0)),    # state
            pl.BlockSpec((ACTION_DIM, h2), lambda r: (0, 0)),         # w1a_cat
            pl.BlockSpec((STATE_DIM, h2), lambda r: (0, 0)),          # w1s_cat
            pl.BlockSpec((h2, h2), lambda r: (0, 0)),                 # w2w1
            pl.BlockSpec((h2, ACTION_DIM), lambda r: (0, 0)),         # w2_cat
            pl.BlockSpec((vec_tbl.shape[0], h2), lambda r: (0, 0)),   # vec table
            pl.BlockSpec((1, ACTION_DIM), lambda r: (0, 0)),          # g_sum*b2
        ],
        out_specs=pl.BlockSpec((row_tile, ACTION_DIM), lambda r: (r, 0)),
    )

    return pl.pallas_call(
        kernel,
        out_shape=jax.ShapeDtypeStruct((B, ACTION_DIM), jnp.float32),
        grid_spec=grid_spec,
        compiler_params=pltpu.CompilerParams(
            dimension_semantics=("parallel",)),
    )(x0, state_bf, w1a_bf, w1s_bf, w2w1_bf, w2cat_bf, vec_tbl, gb2)


def _reference_forward(state, x0, params, *, guidance_scale=GUIDANCE_SCALE,
                       num_steps=NUM_STEPS):
    """Pure-JAX f32 reference of the ORIGINAL (un-restructured) formulation."""
    (freqs, w1a, w1t, w1s, b1, w2, b2, we1a, we1t, we1s, be1, we2) = params
    g = float(guidance_scale)
    t_start, t_end = 1.0, 1e-3
    dt = (t_end - t_start) / num_steps
    x = x0
    for i in range(num_steps):
        t = t_start + dt * i
        beta_t = BETA_MIN + t * (BETA_MAX - BETA_MIN)
        alpha_bar = math.exp(-(BETA_MIN * t + 0.5 * (BETA_MAX - BETA_MIN) * t * t))
        sigma_t = math.sqrt(max(1.0 - alpha_bar, 1e-4))
        temb = jnp.concatenate([jnp.sin(t * freqs), jnp.cos(t * freqs)], axis=-1)
        # score net eps(a_t, t, s)
        h = jnp.maximum(x @ w1a + state @ w1s + temb @ w1t + b1, 0.0)
        eps = h @ w2 + b2
        # energy net E = relu(ze) @ we2 ; analytic dE/da
        ze = x @ we1a + state @ we1s + temb @ we1t + be1
        grad_a = ((ze > 0.0).astype(jnp.float32) * we2.reshape(1, -1)) @ we1a.T
        eps_guided = eps + g * grad_a
        c_x = 1.0 - 0.5 * dt * beta_t
        c_e = 0.5 * dt * beta_t / sigma_t
        x = c_x * x + c_e * eps_guided
    return x


def init_params(key):
    """Deterministic synthetic parameters (shapes implied by the module sizes)."""
    ks = jax.random.split(key, 12)
    scale = 0.1
    freqs = 2.0 ** jnp.arange(N_FREQ, dtype=jnp.float32).reshape(1, N_FREQ)
    w1a = scale * jax.random.normal(ks[0], (ACTION_DIM, HIDDEN), jnp.float32)
    w1t = scale * jax.random.normal(ks[1], (2 * N_FREQ, HIDDEN), jnp.float32)
    w1s = scale * jax.random.normal(ks[2], (STATE_DIM, HIDDEN), jnp.float32)
    b1 = jnp.zeros((1, HIDDEN), jnp.float32)
    w2 = scale * jax.random.normal(ks[3], (HIDDEN, ACTION_DIM), jnp.float32)
    b2 = jnp.zeros((1, ACTION_DIM), jnp.float32)
    we1a = scale * jax.random.normal(ks[4], (ACTION_DIM, HIDDEN), jnp.float32)
    we1t = scale * jax.random.normal(ks[5], (2 * N_FREQ, HIDDEN), jnp.float32)
    we1s = scale * jax.random.normal(ks[6], (STATE_DIM, HIDDEN), jnp.float32)
    be1 = jnp.zeros((1, HIDDEN), jnp.float32)
    we2 = scale * jax.random.normal(ks[7], (HIDDEN, 1), jnp.float32)
    return (freqs, w1a, w1t, w1s, b1, w2, b2, we1a, we1t, we1s, be1, we2)


if __name__ == "__main__":
    key = jax.random.PRNGKey(0)
    k_state, k_noise, k_param = jax.random.split(key, 3)

    # QGPO samples K candidate actions per state -> K rows per state in M.
    base_state = jax.random.normal(k_state, (N_STATES, STATE_DIM), jnp.float32)
    state = jnp.repeat(base_state, K_ACTIONS, axis=0)            # (128, 16)
    x0 = jax.random.normal(k_noise, (BATCH, ACTION_DIM), jnp.float32)  # sampling noise
    params = init_params(k_param)

    action = qgpo_policy_forward(state, x0, params)
    action = jax.block_until_ready(action)

    assert action.shape == (BATCH, ACTION_DIM)
    assert action.dtype == jnp.float32
    assert bool(jnp.all(jnp.isfinite(action)))

    # Loose check against the f32 un-restructured reference (kernel uses bf16 MXU
    # operands + the z-domain recursion, so tolerance is relative to output scale).
    ref = _reference_forward(state, x0, params)
    err = float(jnp.max(jnp.abs(action - ref)))
    scl = float(jnp.max(jnp.abs(ref))) + 1.0
    assert err / scl < 5e-2, (err, scl)

    print("KERNEL_OK")
</pallas_src>

<mosaic_0001>
module attributes {stable_mosaic.version = 11 : i64} {
  func.func @_qgpo_sample_kernel(%arg0: i32, %arg1: memref<64x8xf32, #tpu.memory_space<vmem>>, %arg2: memref<64x16xbf16, #tpu.memory_space<vmem>>, %arg3: memref<8x128xbf16, #tpu.memory_space<vmem>>, %arg4: memref<16x128xbf16, #tpu.memory_space<vmem>>, %arg5: memref<128x128xbf16, #tpu.memory_space<vmem>>, %arg6: memref<128x8xbf16, #tpu.memory_space<vmem>>, %arg7: memref<18x128xf32, #tpu.memory_space<vmem>>, %arg8: memref<1x8xf32, #tpu.memory_space<vmem>>, %arg9: memref<64x8xf32, #tpu.memory_space<vmem>>) attributes {dimension_semantics = [#tpu.dimension_semantics<parallel>], iteration_bounds = array<i64: 2>, scalar_prefetch = 0 : i64, scratch_operands = 0 : i64, tpu.core_type = #tpu.core_type<tc>, window_params = [{transform_indices = @transform_0, window_bounds = array<i64: 64, 8>}, {transform_indices = @transform_1, window_bounds = array<i64: 64, 16>}, {pipeline_mode = #tpu.pipeline_mode<synchronous>, transform_indices = @transform_2, window_bounds = array<i64: 8, 128>}, {pipeline_mode = #tpu.pipeline_mode<synchronous>, transform_indices = @transform_3, window_bounds = array<i64: 16, 128>}, {pipeline_mode = #tpu.pipeline_mode<synchronous>, transform_indices = @transform_4, window_bounds = array<i64: 128, 128>}, {pipeline_mode = #tpu.pipeline_mode<synchronous>, transform_indices = @transform_5, window_bounds = array<i64: 128, 8>}, {pipeline_mode = #tpu.pipeline_mode<synchronous>, transform_indices = @transform_6, window_bounds = array<i64: 18, 128>}, {pipeline_mode = #tpu.pipeline_mode<synchronous>, transform_indices = @transform_7, window_bounds = array<i64: 1, 8>}, {transform_indices = @transform_8, window_bounds = array<i64: 64, 8>}]} {
    %c0 = arith.constant 0 : index
    %c0_0 = arith.constant 0 : index
    %0 = vector.load %arg1[%c0, %c0_0] : memref<64x8xf32, #tpu.memory_space<vmem>>, vector<64x8xf32>
    %c0_1 = arith.constant 0 : index
    %c0_2 = arith.constant 0 : index
    %1 = vector.load %arg7[%c0_1, %c0_2] : memref<18x128xf32, #tpu.memory_space<vmem>>, vector<1x128xf32>
    %2 = vector.shape_cast %1 : vector<1x128xf32> to vector<1x128xf32>
    %3 = vector.broadcast %2 : vector<1x128xf32> to vector<64x128xf32>
    %c1 = arith.constant 1 : index
    %c0_3 = arith.constant 0 : index
    %4 = vector.load %arg7[%c1, %c0_3] : memref<18x128xf32, #tpu.memory_space<vmem>>, vector<1x128xf32>
    %5 = vector.shape_cast %4 : vector<1x128xf32> to vector<1x128xf32>
    %6 = vector.broadcast %5 : vector<1x128xf32> to vector<64x128xf32>
    %c0_4 = arith.constant 0 : index
    %c0_5 = arith.constant 0 : index
    %7 = vector.load %arg2[%c0_4, %c0_5] : memref<64x16xbf16, #tpu.memory_space<vmem>>, vector<64x16xbf16>
    %c0_6 = arith.constant 0 : index
    %c0_7 = arith.constant 0 : index
    %8 = vector.load %arg4[%c0_6, %c0_7] : memref<16x128xbf16, #tpu.memory_space<vmem>>, vector<16x128xbf16>
    %cst = arith.constant dense<0.000000e+00> : vector<64x128xf32>
    %9 = tpu.matmul %7, %8, %cst {dimension_numbers = #tpu.dot_dimension_numbers<[1], [0], [0], [1], [0, 0, 1, 1], [], []>} : vector<64x16xbf16>, vector<16x128xbf16>, vector<64x128xf32> -> vector<64x128xf32>
    %10 = arith.truncf %0 : vector<64x8xf32> to vector<64x8xbf16>
    %c0_8 = arith.constant 0 : index
    %c0_9 = arith.constant 0 : index
    %11 = vector.load %arg3[%c0_8, %c0_9] : memref<8x128xbf16, #tpu.memory_space<vmem>>, vector<8x128xbf16>
    %cst_10 = arith.constant dense<0.000000e+00> : vector<64x128xf32>
    %12 = tpu.matmul %10, %11, %cst_10 {dimension_numbers = #tpu.dot_dimension_numbers<[1], [0], [0], [1], [0, 0, 1, 1], [], []>} : vector<64x8xbf16>, vector<8x128xbf16>, vector<64x128xf32> -> vector<64x128xf32>
    %13 = arith.addf %12, %9 : vector<64x128xf32>
    %c2 = arith.constant 2 : index
    %c0_11 = arith.constant 0 : index
    %14 = vector.load %arg7[%c2, %c0_11] : memref<18x128xf32, #tpu.memory_space<vmem>>, vector<1x128xf32>
    %15 = vector.broadcast %14 : vector<1x128xf32> to vector<64x128xf32>
    %16 = arith.addf %13, %15 : vector<64x128xf32>
    %cst_12 = arith.constant 0.000000e+00 : f32
    %17 = vector.broadcast %cst_12 : f32 to vector<64x128xf32>
    %cst_13 = arith.constant 0.000000e+00 : f32
    %18 = vector.broadcast %cst_13 : f32 to vector<64x128xf32>
    %19 = arith.cmpf ogt, %16, %18 : vector<64x128xf32>
    %20 = arith.mulf %3, %16 : vector<64x128xf32>
    %21 = arith.addf %20, %6 : vector<64x128xf32>
    %cst_14 = arith.constant 0.000000e+00 : f32
    %22 = vector.broadcast %cst_14 : f32 to vector<64x128xf32>
    %23 = arith.select %19, %21, %22 : vector<64x128xi1>, vector<64x128xf32>
    %cst_15 = arith.constant -33.1825027 : f32
    %24 = vector.broadcast %cst_15 : f32 to vector<64x128xf32>
    %25 = arith.mulf %24, %23 : vector<64x128xf32>
    %26 = arith.addf %17, %25 : vector<64x128xf32>
    %27 = arith.truncf %23 : vector<64x128xf32> to vector<64x128xbf16>
    %c0_16 = arith.constant 0 : index
    %c0_17 = arith.constant 0 : index
    %28 = vector.load %arg5[%c0_16, %c0_17] : memref<128x128xbf16, #tpu.memory_space<vmem>>, vector<128x128xbf16>
    %cst_18 = arith.constant dense<0.000000e+00> : vector<64x128xf32>
    %29 = tpu.matmul %27, %28, %cst_18 {dimension_numbers = #tpu.dot_dimension_numbers<[1], [0], [0], [1], [0, 0, 1, 1], [], []>} : vector<64x128xbf16>, vector<128x128xbf16>, vector<64x128xf32> -> vector<64x128xf32>
    %cst_19 = arith.constant 1.62437499 : f32
    %30 = vector.broadcast %cst_19 : f32 to vector<64x128xf32>
    %31 = arith.mulf %30, %16 : vector<64x128xf32>
    %cst_20 = arith.constant -0.624388456 : f32
    %32 = vector.broadcast %cst_20 : f32 to vector<64x128xf32>
    %33 = arith.mulf %32, %29 : vector<64x128xf32>
    %34 = arith.addf %31, %33 : vector<64x128xf32>
    %cst_21 = arith.constant -6.243750e-01 : f32
    %35 = vector.broadcast %cst_21 : f32 to vector<64x128xf32>
    %36 = arith.mulf %35, %9 : vector<64x128xf32>
    %37 = arith.addf %34, %36 : vector<64x128xf32>
    %c3 = arith.constant 3 : index
    %c0_22 = arith.constant 0 : index
    %38 = vector.load %arg7[%c3, %c0_22] : memref<18x128xf32, #tpu.memory_space<vmem>>, vector<1x128xf32>
    %39 = vector.broadcast %38 : vector<1x128xf32> to vector<64x128xf32>
    %40 = arith.addf %37, %39 : vector<64x128xf32>
    %cst_23 = arith.constant 0.000000e+00 : f32
    %41 = vector.broadcast %cst_23 : f32 to vector<64x128xf32>
    %42 = arith.cmpf ogt, %40, %41 : vector<64x128xf32>
    %43 = arith.mulf %3, %40 : vector<64x128xf32>
    %44 = arith.addf %43, %6 : vector<64x128xf32>
    %cst_24 = arith.constant 0.000000e+00 : f32
    %45 = vector.broadcast %cst_24 : f32 to vector<64x128xf32>
    %46 = arith.select %42, %44, %45 : vector<64x128xi1>, vector<64x128xf32>
    %cst_25 = arith.constant -19.6284676 : f32
    %47 = vector.broadcast %cst_25 : f32 to vector<64x128xf32>
    %48 = arith.mulf %47, %46 : vector<64x128xf32>
    %49 = arith.addf %26, %48 : vector<64x128xf32>
    %50 = arith.truncf %46 : vector<64x128xf32> to vector<64x128xbf16>
    %c0_26 = arith.constant 0 : index
    %c0_27 = arith.constant 0 : index
    %51 = vector.load %arg5[%c0_26, %c0_27] : memref<128x128xbf16, #tpu.memory_space<vmem>>, vector<128x128xbf16>
    %cst_28 = arith.constant dense<0.000000e+00> : vector<64x128xf32>
    %52 = tpu.matmul %50, %51, %cst_28 {dimension_numbers = #tpu.dot_dimension_numbers<[1], [0], [0], [1], [0, 0, 1, 1], [], []>} : vector<64x128xbf16>, vector<128x128xbf16>, vector<64x128xf32> -> vector<64x128xf32>
    %cst_29 = arith.constant 1.58558547 : f32
    %53 = vector.broadcast %cst_29 : f32 to vector<64x128xf32>
    %54 = arith.mulf %53, %40 : vector<64x128xf32>
    %cst_30 = arith.constant -0.585627913 : f32
    %55 = vector.broadcast %cst_30 : f32 to vector<64x128xf32>
    %56 = arith.mulf %55, %52 : vector<64x128xf32>
    %57 = arith.addf %54, %56 : vector<64x128xf32>
    %cst_31 = arith.constant -0.585585535 : f32
    %58 = vector.broadcast %cst_31 : f32 to vector<64x128xf32>
    %59 = arith.mulf %58, %9 : vector<64x128xf32>
    %60 = arith.addf %57, %59 : vector<64x128xf32>
    %c4 = arith.constant 4 : index
    %c0_32 = arith.constant 0 : index
    %61 = vector.load %arg7[%c4, %c0_32] : memref<18x128xf32, #tpu.memory_space<vmem>>, vector<1x128xf32>
    %62 = vector.broadcast %61 : vector<1x128xf32> to vector<64x128xf32>
    %63 = arith.addf %60, %62 : vector<64x128xf32>
    %cst_33 = arith.constant 0.000000e+00 : f32
    %64 = vector.broadcast %cst_33 : f32 to vector<64x128xf32>
    %65 = arith.cmpf ogt, %63, %64 : vector<64x128xf32>
    %66 = arith.mulf %3, %63 : vector<64x128xf32>
    %67 = arith.addf %66, %6 : vector<64x128xf32>
    %cst_34 = arith.constant 0.000000e+00 : f32
    %68 = vector.broadcast %cst_34 : f32 to vector<64x128xf32>
    %69 = arith.select %65, %67, %68 : vector<64x128xi1>, vector<64x128xf32>
    %cst_35 = arith.constant -11.8509865 : f32
    %70 = vector.broadcast %cst_35 : f32 to vector<64x128xf32>
    %71 = arith.mulf %70, %69 : vector<64x128xf32>
    %72 = arith.addf %49, %71 : vector<64x128xf32>
    %73 = arith.truncf %69 : vector<64x128xf32> to vector<64x128xbf16>
    %c0_36 = arith.constant 0 : index
    %c0_37 = arith.constant 0 : index
    %74 = vector.load %arg5[%c0_36, %c0_37] : memref<128x128xbf16, #tpu.memory_space<vmem>>, vector<128x128xbf16>
    %cst_38 = arith.constant dense<0.000000e+00> : vector<64x128xf32>
    %75 = tpu.matmul %73, %74, %cst_38 {dimension_numbers = #tpu.dot_dimension_numbers<[1], [0], [0], [1], [0, 0, 1, 1], [], []>} : vector<64x128xbf16>, vector<128x128xbf16>, vector<64x128xf32> -> vector<64x128xf32>
    %cst_39 = arith.constant 1.54679596 : f32
    %76 = vector.broadcast %cst_39 : f32 to vector<64x128xf32>
    %77 = arith.mulf %76, %63 : vector<64x128xf32>
    %cst_40 = arith.constant -0.546918929 : f32
    %78 = vector.broadcast %cst_40 : f32 to vector<64x128xf32>
    %79 = arith.mulf %78, %75 : vector<64x128xf32>
    %80 = arith.addf %77, %79 : vector<64x128xf32>
    %cst_41 = arith.constant -5.467960e-01 : f32
    %81 = vector.broadcast %cst_41 : f32 to vector<64x128xf32>
    %82 = arith.mulf %81, %9 : vector<64x128xf32>
    %83 = arith.addf %80, %82 : vector<64x128xf32>
    %c5 = arith.constant 5 : index
    %c0_42 = arith.constant 0 : index
    %84 = vector.load %arg7[%c5, %c0_42] : memref<18x128xf32, #tpu.memory_space<vmem>>, vector<1x128xf32>
    %85 = vector.broadcast %84 : vector<1x128xf32> to vector<64x128xf32>
    %86 = arith.addf %83, %85 : vector<64x128xf32>
    %cst_43 = arith.constant 0.000000e+00 : f32
    %87 = vector.broadcast %cst_43 : f32 to vector<64x128xf32>
    %88 = arith.cmpf ogt, %86, %87 : vector<64x128xf32>
    %89 = arith.mulf %3, %86 : vector<64x128xf32>
    %90 = arith.addf %89, %6 : vector<64x128xf32>
    %cst_44 = arith.constant 0.000000e+00 : f32
    %91 = vector.broadcast %cst_44 : f32 to vector<64x128xf32>
    %92 = arith.select %88, %90, %91 : vector<64x128xi1>, vector<64x128xf32>
    %cst_45 = arith.constant -7.30428981 : f32
    %93 = vector.broadcast %cst_45 : f32 to vector<64x128xf32>
    %94 = arith.mulf %93, %92 : vector<64x128xf32>
    %95 = arith.addf %72, %94 : vector<64x128xf32>
    %96 = arith.truncf %92 : vector<64x128xf32> to vector<64x128xbf16>
    %c0_46 = arith.constant 0 : index
    %c0_47 = arith.constant 0 : index
    %97 = vector.load %arg5[%c0_46, %c0_47] : memref<128x128xbf16, #tpu.memory_space<vmem>>, vector<128x128xbf16>
    %cst_48 = arith.constant dense<0.000000e+00> : vector<64x128xf32>
    %98 = tpu.matmul %96, %97, %cst_48 {dimension_numbers = #tpu.dot_dimension_numbers<[1], [0], [0], [1], [0, 0, 1, 1], [], []>} : vector<64x128xbf16>, vector<128x128xbf16>, vector<64x128xf32> -> vector<64x128xf32>
    %cst_49 = arith.constant 1.50800657 : f32
    %99 = vector.broadcast %cst_49 : f32 to vector<64x128xf32>
    %100 = arith.mulf %99, %86 : vector<64x128xf32>
    %cst_50 = arith.constant -0.508334577 : f32
    %101 = vector.broadcast %cst_50 : f32 to vector<64x128xf32>
    %102 = arith.mulf %101, %98 : vector<64x128xf32>
    %103 = arith.addf %100, %102 : vector<64x128xf32>
    %cst_51 = arith.constant -0.508006513 : f32
    %104 = vector.broadcast %cst_51 : f32 to vector<64x128xf32>
    %105 = arith.mulf %104, %9 : vector<64x128xf32>
    %106 = arith.addf %103, %105 : vector<64x128xf32>
    %c6 = arith.constant 6 : index
    %c0_52 = arith.constant 0 : index
    %107 = vector.load %arg7[%c6, %c0_52] : memref<18x128xf32, #tpu.memory_space<vmem>>, vector<1x128xf32>
    %108 = vector.broadcast %107 : vector<1x128xf32> to vector<64x128xf32>
    %109 = arith.addf %106, %108 : vector<64x128xf32>
    %cst_53 = arith.constant 0.000000e+00 : f32
    %110 = vector.broadcast %cst_53 : f32 to vector<64x128xf32>
    %111 = arith.cmpf ogt, %109, %110 : vector<64x128xf32>
    %112 = arith.mulf %3, %109 : vector<64x128xf32>
    %113 = arith.addf %112, %6 : vector<64x128xf32>
    %cst_54 = arith.constant 0.000000e+00 : f32
    %114 = vector.broadcast %cst_54 : f32 to vector<64x128xf32>
    %115 = arith.select %111, %113, %114 : vector<64x128xi1>, vector<64x128xf32>
    %cst_55 = arith.constant -4.59686708 : f32
    %116 = vector.broadcast %cst_55 : f32 to vector<64x128xf32>
    %117 = arith.mulf %116, %115 : vector<64x128xf32>
    %118 = arith.addf %95, %117 : vector<64x128xf32>
    %119 = arith.truncf %115 : vector<64x128xf32> to vector<64x128xbf16>
    %c0_56 = arith.constant 0 : index
    %c0_57 = arith.constant 0 : index
    %120 = vector.load %arg5[%c0_56, %c0_57] : memref<128x128xbf16, #tpu.memory_space<vmem>>, vector<128x128xbf16>
    %cst_58 = arith.constant dense<0.000000e+00> : vector<64x128xf32>
    %121 = tpu.matmul %119, %120, %cst_58 {dimension_numbers = #tpu.dot_dimension_numbers<[1], [0], [0], [1], [0, 0, 1, 1], [], []>} : vector<64x128xbf16>, vector<128x128xbf16>, vector<64x128xf32> -> vector<64x128xf32>
    %cst_59 = arith.constant 1.46921706 : f32
    %122 = vector.broadcast %cst_59 : f32 to vector<64x128xf32>
    %123 = arith.mulf %122, %109 : vector<64x128xf32>
    %cst_60 = arith.constant -0.470023453 : f32
    %124 = vector.broadcast %cst_60 : f32 to vector<64x128xf32>
    %125 = arith.mulf %124, %121 : vector<64x128xf32>
    %126 = arith.addf %123, %125 : vector<64x128xf32>
    %cst_61 = arith.constant -0.469217032 : f32
    %127 = vector.broadcast %cst_61 : f32 to vector<64x128xf32>
    %128 = arith.mulf %127, %9 : vector<64x128xf32>
    %129 = arith.addf %126, %128 : vector<64x128xf32>
    %c7 = arith.constant 7 : index
    %c0_62 = arith.constant 0 : index
    %130 = vector.load %arg7[%c7, %c0_62] : memref<18x128xf32, #tpu.memory_space<vmem>>, vector<1x128xf32>
    %131 = vector.broadcast %130 : vector<1x128xf32> to vector<64x128xf32>
    %132 = arith.addf %129, %131 : vector<64x128xf32>
    %cst_63 = arith.constant 0.000000e+00 : f32
    %133 = vector.broadcast %cst_63 : f32 to vector<64x128xf32>
    %134 = arith.cmpf ogt, %132, %133 : vector<64x128xf32>
    %135 = arith.mulf %3, %132 : vector<64x128xf32>
    %136 = arith.addf %135, %6 : vector<64x128xf32>
    %cst_64 = arith.constant 0.000000e+00 : f32
    %137 = vector.broadcast %cst_64 : f32 to vector<64x128xf32>
    %138 = arith.select %134, %136, %137 : vector<64x128xi1>, vector<64x128xf32>
    %cst_65 = arith.constant -2.95539021 : f32
    %139 = vector.broadcast %cst_65 : f32 to vector<64x128xf32>
    %140 = arith.mulf %139, %138 : vector<64x128xf32>
    %141 = arith.addf %118, %140 : vector<64x128xf32>
    %142 = arith.truncf %138 : vector<64x128xf32> to vector<64x128xbf16>
    %c0_66 = arith.constant 0 : index
    %c0_67 = arith.constant 0 : index
    %143 = vector.load %arg5[%c0_66, %c0_67] : memref<128x128xbf16, #tpu.memory_space<vmem>>, vector<128x128xbf16>
    %cst_68 = arith.constant dense<0.000000e+00> : vector<64x128xf32>
    %144 = tpu.matmul %142, %143, %cst_68 {dimension_numbers = #tpu.dot_dimension_numbers<[1], [0], [0], [1], [0, 0, 1, 1], [], []>} : vector<64x128xbf16>, vector<128x128xbf16>, vector<64x128xf32> -> vector<64x128xf32>
    %cst_69 = arith.constant 1.43042755 : f32
    %145 = vector.broadcast %cst_69 : f32 to vector<64x128xf32>
    %146 = arith.mulf %145, %132 : vector<64x128xf32>
    %cst_70 = arith.constant -0.432253301 : f32
    %147 = vector.broadcast %cst_70 : f32 to vector<64x128xf32>
    %148 = arith.mulf %147, %144 : vector<64x128xf32>
    %149 = arith.addf %146, %148 : vector<64x128xf32>
    %cst_71 = arith.constant -0.430427551 : f32
    %150 = vector.broadcast %cst_71 : f32 to vector<64x128xf32>
    %151 = arith.mulf %150, %9 : vector<64x128xf32>
    %152 = arith.addf %149, %151 : vector<64x128xf32>
    %c8 = arith.constant 8 : index
    %c0_72 = arith.constant 0 : index
    %153 = vector.load %arg7[%c8, %c0_72] : memref<18x128xf32, #tpu.memory_space<vmem>>, vector<1x128xf32>
    %154 = vector.broadcast %153 : vector<1x128xf32> to vector<64x128xf32>
    %155 = arith.addf %152, %154 : vector<64x128xf32>
    %cst_73 = arith.constant 0.000000e+00 : f32
    %156 = vector.broadcast %cst_73 : f32 to vector<64x128xf32>
    %157 = arith.cmpf ogt, %155, %156 : vector<64x128xf32>
    %158 = arith.mulf %3, %155 : vector<64x128xf32>
    %159 = arith.addf %158, %6 : vector<64x128xf32>
    %cst_74 = arith.constant 0.000000e+00 : f32
    %160 = vector.broadcast %cst_74 : f32 to vector<64x128xf32>
    %161 = arith.select %157, %159, %160 : vector<64x128xi1>, vector<64x128xf32>
    %cst_75 = arith.constant -1.94285464 : f32
    %162 = vector.broadcast %cst_75 : f32 to vector<64x128xf32>
    %163 = arith.mulf %162, %161 : vector<64x128xf32>
    %164 = arith.addf %141, %163 : vector<64x128xf32>
    %165 = arith.truncf %161 : vector<64x128xf32> to vector<64x128xbf16>
    %c0_76 = arith.constant 0 : index
    %c0_77 = arith.constant 0 : index
    %166 = vector.load %arg5[%c0_76, %c0_77] : memref<128x128xbf16, #tpu.memory_space<vmem>>, vector<128x128xbf16>
    %cst_78 = arith.constant dense<0.000000e+00> : vector<64x128xf32>
    %167 = tpu.matmul %165, %166, %cst_78 {dimension_numbers = #tpu.dot_dimension_numbers<[1], [0], [0], [1], [0, 0, 1, 1], [], []>} : vector<64x128xbf16>, vector<128x128xbf16>, vector<64x128xf32> -> vector<64x128xf32>
    %cst_79 = arith.constant 1.39163804 : f32
    %168 = vector.broadcast %cst_79 : f32 to vector<64x128xf32>
    %169 = arith.mulf %168, %155 : vector<64x128xf32>
    %cst_80 = arith.constant -0.395448625 : f32
    %170 = vector.broadcast %cst_80 : f32 to vector<64x128xf32>
    %171 = arith.mulf %170, %167 : vector<64x128xf32>
    %172 = arith.addf %169, %171 : vector<64x128xf32>
    %cst_81 = arith.constant -0.391638041 : f32
    %173 = vector.broadcast %cst_81 : f32 to vector<64x128xf32>
    %174 = arith.mulf %173, %9 : vector<64x128xf32>
    %175 = arith.addf %172, %174 : vector<64x128xf32>
    %c9 = arith.constant 9 : index
    %c0_82 = arith.constant 0 : index
    %176 = vector.load %arg7[%c9, %c0_82] : memref<18x128xf32, #tpu.memory_space<vmem>>, vector<1x128xf32>
    %177 = vector.broadcast %176 : vector<1x128xf32> to vector<64x128xf32>
    %178 = arith.addf %175, %177 : vector<64x128xf32>
    %cst_83 = arith.constant 0.000000e+00 : f32
    %179 = vector.broadcast %cst_83 : f32 to vector<64x128xf32>
    %180 = arith.cmpf ogt, %178, %179 : vector<64x128xf32>
    %181 = arith.mulf %3, %178 : vector<64x128xf32>
    %182 = arith.addf %181, %6 : vector<64x128xf32>
    %cst_84 = arith.constant 0.000000e+00 : f32
    %183 = vector.broadcast %cst_84 : f32 to vector<64x128xf32>
    %184 = arith.select %180, %182, %183 : vector<64x128xi1>, vector<64x128xf32>
    %cst_85 = arith.constant -1.30809605 : f32
    %185 = vector.broadcast %cst_85 : f32 to vector<64x128xf32>
    %186 = arith.mulf %185, %184 : vector<64x128xf32>
    %187 = arith.addf %164, %186 : vector<64x128xf32>
    %188 = arith.truncf %184 : vector<64x128xf32> to vector<64x128xbf16>
    %c0_86 = arith.constant 0 : index
    %c0_87 = arith.constant 0 : index
    %189 = vector.load %arg5[%c0_86, %c0_87] : memref<128x128xbf16, #tpu.memory_space<vmem>>, vector<128x128xbf16>
    %cst_88 = arith.constant dense<0.000000e+00> : vector<64x128xf32>
    %190 = tpu.matmul %188, %189, %cst_88 {dimension_numbers = #tpu.dot_dimension_numbers<[1], [0], [0], [1], [0, 0, 1, 1], [], []>} : vector<64x128xbf16>, vector<128x128xbf16>, vector<64x128xf32> -> vector<64x128xf32>
    %cst_89 = arith.constant 1.35284853 : f32
    %191 = vector.broadcast %cst_89 : f32 to vector<64x128xf32>
    %192 = arith.mulf %191, %178 : vector<64x128xf32>
    %cst_90 = arith.constant -0.360195726 : f32
    %193 = vector.broadcast %cst_90 : f32 to vector<64x128xf32>
    %194 = arith.mulf %193, %190 : vector<64x128xf32>
    %195 = arith.addf %192, %194 : vector<64x128xf32>
    %cst_91 = arith.constant -0.35284856 : f32
    %196 = vector.broadcast %cst_91 : f32 to vector<64x128xf32>
    %197 = arith.mulf %196, %9 : vector<64x128xf32>
    %198 = arith.addf %195, %197 : vector<64x128xf32>
    %c10 = arith.constant 10 : index
    %c0_92 = arith.constant 0 : index
    %199 = vector.load %arg7[%c10, %c0_92] : memref<18x128xf32, #tpu.memory_space<vmem>>, vector<1x128xf32>
    %200 = vector.broadcast %199 : vector<1x128xf32> to vector<64x128xf32>
    %201 = arith.addf %198, %200 : vector<64x128xf32>
    %cst_93 = arith.constant 0.000000e+00 : f32
    %202 = vector.broadcast %cst_93 : f32 to vector<64x128xf32>
    %203 = arith.cmpf ogt, %201, %202 : vector<64x128xf32>
    %204 = arith.mulf %3, %201 : vector<64x128xf32>
    %205 = arith.addf %204, %6 : vector<64x128xf32>
    %cst_94 = arith.constant 0.000000e+00 : f32
    %206 = vector.broadcast %cst_94 : f32 to vector<64x128xf32>
    %207 = arith.select %203, %205, %206 : vector<64x128xi1>, vector<64x128xf32>
    %cst_95 = arith.constant -0.904251515 : f32
    %208 = vector.broadcast %cst_95 : f32 to vector<64x128xf32>
    %209 = arith.mulf %208, %207 : vector<64x128xf32>
    %210 = arith.addf %187, %209 : vector<64x128xf32>
    %211 = arith.truncf %207 : vector<64x128xf32> to vector<64x128xbf16>
    %c0_96 = arith.constant 0 : index
    %c0_97 = arith.constant 0 : index
    %212 = vector.load %arg5[%c0_96, %c0_97] : memref<128x128xbf16, #tpu.memory_space<vmem>>, vector<128x128xbf16>
    %cst_98 = arith.constant dense<0.000000e+00> : vector<64x128xf32>
    %213 = tpu.matmul %211, %212, %cst_98 {dimension_numbers = #tpu.dot_dimension_numbers<[1], [0], [0], [1], [0, 0, 1, 1], [], []>} : vector<64x128xbf16>, vector<128x128xbf16>, vector<64x128xf32> -> vector<64x128xf32>
    %cst_99 = arith.constant 1.31405902 : f32
    %214 = vector.broadcast %cst_99 : f32 to vector<64x128xf32>
    %215 = arith.mulf %214, %201 : vector<64x128xf32>
    %cst_100 = arith.constant -0.327192307 : f32
    %216 = vector.broadcast %cst_100 : f32 to vector<64x128xf32>
    %217 = arith.mulf %216, %213 : vector<64x128xf32>
    %218 = arith.addf %215, %217 : vector<64x128xf32>
    %cst_101 = arith.constant -0.314059079 : f32
    %219 = vector.broadcast %cst_101 : f32 to vector<64x128xf32>
    %220 = arith.mulf %219, %9 : vector<64x128xf32>
    %221 = arith.addf %218, %220 : vector<64x128xf32>
    %c11 = arith.constant 11 : index
    %c0_102 = arith.constant 0 : index
    %222 = vector.load %arg7[%c11, %c0_102] : memref<18x128xf32, #tpu.memory_space<vmem>>, vector<1x128xf32>
    %223 = vector.broadcast %222 : vector<1x128xf32> to vector<64x128xf32>
    %224 = arith.addf %221, %223 : vector<64x128xf32>
    %cst_103 = arith.constant 0.000000e+00 : f32
    %225 = vector.broadcast %cst_103 : f32 to vector<64x128xf32>
    %226 = arith.cmpf ogt, %224, %225 : vector<64x128xf32>
    %227 = arith.mulf %3, %224 : vector<64x128xf32>
    %228 = arith.addf %227, %6 : vector<64x128xf32>
    %cst_104 = arith.constant 0.000000e+00 : f32
    %229 = vector.broadcast %cst_104 : f32 to vector<64x128xf32>
    %230 = arith.select %226, %228, %229 : vector<64x128xi1>, vector<64x128xf32>
    %cst_105 = arith.constant -0.643951416 : f32
    %231 = vector.broadcast %cst_105 : f32 to vector<64x128xf32>
    %232 = arith.mulf %231, %230 : vector<64x128xf32>
    %233 = arith.addf %210, %232 : vector<64x128xf32>
    %234 = arith.truncf %230 : vector<64x128xf32> to vector<64x128xbf16>
    %c0_106 = arith.constant 0 : index
    %c0_107 = arith.constant 0 : index
    %235 = vector.load %arg5[%c0_106, %c0_107] : memref<128x128xbf16, #tpu.memory_space<vmem>>, vector<128x128xbf16>
    %cst_108 = arith.constant dense<0.000000e+00> : vector<64x128xf32>
    %236 = tpu.matmul %234, %235, %cst_108 {dimension_numbers = #tpu.dot_dimension_numbers<[1], [0], [0], [1], [0, 0, 1, 1], [], []>} : vector<64x128xbf16>, vector<128x128xbf16>, vector<64x128xf32> -> vector<64x128xf32>
    %cst_109 = arith.constant 1.27526963 : f32
    %237 = vector.broadcast %cst_109 : f32 to vector<64x128xf32>
    %238 = arith.mulf %237, %224 : vector<64x128xf32>
    %cst_110 = arith.constant -0.297145337 : f32
    %239 = vector.broadcast %cst_110 : f32 to vector<64x128xf32>
    %240 = arith.mulf %239, %236 : vector<64x128xf32>
    %241 = arith.addf %238, %240 : vector<64x128xf32>
    %cst_111 = arith.constant -0.275269568 : f32
    %242 = vector.broadcast %cst_111 : f32 to vector<64x128xf32>
    %243 = arith.mulf %242, %9 : vector<64x128xf32>
    %244 = arith.addf %241, %243 : vector<64x128xf32>
    %c12 = arith.constant 12 : index
    %c0_112 = arith.constant 0 : index
    %245 = vector.load %arg7[%c12, %c0_112] : memref<18x128xf32, #tpu.memory_space<vmem>>, vector<1x128xf32>
    %246 = vector.broadcast %245 : vector<1x128xf32> to vector<64x128xf32>
    %247 = arith.addf %244, %246 : vector<64x128xf32>
    %cst_113 = arith.constant 0.000000e+00 : f32
    %248 = vector.broadcast %cst_113 : f32 to vector<64x128xf32>
    %249 = arith.cmpf ogt, %247, %248 : vector<64x128xf32>
    %250 = arith.mulf %3, %247 : vector<64x128xf32>
    %251 = arith.addf %250, %6 : vector<64x128xf32>
    %cst_114 = arith.constant 0.000000e+00 : f32
    %252 = vector.broadcast %cst_114 : f32 to vector<64x128xf32>
    %253 = arith.select %249, %251, %252 : vector<64x128xi1>, vector<64x128xf32>
    %cst_115 = arith.constant -0.474363387 : f32
    %254 = vector.broadcast %cst_115 : f32 to vector<64x128xf32>
    %255 = arith.mulf %254, %253 : vector<64x128xf32>
    %256 = arith.addf %233, %255 : vector<64x128xf32>
    %257 = arith.truncf %253 : vector<64x128xf32> to vector<64x128xbf16>
    %c0_116 = arith.constant 0 : index
    %c0_117 = arith.constant 0 : index
    %258 = vector.load %arg5[%c0_116, %c0_117] : memref<128x128xbf16, #tpu.memory_space<vmem>>, vector<128x128xbf16>
    %cst_118 = arith.constant dense<0.000000e+00> : vector<64x128xf32>
    %259 = tpu.matmul %257, %258, %cst_118 {dimension_numbers = #tpu.dot_dimension_numbers<[1], [0], [0], [1], [0, 0, 1, 1], [], []>} : vector<64x128xbf16>, vector<128x128xbf16>, vector<64x128xf32> -> vector<64x128xf32>
    %cst_119 = arith.constant 1.23648012 : f32
    %260 = vector.broadcast %cst_119 : f32 to vector<64x128xf32>
    %261 = arith.mulf %260, %247 : vector<64x128xf32>
    %cst_120 = arith.constant -0.270653784 : f32
    %262 = vector.broadcast %cst_120 : f32 to vector<64x128xf32>
    %263 = arith.mulf %262, %259 : vector<64x128xf32>
    %264 = arith.addf %261, %263 : vector<64x128xf32>
    %cst_121 = arith.constant -0.236480087 : f32
    %265 = vector.broadcast %cst_121 : f32 to vector<64x128xf32>
    %266 = arith.mulf %265, %9 : vector<64x128xf32>
    %267 = arith.addf %264, %266 : vector<64x128xf32>
    %c13 = arith.constant 13 : index
    %c0_122 = arith.constant 0 : index
    %268 = vector.load %arg7[%c13, %c0_122] : memref<18x128xf32, #tpu.memory_space<vmem>>, vector<1x128xf32>
    %269 = vector.broadcast %268 : vector<1x128xf32> to vector<64x128xf32>
    %270 = arith.addf %267, %269 : vector<64x128xf32>
    %cst_123 = arith.constant 0.000000e+00 : f32
    %271 = vector.broadcast %cst_123 : f32 to vector<64x128xf32>
    %272 = arith.cmpf ogt, %270, %271 : vector<64x128xf32>
    %273 = arith.mulf %3, %270 : vector<64x128xf32>
    %274 = arith.addf %273, %6 : vector<64x128xf32>
    %cst_124 = arith.constant 0.000000e+00 : f32
    %275 = vector.broadcast %cst_124 : f32 to vector<64x128xf32>
    %276 = arith.select %272, %274, %275 : vector<64x128xi1>, vector<64x128xf32>
    %cst_125 = arith.constant -0.363098025 : f32
    %277 = vector.broadcast %cst_125 : f32 to vector<64x128xf32>
    %278 = arith.mulf %277, %276 : vector<64x128xf32>
    %279 = arith.addf %256, %278 : vector<64x128xf32>
    %280 = arith.truncf %276 : vector<64x128xf32> to vector<64x128xbf16>
    %c0_126 = arith.constant 0 : index
    %c0_127 = arith.constant 0 : index
    %281 = vector.load %arg5[%c0_126, %c0_127] : memref<128x128xbf16, #tpu.memory_space<vmem>>, vector<128x128xbf16>
    %cst_128 = arith.constant dense<0.000000e+00> : vector<64x128xf32>
    %282 = tpu.matmul %280, %281, %cst_128 {dimension_numbers = #tpu.dot_dimension_numbers<[1], [0], [0], [1], [0, 0, 1, 1], [], []>} : vector<64x128xbf16>, vector<128x128xbf16>, vector<64x128xf32> -> vector<64x128xf32>
    %cst_129 = arith.constant 1.19769061 : f32
    %283 = vector.broadcast %cst_129 : f32 to vector<64x128xf32>
    %284 = arith.mulf %283, %270 : vector<64x128xf32>
    %cst_130 = arith.constant -0.248125553 : f32
    %285 = vector.broadcast %cst_130 : f32 to vector<64x128xf32>
    %286 = arith.mulf %285, %282 : vector<64x128xf32>
    %287 = arith.addf %284, %286 : vector<64x128xf32>
    %cst_131 = arith.constant -0.197690591 : f32
    %288 = vector.broadcast %cst_131 : f32 to vector<64x128xf32>
    %289 = arith.mulf %288, %9 : vector<64x128xf32>
    %290 = arith.addf %287, %289 : vector<64x128xf32>
    %c14 = arith.constant 14 : index
    %c0_132 = arith.constant 0 : index
    %291 = vector.load %arg7[%c14, %c0_132] : memref<18x128xf32, #tpu.memory_space<vmem>>, vector<1x128xf32>
    %292 = vector.broadcast %291 : vector<1x128xf32> to vector<64x128xf32>
    %293 = arith.addf %290, %292 : vector<64x128xf32>
    %cst_133 = arith.constant 0.000000e+00 : f32
    %294 = vector.broadcast %cst_133 : f32 to vector<64x128xf32>
    %295 = arith.cmpf ogt, %293, %294 : vector<64x128xf32>
    %296 = arith.mulf %3, %293 : vector<64x128xf32>
    %297 = arith.addf %296, %6 : vector<64x128xf32>
    %cst_134 = arith.constant 0.000000e+00 : f32
    %298 = vector.broadcast %cst_134 : f32 to vector<64x128xf32>
    %299 = arith.select %295, %297, %298 : vector<64x128xi1>, vector<64x128xf32>
    %cst_135 = arith.constant -0.290119529 : f32
    %300 = vector.broadcast %cst_135 : f32 to vector<64x128xf32>
    %301 = arith.mulf %300, %299 : vector<64x128xf32>
    %302 = arith.addf %279, %301 : vector<64x128xf32>
    %303 = arith.truncf %299 : vector<64x128xf32> to vector<64x128xbf16>
    %c0_136 = arith.constant 0 : index
    %c0_137 = arith.constant 0 : index
    %304 = vector.load %arg5[%c0_136, %c0_137] : memref<128x128xbf16, #tpu.memory_space<vmem>>, vector<128x128xbf16>
    %cst_138 = arith.constant dense<0.000000e+00> : vector<64x128xf32>
    %305 = tpu.matmul %303, %304, %cst_138 {dimension_numbers = #tpu.dot_dimension_numbers<[1], [0], [0], [1], [0, 0, 1, 1], [], []>} : vector<64x128xbf16>, vector<128x128xbf16>, vector<64x128xf32> -> vector<64x128xf32>
    %cst_139 = arith.constant 1.1589011 : f32
    %306 = vector.broadcast %cst_139 : f32 to vector<64x128xf32>
    %307 = arith.mulf %306, %293 : vector<64x128xf32>
    %cst_140 = arith.constant -0.229758158 : f32
    %308 = vector.broadcast %cst_140 : f32 to vector<64x128xf32>
    %309 = arith.mulf %308, %305 : vector<64x128xf32>
    %310 = arith.addf %307, %309 : vector<64x128xf32>
    %cst_141 = arith.constant -0.158901095 : f32
    %311 = vector.broadcast %cst_141 : f32 to vector<64x128xf32>
    %312 = arith.mulf %311, %9 : vector<64x128xf32>
    %313 = arith.addf %310, %312 : vector<64x128xf32>
    %c15 = arith.constant 15 : index
    %c0_142 = arith.constant 0 : index
    %314 = vector.load %arg7[%c15, %c0_142] : memref<18x128xf32, #tpu.memory_space<vmem>>, vector<1x128xf32>
    %315 = vector.broadcast %314 : vector<1x128xf32> to vector<64x128xf32>
    %316 = arith.addf %313, %315 : vector<64x128xf32>
    %cst_143 = arith.constant 0.000000e+00 : f32
    %317 = vector.broadcast %cst_143 : f32 to vector<64x128xf32>
    %318 = arith.cmpf ogt, %316, %317 : vector<64x128xf32>
    %319 = arith.mulf %3, %316 : vector<64x128xf32>
    %320 = arith.addf %319, %6 : vector<64x128xf32>
    %cst_144 = arith.constant 0.000000e+00 : f32
    %321 = vector.broadcast %cst_144 : f32 to vector<64x128xf32>
    %322 = arith.select %318, %320, %321 : vector<64x128xi1>, vector<64x128xf32>
    %cst_145 = arith.constant -0.243026763 : f32
    %323 = vector.broadcast %cst_145 : f32 to vector<64x128xf32>
    %324 = arith.mulf %323, %322 : vector<64x128xf32>
    %325 = arith.addf %302, %324 : vector<64x128xf32>
    %326 = arith.truncf %322 : vector<64x128xf32> to vector<64x128xbf16>
    %c0_146 = arith.constant 0 : index
    %c0_147 = arith.constant 0 : index
    %327 = vector.load %arg5[%c0_146, %c0_147] : memref<128x128xbf16, #tpu.memory_space<vmem>>, vector<128x128xbf16>
    %cst_148 = arith.constant dense<0.000000e+00> : vector<64x128xf32>
    %328 = tpu.matmul %326, %327, %cst_148 {dimension_numbers = #tpu.dot_dimension_numbers<[1], [0], [0], [1], [0, 0, 1, 1], [], []>} : vector<64x128xbf16>, vector<128x128xbf16>, vector<64x128xf32> -> vector<64x128xf32>
    %cst_149 = arith.constant 1.12011158 : f32
    %329 = vector.broadcast %cst_149 : f32 to vector<64x128xf32>
    %330 = arith.mulf %329, %316 : vector<64x128xf32>
    %cst_150 = arith.constant -0.215580434 : f32
    %331 = vector.broadcast %cst_150 : f32 to vector<64x128xf32>
    %332 = arith.mulf %331, %328 : vector<64x128xf32>
    %333 = arith.addf %330, %332 : vector<64x128xf32>
    %cst_151 = arith.constant -0.120111607 : f32
    %334 = vector.broadcast %cst_151 : f32 to vector<64x128xf32>
    %335 = arith.mulf %334, %9 : vector<64x128xf32>
    %336 = arith.addf %333, %335 : vector<64x128xf32>
    %c16 = arith.constant 16 : index
    %c0_152 = arith.constant 0 : index
    %337 = vector.load %arg7[%c16, %c0_152] : memref<18x128xf32, #tpu.memory_space<vmem>>, vector<1x128xf32>
    %338 = vector.broadcast %337 : vector<1x128xf32> to vector<64x128xf32>
    %339 = arith.addf %336, %338 : vector<64x128xf32>
    %cst_153 = arith.constant 0.000000e+00 : f32
    %340 = vector.broadcast %cst_153 : f32 to vector<64x128xf32>
    %341 = arith.cmpf ogt, %339, %340 : vector<64x128xf32>
    %342 = arith.mulf %3, %339 : vector<64x128xf32>
    %343 = arith.addf %342, %6 : vector<64x128xf32>
    %cst_154 = arith.constant 0.000000e+00 : f32
    %344 = vector.broadcast %cst_154 : f32 to vector<64x128xf32>
    %345 = arith.select %341, %343, %344 : vector<64x128xi1>, vector<64x128xf32>
    %cst_155 = arith.constant -0.214283347 : f32
    %346 = vector.broadcast %cst_155 : f32 to vector<64x128xf32>
    %347 = arith.mulf %346, %345 : vector<64x128xf32>
    %348 = arith.addf %325, %347 : vector<64x128xf32>
    %349 = arith.truncf %345 : vector<64x128xf32> to vector<64x128xbf16>
    %c0_156 = arith.constant 0 : index
    %c0_157 = arith.constant 0 : index
    %350 = vector.load %arg5[%c0_156, %c0_157] : memref<128x128xbf16, #tpu.memory_space<vmem>>, vector<128x128xbf16>
    %cst_158 = arith.constant dense<0.000000e+00> : vector<64x128xf32>
    %351 = tpu.matmul %349, %350, %cst_158 {dimension_numbers = #tpu.dot_dimension_numbers<[1], [0], [0], [1], [0, 0, 1, 1], [], []>} : vector<64x128xbf16>, vector<128x128xbf16>, vector<64x128xf32> -> vector<64x128xf32>
    %cst_159 = arith.constant 1.08132207 : f32
    %352 = vector.broadcast %cst_159 : f32 to vector<64x128xf32>
    %353 = arith.mulf %352, %339 : vector<64x128xf32>
    %cst_160 = arith.constant -0.205541134 : f32
    %354 = vector.broadcast %cst_160 : f32 to vector<64x128xf32>
    %355 = arith.mulf %354, %351 : vector<64x128xf32>
    %356 = arith.addf %353, %355 : vector<64x128xf32>
    %cst_161 = arith.constant -0.0813221111 : f32
    %357 = vector.broadcast %cst_161 : f32 to vector<64x128xf32>
    %358 = arith.mulf %357, %9 : vector<64x128xf32>
    %359 = arith.addf %356, %358 : vector<64x128xf32>
    %c17 = arith.constant 17 : index
    %c0_162 = arith.constant 0 : index
    %360 = vector.load %arg7[%c17, %c0_162] : memref<18x128xf32, #tpu.memory_space<vmem>>, vector<1x128xf32>
    %361 = vector.broadcast %360 : vector<1x128xf32> to vector<64x128xf32>
    %362 = arith.addf %359, %361 : vector<64x128xf32>
    %cst_163 = arith.constant 0.000000e+00 : f32
    %363 = vector.broadcast %cst_163 : f32 to vector<64x128xf32>
    %364 = arith.cmpf ogt, %362, %363 : vector<64x128xf32>
    %365 = arith.mulf %3, %362 : vector<64x128xf32>
    %366 = arith.addf %365, %6 : vector<64x128xf32>
    %cst_164 = arith.constant 0.000000e+00 : f32
    %367 = vector.broadcast %cst_164 : f32 to vector<64x128xf32>
    %368 = arith.select %364, %366, %367 : vector<64x128xi1>, vector<64x128xf32>
    %cst_165 = arith.constant -0.199777648 : f32
    %369 = vector.broadcast %cst_165 : f32 to vector<64x128xf32>
    %370 = arith.mulf %369, %368 : vector<64x128xf32>
    %371 = arith.addf %348, %370 : vector<64x128xf32>
    %cst_166 = arith.constant 86.3257904 : f32
    %372 = vector.broadcast %cst_166 : f32 to vector<64x8xf32>
    %373 = arith.mulf %372, %0 : vector<64x8xf32>
    %374 = arith.truncf %371 : vector<64x128xf32> to vector<64x128xbf16>
    %c0_167 = arith.constant 0 : index
    %c0_168 = arith.constant 0 : index
    %375 = vector.load %arg6[%c0_167, %c0_168] : memref<128x8xbf16, #tpu.memory_space<vmem>>, vector<128x8xbf16>
    %cst_169 = arith.constant dense<0.000000e+00> : vector<64x8xf32>
    %376 = tpu.matmul %374, %375, %cst_169 {dimension_numbers = #tpu.dot_dimension_numbers<[1], [0], [0], [1], [0, 0, 1, 1], [], []>} : vector<64x128xbf16>, vector<128x8xbf16>, vector<64x8xf32> -> vector<64x8xf32>
    %377 = arith.addf %373, %376 : vector<64x8xf32>
    %c0_170 = arith.constant 0 : index
    %c0_171 = arith.constant 0 : index
    %378 = vector.load %arg8[%c0_170, %c0_171] : memref<1x8xf32, #tpu.memory_space<vmem>>, vector<1x8xf32>
    %379 = vector.broadcast %378 : vector<1x8xf32> to vector<64x8xf32>
    %380 = arith.addf %377, %379 : vector<64x8xf32>
    %c0_172 = arith.constant 0 : index
    %c0_173 = arith.constant 0 : index
    %381 = vector.load %arg9[%c0_172, %c0_173] : memref<64x8xf32, #tpu.memory_space<vmem>>, vector<64x8xf32>
    tpu.vector_store %arg9[%c0_172, %c0_173], %380 {strides = array<i32>} : memref<64x8xf32, #tpu.memory_space<vmem>>, vector<64x8xf32>,
    return
  }
  func.func @transform_0(%arg0: i32) -> (i32, i32) {
    %c0_i32 = arith.constant 0 : i32
    %c0_i32_0 = arith.constant 0 : i32
    return %arg0, %c0_i32 : i32, i32
  }
  func.func @transform_1(%arg0: i32) -> (i32, i32) {
    %c0_i32 = arith.constant 0 : i32
    %c0_i32_0 = arith.constant 0 : i32
    return %arg0, %c0_i32 : i32, i32
  }
  func.func @transform_2(%arg0: i32) -> (i32, i32) {
    %c0_i32 = arith.constant 0 : i32
    %c0_i32_0 = arith.constant 0 : i32
    %c0_i32_1 = arith.constant 0 : i32
    return %c0_i32, %c0_i32_0 : i32, i32
  }
  func.func @transform_3(%arg0: i32) -> (i32, i32) {
    %c0_i32 = arith.constant 0 : i32
    %c0_i32_0 = arith.constant 0 : i32
    %c0_i32_1 = arith.constant 0 : i32
    return %c0_i32, %c0_i32_0 : i32, i32
  }
  func.func @transform_4(%arg0: i32) -> (i32, i32) {
    %c0_i32 = arith.constant 0 : i32
    %c0_i32_0 = arith.constant 0 : i32
    %c0_i32_1 = arith.constant 0 : i32
    return %c0_i32, %c0_i32_0 : i32, i32
  }
  func.func @transform_5(%arg0: i32) -> (i32, i32) {
    %c0_i32 = arith.constant 0 : i32
    %c0_i32_0 = arith.constant 0 : i32
    %c0_i32_1 = arith.constant 0 : i32
    return %c0_i32, %c0_i32_0 : i32, i32
  }
  func.func @transform_6(%arg0: i32) -> (i32, i32) {
    %c0_i32 = arith.constant 0 : i32
    %c0_i32_0 = arith.constant 0 : i32
    %c0_i32_1 = arith.constant 0 : i32
    return %c0_i32, %c0_i32_0 : i32, i32
  }
  func.func @transform_7(%arg0: i32) -> (i32, i32) {
    %c0_i32 = arith.constant 0 : i32
    %c0_i32_0 = arith.constant 0 : i32
    %c0_i32_1 = arith.constant 0 : i32
    return %c0_i32, %c0_i32_0 : i32, i32
  }
  func.func @transform_8(%arg0: i32) -> (i32, i32) {
    %c0_i32 = arith.constant 0 : i32
    %c0_i32_0 = arith.constant 0 : i32
    return %arg0, %c0_i32 : i32, i32
  }
}

</mosaic_0001>

<bundles_post_ra>
// kernel: tpu_custom_call.1
= control target key start
LH: loop header
LB: loop body
LE: loop exit
PB: predicated region body
PF: predicated region fallthrough
CT: control target
= control target key end

     0   :  { %s4434_s27 = smov 0   ;;  %s7287_s0 = inlined_call_operand.vmem [shape: f32[128,8], index: 0, kind: input, shape index: {}]   ;;  %s7288_s1 = inlined_call_operand.vmem [shape: bf16[128,16], index: 1, kind: input, shape index: {}]   ;;  %s7289_s2 = inlined_call_operand.vmem [shape: bf16[8,128], index: 2, kind: input, shape index: {}]   ;;  %s7290_s3 = inlined_call_operand.vmem [shape: bf16[16,128], index: 3, kind: input, shape index: {}]   ;;  %s7291_s4 = inlined_call_operand.vmem [shape: bf16[128,128], index: 4, kind: input, shape index: {}]   ;;  %s7292_s5 = inlined_call_operand.vmem [shape: bf16[128,8], index: 5, kind: input, shape index: {}]   ;;  %s7293_s6 = inlined_call_operand.vmem [shape: f32[18,128], index: 6, kind: input, shape index: {}]   ;;  %s7294_s7 = inlined_call_operand.vmem [shape: f32[1,8], index: 7, kind: input, shape index: {}]   ;;  %s7295_s8 = inlined_call_operand.vmem [shape: f32[128,8], index: 8, kind: output, shape index: {}]  }
   0x1 LB: > { %s3466_s28 = sadd.s32 4294967295, %s4387_s27   ;;  %p3470_p0 = scmp.ge.s32.totalorder %s4387_s27, 1  ;;  %s4387_s27 = sphi %s4434_s27, %s18_s27  }
   0x2   : > { %p274_p1 = scmp.lt.s32.totalorder %s4387_s27, 3 }
   0x4   : > { %p275_p2 = pnand %p3470_p0, %p274_p1 }
   0x5   : > { %s3471_s11 = sshll.u32 (!%p275_p2), %s3466_s28, 3 }
   0x6   : > { %278 = sbr.rel (%p275_p2) target bundleno = 3673 (0xe59), region = 52  ;;  %p314_p3 = scmp.lt.s32.totalorder (!%p275_p2), %s3471_s11, 15 }
   0xb   : > { %v4322_v0 = vld [vmem:[%s7290_s3] sm:$0xff]   ;;  %vm482_vm0 = vcmask 1043456   ;;  %v4451_v2 = vld [vmem:[%s7291_s4 + $0x38] sm:$0xff]   ;;  %s7405_s11 = smov (!%p314_p3, %s3471_s11), 15  ;;  %vm386_vm1 = vcmask 130048   ;;  %vm469_vm2 = vcmask 64512  }
   0xc   : > { %v468_v1 = vld [vmem:[%s7289_s2] sm:$0xf]  ;;  %3909 = vmatprep.subr.bf16.mxu0 %v4322_v0  ;;  %s3474_s14 = sshll.u32 %s7405_s11, 2  ;;  %s3472_s15 = sshll.u32 %s7405_s11, 3  ;;  %v4474_v7 = vld [vmem:[%s7291_s4 + $0x30] sm:$0xff]   ;;  %v4487_v17 = vld [vmem:[%s7291_s4 + $0x28] sm:$0xff]  }
   0xd   : > { %4313 = vmatprep.subr.msk.bf16.mxu1 %vm482_vm0, %v468_v1  ;;  %v484_v3 = vsel %vm482_vm0, %v468_v1, 0  ;;  %3910 = vmatpush3.bf16.msra.mxu0 %v4322_v0  ;;  %s323_s18 = scalar_lea.vmem %s7288_s1, %s3474_s14  ;;  %s4467_s21 = scalar_lea.vmem %s7287_s0, %s3472_s15  ;;  %v4498_v21 = vld [vmem:[%s7291_s4 + $0x20] sm:$0xff]   ;;  %v4517_v23 = vld [vmem:[%s7291_s4 + $0x18] sm:$0xff]   ;;  %v4526_v24 = vld [vmem:[%s7291_s4 + $0x10] sm:$0xff]  }
   0xe   : > { %3920 = vmatpush3.bf16.msra.mxu1 %v484_v3  ;;  %3929 = vmatprep.subr.bf16.mxu0 %v4451_v2  ;;  %v4323_v4 = vld [vmem:[%s323_s18] sm:$0xff]   ;;  %v333_v6 = vld [vmem:[%s4467_s21 + $0x8] sm:$0xff]  ;;  %v334_v10 = vld [vmem:[%s4467_s21 + $0x10] sm:$0xff]  ;;  %s7261_s26 = scalar_lea.vmem %s7295_s8, %s3472_s15 }
   0xf   : > { %3953 = vmatprep.subr.bf16.mxu1 %v4451_v2  ;;  %v332_v5 = vld [vmem:[%s4467_s21] sm:$0xff]  ;;  %3911 = vmatprep.mubr.msk.bf16.mxu0 %vm386_vm1, %v4323_v4  ;;  %v4324_v9 = vld [vmem:[%s323_s18 + $0x8] sm:$0xff]   ;;  %v335_v11 = vld [vmem:[%s4467_s21 + $0x18] sm:$0xff] }
  0x10   : > { %v464_v8 = vpack.c.bf16 %v333_v6, %v332_v5  ;;  %3912 = vmatmul.mubr.msk.bf16.vlgmr.msra.gmra.mxu0 %vm386_vm1, %v4324_v9  ;;  %v465_v12 = vpack.c.bf16 %v335_v11, %v334_v10  ;;  %v4325_v13 = vld [vmem:[%s323_s18 + $0x10] sm:$0xff]   ;;  %v336_v14 = vld [vmem:[%s4467_s21 + $0x20] sm:$0xff]  ;;  %v337_v15 = vld [vmem:[%s4467_s21 + $0x28] sm:$0xff] }
  0x11   : > { %v466_v16 = vpack.c.bf16 %v337_v15, %v336_v14  ;;  %3930 = vmatpush3.bf16.msra.mxu0 %v4451_v2  ;;  %3915 = vmatprep.mubr.msk.bf16.mxu0 %vm386_vm1, %v4325_v13  ;;  %v4326_v18 = vld [vmem:[%s323_s18 + $0x18] sm:$0xff]   ;;  %v338_v19 = vld [vmem:[%s4467_s21 + $0x30] sm:$0xff]  ;;  %v4535_v25 = vld [vmem:[%s7291_s4 + $0x8] sm:$0xff]  }
  0x12   : > { %3921 = vmatprep.mubr.msk.bf16.mxu1 %vm469_vm2, %v464_v8  ;;  %v339_v20 = vld [vmem:[%s4467_s21 + $0x38] sm:$0xff]  ;;  %3931 = vmatprep.subr.bf16.mxu0 %v4474_v7  ;;  %v4544_v26 = vld [vmem:[%s7291_s4] sm:$0xff]  }
  0x13   : > { %3922 = vmatmul.mubr.msk.bf16.vlgmr.msra.gmra.mxu1 %vm469_vm2, %v465_v12  ;;  %v467_v22 = vpack.c.bf16 %v339_v20, %v338_v19  ;;  %v3492_v29 = vld [vmem:[%s7293_s6 + $0x2] ss:$0 sm:$0xff]  ;;  %v4563_v32 = vld [vmem:[%s7293_s6] ss:$0 sm:$0xff]  ;;  %v4573_v37 = vld [vmem:[%s7293_s6 + $0x1] ss:$0 sm:$0xff] }
  0x14   : > { %3925 = vmatprep.mubr.msk.bf16.mxu1 %vm469_vm2, %v466_v16  ;;  %3954 = vmatpush3.bf16.msra.mxu1 %v4451_v2 }
  0x15   : > { %3932 = vmatpush3.bf16.msra.mxu0 %v4474_v7  ;;  %3955 = vmatprep.subr.bf16.mxu1 %v4474_v7 }
  0x16   : > { %3933 = vmatprep.subr.bf16.mxu0 %v4487_v17 }
  0x18   : > { %3916 = vmatmul.mubr.msk.bf16.gmra.mxu0 %vm386_vm1, %v4326_v18  ;;  %3956 = vmatpush3.bf16.msra.mxu1 %v4474_v7 }
  0x19   : > { %3934 = vmatpush3.bf16.msra.mxu0 %v4487_v17  ;;  %3957 = vmatprep.subr.bf16.mxu1 %v4487_v17 }
  0x1a   : > { %3935 = vmatprep.subr.bf16.mxu0 %v4498_v21 }
  0x1b   : > { %3926 = vmatmul.mubr.msk.bf16.gmra.mxu1 %vm469_vm2, %v467_v22 }
  0x1c   : > { %3958 = vmatpush3.bf16.msra.mxu1 %v4487_v17 }
  0x1d   : > { %3936 = vmatpush3.bf16.msra.mxu0 %v4498_v21  ;;  %3959 = vmatprep.subr.bf16.mxu1 %v4498_v21 }
  0x1e   : > { %3937 = vmatprep.subr.bf16.mxu0 %v4517_v23 }
  0x20   : > { %3960 = vmatpush3.bf16.msra.mxu1 %v4498_v21 }
  0x21   : > { %3961 = vmatprep.subr.bf16.mxu1 %v4517_v23  ;;  %3938 = vmatpush3.bf16.msra.mxu0 %v4517_v23 }
  0x22   : > { %3939 = vmatprep.subr.bf16.mxu0 %v4526_v24 }
  0x24   : > { %3962 = vmatpush3.bf16.msra.mxu1 %v4517_v23 }
  0x25   : > { %3963 = vmatprep.subr.bf16.mxu1 %v4526_v24  ;;  %3940 = vmatpush3.bf16.msra.mxu0 %v4526_v24 }
  0x26   : > { %3941 = vmatprep.subr.bf16.mxu0 %v4535_v25 }
  0x28   : > { %3964 = vmatpush3.bf16.msra.mxu1 %v4526_v24 }
  0x29   : > { %3965 = vmatprep.subr.bf16.mxu1 %v4535_v25  ;;  %3942 = vmatpush3.bf16.msra.mxu0 %v4535_v25 }
  0x2a   : > { %3943 = vmatprep.subr.bf16.mxu0 %v4544_v26 }
  0x2c   : > { %3966 = vmatpush3.bf16.msra.mxu1 %v4535_v25 }
  0x2d   : > { %3967 = vmatprep.subr.bf16.mxu1 %v4544_v26  ;;  %3944 = vmatpush3.bf16.msra.mxu0 %v4544_v26 }
  0x2e   : > { %3977 = vmatprep.subr.bf16.mxu0 %v4451_v2 }
  0x30   : > { %3968 = vmatpush3.bf16.msra.mxu1 %v4544_v26 }
  0x31   : > { %4001 = vmatprep.subr.bf16.mxu1 %v4451_v2 }
  0xd0   : > { %v4552_v27 = vpop.f32.mrf.mxu0 }
  0xd2   : > { %v4557_v30 = vpop.f32.mrf.mxu0 }
  0xd3   : > { %v3923_v28 = vpop.f32.mrf.mxu1 }
  0xd4   : > { %v529_v31 = vadd.f32 %v3923_v28, %v4552_v27  ;;  %v4565_v34 = vpop.f32.mrf.mxu0 }
  0xd5   : > { %v520_v33 = vpop.f32.mrf.mxu1 }
  0xd6   : > { %v4567_v35 = vadd.f32 %v3492_v29, %v529_v31  ;;  %v521_v36 = vadd.f32 %v520_v33, %v4557_v30  ;;  %v4575_v39 = vpop.f32.mrf.mxu0 }
  0xd7   : > { %v3924_v38 = vpop.f32.mrf.mxu1 }
  0xd8   : > { %v574_v40 = vmul.f32 %v4563_v32, %v4567_v35  ;;  %v4579_v41 = vadd.f32 %v3492_v29, %v521_v36  ;;  %v532_v42 = vadd.f32 %v3924_v38, %v4565_v34  ;;  %v4582_v44 = vpop.f32.mrf.mxu0  ;;  %vm566_vm3 = vcmp.gt.f32.partialorder %v4567_v35, 0.0 }
  0xd9   : > { %v523_v43 = vpop.f32.mrf.mxu1 }
  0xda   : > { %v582_v45 = vadd.f32 %v4573_v37, %v574_v40  ;;  %v572_v46 = vmul.f32 %v4563_v32, %v4579_v41  ;;  %v4587_v47 = vadd.f32 %v3492_v29, %v532_v42  ;;  %v524_v48 = vadd.f32 %v523_v43, %v4575_v39  ;;  %v4591_v50 = vpop.f32.mrf.mxu0 }
  0xdb   : > { %v3927_v49 = vpop.f32.mrf.mxu1  ;;  %vm564_vm4 = vcmp.gt.f32.partialorder %v4579_v41, 0.0  ;;  %v771_v43 = vmul.f32 -0.624375, %v4552_v27 }
  0xdc   : > { %v4595_v51 = vsel %vm566_vm3, %v582_v45, 0.0  ;;  %v575_v52 = vmul.f32 %v4563_v32, %v4587_v47  ;;  %v4599_v53 = vadd.f32 %v3492_v29, %v524_v48  ;;  %v545_v54 = vadd.f32 %v3927_v49, %v4582_v44  ;;  %v4602_v56 = vpop.f32.mrf.mxu0 }
  0xdd   : > { %v536_v55 = vpop.f32.mrf.mxu1  ;;  %v580_v57 = vadd.f32 %v4573_v37, %v572_v46  ;;  %vm567_vm5 = vcmp.gt.f32.partialorder %v4587_v47, 0.0  ;;  %v747_v46 = vmul.f32 1.624375, %v4567_v35  ;;  %v772_v49 = vmul.f32 -0.624375, %v4565_v34 }
  0xde   : > { %v583_v58 = vadd.f32 %v4573_v37, %v575_v52  ;;  %v573_v59 = vmul.f32 %v4563_v32, %v4599_v53  ;;  %v537_v60 = vadd.f32 %v536_v55, %v4591_v50  ;;  %v4611_v61 = vadd.f32 %v3492_v29, %v545_v54  ;;  %v4613_v63 = vpop.f32.mrf.mxu0  ;;  %vm3504_vm9 = vmpackc.low %vm567_vm5, %vm566_vm3  ;;  %v4699_v35 = vld [vmem:[%s7293_s6 + $0x3] ss:$0 sm:$0xff] }
  0xdf   : > { %v3928_v62 = vpop.f32.mrf.mxu1  ;;  %v4617_v0 = vsel %vm564_vm4, %v580_v57, 0.0  ;;  %vm565_vm6 = vcmp.gt.f32.partialorder %v4599_v53, 0.0  ;;  %v745_v54 = vmul.f32 1.624375, %v4579_v41  ;;  %v770_v55 = vmul.f32 -0.624375, %v4575_v39 }
  0xe0   : > { %v4621_v1 = vsel %vm567_vm5, %v583_v58, 0.0  ;;  %v4623_v3 = vadd.f32 %v3492_v29, %v537_v60  ;;  %v548_v4 = vadd.f32 %v3928_v62, %v4602_v56  ;;  %v578_v5 = vmul.f32 %v4563_v32, %v4611_v61  ;;  %vm3501_vm7 = vmpackc.low %vm565_vm6, %vm564_vm4 }
  0xe1   : > { %v539_v6 = vpop.f32.mrf.mxu1  ;;  %v581_v8 = vadd.f32 %v4573_v37, %v573_v59  ;;  %v3505_v12 = vpack.c.bf16 %v583_v58, %v582_v45  ;;  %vm570_vm8 = vcmp.gt.f32.partialorder %v4611_v61, 0.0  ;;  %v769_v45 = vmul.f32 -0.624375, %v4557_v30 }
  0xe2   : > { %v576_v9 = vmul.f32 %v4563_v32, %v4623_v3  ;;  %v4632_v10 = vadd.f32 %v3492_v29, %v548_v4  ;;  %v540_v11 = vadd.f32 %v539_v6, %v4613_v63  ;;  %v586_v15 = vadd.f32 %v4573_v37, %v578_v5 }
  0xe3   : > { %v4635_v13 = vsel %vm565_vm6, %v581_v8, 0.0  ;;  %v3502_v14 = vpack.c.bf16 %v581_v8, %v580_v57  ;;  %vm568_vm10 = vcmp.gt.f32.partialorder %v4623_v3, 0.0  ;;  %v775_v57 = vmul.f32 -0.624375, %v4582_v44 }
  0xe4   : > { %v579_v16 = vmul.f32 %v4563_v32, %v4632_v10  ;;  %v4640_v18 = vadd.f32 %v3492_v29, %v540_v11  ;;  %v584_v19 = vadd.f32 %v4573_v37, %v576_v9  ;;  %v4653_v20 = vsel %vm570_vm8, %v586_v15, 0.0 }
  0xe5   : > { %3945 = vmatprep.mubr.msk.bf16.mxu0 %vm3501_vm7, %v3502_v14  ;;  %vm571_vm11 = vcmp.gt.f32.partialorder %v4632_v10, 0.0  ;;  %v4693_v58 = vmul.f32 -33.182503, %v4595_v51  ;;  %v748_v62 = vmul.f32 1.624375, %v4587_v47 }
  0xe6   : > { %v577_v22 = vmul.f32 %v4563_v32, %v4640_v18  ;;  %3946 = vmatmul.mubr.msk.bf16.vlgmr.msra.gmra.mxu0 %vm3504_vm9, %v3505_v12  ;;  %v4657_v28 = vsel %vm568_vm10, %v584_v19, 0.0  ;;  %v587_v29 = vadd.f32 %v4573_v37, %v579_v16  ;;  %vm569_vm12 = vcmp.gt.f32.partialorder %v4640_v18, 0.0  ;;  %vm3510_vm14 = vmpackc.low %vm571_vm11, %vm570_vm8 }
  0xe7   : > { %3978 = vmatpush3.bf16.msra.mxu0 %v4451_v2  ;;  %vm3507_vm13 = vmpackc.low %vm569_vm12, %vm568_vm10  ;;  %v746_v5 = vmul.f32 1.624375, %v4599_v53  ;;  %v773_v41 = vmul.f32 -0.624375, %v4591_v50  ;;  %v4704_v6 = vmul.f32 -33.182503, %v4621_v1 }
  0xe8   : > { %v585_v31 = vadd.f32 %v4573_v37, %v577_v22  ;;  %v4664_v33 = vsel %vm571_vm11, %v587_v29, 0.0  ;;  %3979 = vmatprep.subr.bf16.mxu0 %v4474_v7  ;;  %v3511_v40 = vpack.c.bf16 %v587_v29, %v586_v15  ;;  %v596_v11 = vmul.f32 -33.182503, %v4617_v0 }
  0xe9   : > { %v4708_v47 = vmul.f32 -33.182503, %v4635_v13  ;;  %v751_v14 = vmul.f32 1.624375, %v4611_v61  ;;  %v749_v1 = vmul.f32 1.624375, %v4623_v3 }
  0xea   : > { %v4667_v36 = vsel %vm569_vm12, %v585_v31, 0.0  ;;  %v3508_v38 = vpack.c.bf16 %v585_v31, %v584_v19  ;;  %v752_v29 = vmul.f32 1.624375, %v4632_v10  ;;  %v776_v31 = vmul.f32 -0.624375, %v4602_v56 }
  0xeb   : > { %3980 = vmatpush3.bf16.msra.mxu0 %v4474_v7 }
  0xec   : > { %3949 = vmatprep.mubr.msk.bf16.mxu0 %vm3507_vm13, %v3508_v38  ;;  %3981 = vmatprep.subr.bf16.mxu0 %v4487_v17 }
  0xee   : > { %3950 = vmatmul.mubr.msk.bf16.gmra.mxu0 %vm3510_vm14, %v3511_v40 }
  0xef   : > { %3982 = vmatpush3.bf16.msra.mxu0 %v4487_v17 }
  0xf0   : > { %3983 = vmatprep.subr.bf16.mxu0 %v4498_v21 }
  0xf3   : > { %3984 = vmatpush3.bf16.msra.mxu0 %v4498_v21 }
  0xf4   : > { %3985 = vmatprep.subr.bf16.mxu0 %v4517_v23 }
  0xf7   : > { %3986 = vmatpush3.bf16.msra.mxu0 %v4517_v23 }
  0xf8   : > { %3987 = vmatprep.subr.bf16.mxu0 %v4526_v24 }
  0xfb   : > { %3988 = vmatpush3.bf16.msra.mxu0 %v4526_v24 }
  0xfc   : > { %3989 = vmatprep.subr.bf16.mxu0 %v4535_v25 }
  0xff   : > { %3990 = vmatpush3.bf16.msra.mxu0 %v4535_v25 }
 0x100   : > { %3991 = vmatprep.subr.bf16.mxu0 %v4544_v26 }
 0x103   : > { %3992 = vmatpush3.bf16.msra.mxu0 %v4544_v26 }
 0x104   : > { %4025 = vmatprep.subr.bf16.mxu0 %v4451_v2 }
 0x1a6   : > { %v3947_v42 = vpop.f32.mrf.mxu0 }
 0x1a7   : > { %v755_v48 = vmul.f32 -0.62438846, %v3947_v42 }
 0x1a8   : > { %v714_v52 = vpop.f32.mrf.mxu0 }
 0x1a9   : > { %v763_v59 = vadd.f32 %v755_v48, %v747_v46  ;;  %v753_v60 = vmul.f32 -0.62438846, %v714_v52 }
 0x1aa   : > { %v3948_v4 = vpop.f32.mrf.mxu0 }
 0x1ab   : > { %v779_v8 = vadd.f32 %v771_v43, %v763_v59  ;;  %v761_v51 = vadd.f32 %v753_v60, %v745_v54  ;;  %v756_v9 = vmul.f32 -0.62438846, %v3948_v4  ;;  %v750_v43 = vmul.f32 1.624375, %v4640_v18 }
 0x1ac   : > { %v717_v12 = vpop.f32.mrf.mxu0 }
 0x1ad   : > { %v4712_v15 = vadd.f32 %v4699_v35, %v779_v8  ;;  %v777_v53 = vadd.f32 %v769_v45, %v761_v51  ;;  %v764_v16 = vadd.f32 %v756_v9, %v748_v62  ;;  %v754_v19 = vmul.f32 -0.62438846, %v717_v12 }
 0x1ae   : > { %v3951_v22 = vpop.f32.mrf.mxu0  ;;  %v774_v45 = vmul.f32 -0.624375, %v4613_v63 }
 0x1af   : > { %v808_v0 = vmul.f32 %v4563_v32, %v4712_v15  ;;  %v4720_v13 = vadd.f32 %v4699_v35, %v777_v53  ;;  %v780_v61 = vadd.f32 %v772_v49, %v764_v16  ;;  %v762_v38 = vadd.f32 %v754_v19, %v746_v5 }
 0x1b0   : > { %v759_v40 = vmul.f32 -0.62438846, %v3951_v22  ;;  %v730_v42 = vpop.f32.mrf.mxu0  ;;  %vm800_vm15 = vcmp.gt.f32.partialorder %v4712_v15, 0.0 }
 0x1b1   : > { %v4725_v3 = vadd.f32 %v4699_v35, %v780_v61  ;;  %v778_v10 = vadd.f32 %v770_v55, %v762_v38  ;;  %v757_v46 = vmul.f32 -0.62438846, %v730_v42  ;;  %vm798_vm0 = vcmp.gt.f32.partialorder %v4720_v13, 0.0 }
 0x1b2   : > { %v767_v48 = vadd.f32 %v759_v40, %v751_v14  ;;  %v3952_v52 = vpop.f32.mrf.mxu0  ;;  %v806_v49 = vmul.f32 %v4563_v32, %v4720_v13  ;;  %v816_v54 = vadd.f32 %v4573_v37, %v808_v0 }
 0x1b3   : > { %v809_v18 = vmul.f32 %v4563_v32, %v4725_v3  ;;  %v4735_v59 = vadd.f32 %v4699_v35, %v778_v10  ;;  %v765_v60 = vadd.f32 %v757_v46, %v749_v1  ;;  %v760_v55 = vmul.f32 -0.62438846, %v3952_v52 }
 0x1b4   : > { %v783_v62 = vadd.f32 %v775_v57, %v767_v48  ;;  %v733_v4 = vpop.f32.mrf.mxu0  ;;  %v814_v5 = vadd.f32 %v4573_v37, %v806_v49  ;;  %vm801_vm1 = vcmp.gt.f32.partialorder %v4725_v3, 0.0  ;;  %v824_v8 = vsel %vm800_vm15, %v816_v54, 0.0 }
 0x1b5   : > { %v781_v51 = vadd.f32 %v773_v41, %v765_v60  ;;  %v768_v9 = vadd.f32 %v760_v55, %v752_v29  ;;  %v758_v12 = vmul.f32 -0.62438846, %v733_v4  ;;  %vm799_vm3 = vcmp.gt.f32.partialorder %v4735_v59, 0.0  ;;  %vm4746_vm4 = vmpackc.low %vm801_vm1, %vm800_vm15 }
 0x1b6   : > { %v4751_v57 = vadd.f32 %v4699_v35, %v783_v62  ;;  %v807_v53 = vmul.f32 %v4563_v32, %v4735_v59  ;;  %v822_v41 = vsel %vm798_vm0, %v814_v5, 0.0  ;;  %vm4761_vm5 = vmpackc.low %vm799_vm3, %vm798_vm0  ;;  %v817_v19 = vadd.f32 %v4573_v37, %v809_v18 }
 0x1b7   : > { %v4767_v22 = vadd.f32 %v4699_v35, %v781_v51  ;;  %v784_v1 = vadd.f32 %v776_v31, %v768_v9  ;;  %v766_v29 = vadd.f32 %v758_v12, %v750_v43  ;;  %v830_v0 = vmul.f32 -19.628468, %v822_v41 }
 0x1b8   : > { %v815_v61 = vadd.f32 %v4573_v37, %v807_v53  ;;  %v825_v38 = vsel %vm801_vm1, %v817_v19, 0.0  ;;  %v832_v40 = vmul.f32 -19.628468, %v824_v8  ;;  %v3518_v42 = vpack.c.bf16 %v817_v19, %v816_v54 }
 0x1b9   : > { %v4773_v10 = vadd.f32 %v4699_v35, %v784_v1  ;;  %v782_v46 = vadd.f32 %v774_v45, %v766_v29  ;;  %v4775_v48 = vadd.f32 %v830_v0, %v596_v11  ;;  %v833_v52 = vmul.f32 -19.628468, %v825_v38 }
 0x1ba   : > { %v823_v49 = vsel %vm799_vm3, %v815_v61, 0.0  ;;  %v3515_v31 = vpack.c.bf16 %v815_v61, %v814_v5  ;;  %v4780_v43 = vadd.f32 %v832_v40, %v4693_v58  ;;  %vm802_vm6 = vcmp.gt.f32.partialorder %v4767_v22, 0.0 }
 0x1bb   : > { %v4784_v18 = vadd.f32 %v4699_v35, %v782_v46  ;;  %v831_v54 = vmul.f32 -19.628468, %v823_v49  ;;  %v4787_v60 = vadd.f32 %v833_v52, %v4704_v6  ;;  %v810_v11 = vmul.f32 %v4563_v32, %v4767_v22 }
 0x1bc   : > { %3969 = vmatprep.mubr.msk.bf16.mxu1 %vm4761_vm5, %v3515_v31  ;;  %vm804_vm7 = vcmp.gt.f32.partialorder %v4751_v57, 0.0  ;;  %vm805_vm8 = vcmp.gt.f32.partialorder %v4773_v10, 0.0  ;;  %v812_v58 = vmul.f32 %v4563_v32, %v4751_v57  ;;  %v813_v35 = vmul.f32 %v4563_v32, %v4773_v10 }
 0x1bd   : > { %v4800_v45 = vadd.f32 %v831_v54, %v4708_v47  ;;  %3970 = vmatmul.mubr.msk.bf16.vlgmr.msra.gmra.mxu1 %vm4746_vm4, %v3518_v42  ;;  %vm803_vm9 = vcmp.gt.f32.partialorder %v4784_v18, 0.0  ;;  %v811_v6 = vmul.f32 %v4563_v32, %v4784_v18  ;;  %v818_v55 = vadd.f32 %v4573_v37, %v810_v11  ;;  %vm4812_vm10 = vmpackc.low %vm805_vm8, %vm804_vm7 }
 0x1be   : > { %v600_v47 = vmul.f32 -33.182503, %v4657_v28  ;;  %vm4821_vm11 = vmpackc.low %vm803_vm9, %vm802_vm6  ;;  %v820_v5 = vadd.f32 %v4573_v37, %v812_v58  ;;  %v821_v8 = vadd.f32 %v4573_v37, %v813_v35  ;;  %4002 = vmatpush3.bf16.msra.mxu1 %v4451_v2  ;;  %v602_v51 = vmul.f32 -33.182503, %v4653_v20 }
 0x1bf   : > { %v603_v9 = vmul.f32 -33.182503, %v4664_v33  ;;  %v819_v28 = vadd.f32 %v4573_v37, %v811_v6  ;;  %v826_v12 = vsel %vm802_vm6, %v818_v55, 0.0  ;;  %4003 = vmatprep.subr.bf16.mxu1 %v4474_v7  ;;  %v601_v29 = vmul.f32 -33.182503, %v4667_v36 }
 0x1c0   : > { %v834_v14 = vmul.f32 -19.628468, %v826_v12  ;;  %v828_v53 = vsel %vm804_vm7, %v820_v5, 0.0  ;;  %v829_v41 = vsel %vm805_vm8, %v821_v8, 0.0  ;;  %v3524_v16 = vpack.c.bf16 %v821_v8, %v820_v5 }
 0x1c1   : > { %v827_v20 = vsel %vm803_vm9, %v819_v28, 0.0  ;;  %v3521_v19 = vpack.c.bf16 %v819_v28, %v818_v55  ;;  %v836_v33 = vmul.f32 -19.628468, %v828_v53  ;;  %v837_v1 = vmul.f32 -19.628468, %v829_v41 }
 0x1c2   : > { %v835_v0 = vmul.f32 -19.628468, %v827_v20  ;;  %v4841_v61 = vadd.f32 %v834_v14, %v600_v47  ;;  %4004 = vmatpush3.bf16.msra.mxu1 %v4474_v7  ;;  %v917_v46 = vmul.f32 1.5855855, %v4712_v15  ;;  %v941_v49 = vmul.f32 -0.58558553, %v4552_v27 }
 0x1c3   : > { %3973 = vmatprep.mubr.msk.bf16.mxu1 %vm4821_vm11, %v3521_v19  ;;  %v4846_v38 = vadd.f32 %v836_v33, %v602_v51  ;;  %v4848_v40 = vadd.f32 %v837_v1, %v603_v9  ;;  %4005 = vmatprep.subr.bf16.mxu1 %v4487_v17  ;;  %v939_v54 = vmul.f32 -0.58558553, %v4557_v30  ;;  %v915_v58 = vmul.f32 1.5855855, %v4720_v13  ;;  %v4875_v55 = vld [vmem:[%s7293_s6 + $0x4] ss:$0 sm:$0xff] }
 0x1c4   : > { %v4851_v42 = vadd.f32 %v835_v0, %v601_v29  ;;  %v942_v6 = vmul.f32 -0.58558553, %v4565_v34  ;;  %v940_v15 = vmul.f32 -0.58558553, %v4575_v39  ;;  %v945_v47 = vmul.f32 -0.58558553, %v4582_v44 }
 0x1c5   : > { %3974 = vmatmul.mubr.msk.bf16.gmra.mxu1 %vm4812_vm10, %v3524_v16  ;;  %v918_v8 = vmul.f32 1.5855855, %v4725_v3  ;;  %v916_v13 = vmul.f32 1.5855855, %v4735_v59  ;;  %v943_v28 = vmul.f32 -0.58558553, %v4591_v50 }
 0x1c6   : > { %4006 = vmatpush3.bf16.msra.mxu1 %v4487_v17  ;;  %v946_v12 = vmul.f32 -0.58558553, %v4602_v56  ;;  %v921_v19 = vmul.f32 1.5855855, %v4751_v57  ;;  %v919_v33 = vmul.f32 1.5855855, %v4767_v22 }
 0x1c7   : > { %4007 = vmatprep.subr.bf16.mxu1 %v4498_v21  ;;  %v944_v3 = vmul.f32 -0.58558553, %v4613_v63 }
 0x1ca   : > { %4008 = vmatpush3.bf16.msra.mxu1 %v4498_v21 }
 0x1cb   : > { %4009 = vmatprep.subr.bf16.mxu1 %v4517_v23 }
 0x1ce   : > { %4010 = vmatpush3.bf16.msra.mxu1 %v4517_v23 }
 0x1cf   : > { %4011 = vmatprep.subr.bf16.mxu1 %v4526_v24 }
 0x1d2   : > { %4012 = vmatpush3.bf16.msra.mxu1 %v4526_v24 }
 0x1d3   : > { %4013 = vmatprep.subr.bf16.mxu1 %v4535_v25 }
 0x1d6   : > { %4014 = vmatpush3.bf16.msra.mxu1 %v4535_v25 }
 0x1d7   : > { %4015 = vmatprep.subr.bf16.mxu1 %v4544_v26 }
 0x1da   : > { %4016 = vmatpush3.bf16.msra.mxu1 %v4544_v26 }
 0x1db   : > { %4049 = vmatprep.subr.bf16.mxu1 %v4451_v2 }
 0x27d   : > { %v3971_v36 = vpop.f32.mrf.mxu1 }
 0x27e   : > { %v925_v52 = vmul.f32 -0.5856279, %v3971_v36 }
 0x27f   : > { %v884_v31 = vpop.f32.mrf.mxu1 }
 0x280   : > { %v933_v11 = vadd.f32 %v925_v52, %v917_v46  ;;  %v923_v35 = vmul.f32 -0.5856279, %v884_v31  ;;  %v922_v52 = vmul.f32 1.5855855, %v4773_v10 }
 0x281   : > { %v3972_v62 = vpop.f32.mrf.mxu1 }
 0x282   : > { %v949_v4 = vadd.f32 %v941_v49, %v933_v11  ;;  %v931_v5 = vadd.f32 %v923_v35, %v915_v58  ;;  %v926_v51 = vmul.f32 -0.5856279, %v3972_v62  ;;  %v920_v49 = vmul.f32 1.5855855, %v4784_v18 }
 0x283   : > { %v887_v9 = vpop.f32.mrf.mxu1 }
 0x284   : > { %v4884_v14 = vadd.f32 %v4875_v55, %v949_v4  ;;  %v947_v53 = vadd.f32 %v939_v54, %v931_v5  ;;  %v934_v41 = vadd.f32 %v926_v51, %v918_v8  ;;  %v924_v16 = vmul.f32 -0.5856279, %v887_v9 }
 0x285   : > { %v3975_v20 = vpop.f32.mrf.mxu1 }
 0x286   : > { %v978_v59 = vmul.f32 %v4563_v32, %v4884_v14  ;;  %v4892_v1 = vadd.f32 %v4875_v55, %v947_v53  ;;  %v950_v29 = vadd.f32 %v942_v6, %v934_v41  ;;  %v932_v0 = vadd.f32 %v924_v16, %v916_v13 }
 0x287   : > { %v929_v36 = vmul.f32 -0.5856279, %v3975_v20  ;;  %v900_v46 = vpop.f32.mrf.mxu1  ;;  %vm970_vm12 = vcmp.gt.f32.partialorder %v4884_v14, 0.0 }
 0x288   : > { %v4897_v57 = vadd.f32 %v4875_v55, %v950_v29  ;;  %v948_v22 = vadd.f32 %v940_v15, %v932_v0  ;;  %v927_v31 = vmul.f32 -0.5856279, %v900_v46  ;;  %vm968_vm13 = vcmp.gt.f32.partialorder %v4892_v1, 0.0 }
 0x289   : > { %v937_v54 = vadd.f32 %v929_v36, %v921_v19  ;;  %v3976_v11 = vpop.f32.mrf.mxu1  ;;  %v976_v58 = vmul.f32 %v4563_v32, %v4892_v1  ;;  %v986_v35 = vadd.f32 %v4573_v37, %v978_v59 }
 0x28a   : > { %v979_v10 = vmul.f32 %v4563_v32, %v4897_v57  ;;  %v4907_v18 = vadd.f32 %v4875_v55, %v948_v22  ;;  %v935_v6 = vadd.f32 %v927_v31, %v919_v33  ;;  %v930_v62 = vmul.f32 -0.5856279, %v3976_v11 }
 0x28b   : > { %v953_v15 = vadd.f32 %v945_v47, %v937_v54  ;;  %v903_v4 = vpop.f32.mrf.mxu1  ;;  %v984_v5 = vadd.f32 %v4573_v37, %v976_v58  ;;  %vm971_vm14 = vcmp.gt.f32.partialorder %v4897_v57, 0.0  ;;  %v994_v8 = vsel %vm970_vm12, %v986_v35, 0.0 }
 0x28c   : > { %v951_v51 = vadd.f32 %v943_v28, %v935_v6  ;;  %v938_v9 = vadd.f32 %v930_v62, %v922_v52  ;;  %v928_v13 = vmul.f32 -0.5856279, %v903_v4  ;;  %vm969_vm15 = vcmp.gt.f32.partialorder %v4907_v18, 0.0  ;;  %vm4918_vm0 = vmpackc.low %vm971_vm14, %vm970_vm12 }
 0x28d   : > { %v4923_v47 = vadd.f32 %v4875_v55, %v953_v15  ;;  %v977_v41 = vmul.f32 %v4563_v32, %v4907_v18  ;;  %v992_v28 = vsel %vm968_vm13, %v984_v5, 0.0  ;;  %vm4933_vm1 = vmpackc.low %vm969_vm15, %vm968_vm13  ;;  %v987_v20 = vadd.f32 %v4573_v37, %v979_v10 }
 0x28e   : > { %v4939_v19 = vadd.f32 %v4875_v55, %v951_v51  ;;  %v954_v33 = vadd.f32 %v946_v12, %v938_v9  ;;  %v936_v59 = vadd.f32 %v928_v13, %v920_v49  ;;  %v1000_v29 = vmul.f32 -11.8509865, %v992_v28 }
 0x28f   : > { %v985_v0 = vadd.f32 %v4573_v37, %v977_v41  ;;  %v995_v36 = vsel %vm971_vm14, %v987_v20, 0.0  ;;  %v1002_v46 = vmul.f32 -11.8509865, %v994_v8  ;;  %v3531_v52 = vpack.c.bf16 %v987_v20, %v986_v35 }
 0x290   : > { %v4945_v22 = vadd.f32 %v4875_v55, %v954_v33  ;;  %v952_v31 = vadd.f32 %v944_v3, %v936_v59  ;;  %v4948_v54 = vadd.f32 %v1000_v29, %v4775_v48  ;;  %v1003_v11 = vmul.f32 -11.8509865, %v995_v36 }
 0x291   : > { %v993_v12 = vsel %vm969_vm15, %v985_v0, 0.0  ;;  %v3528_v49 = vpack.c.bf16 %v985_v0, %v984_v5  ;;  %v4953_v58 = vadd.f32 %v1002_v46, %v4780_v43  ;;  %vm972_vm3 = vcmp.gt.f32.partialorder %v4939_v19, 0.0 }
 0x292   : > { %v4957_v10 = vadd.f32 %v4875_v55, %v952_v31  ;;  %v1001_v35 = vmul.f32 -11.8509865, %v993_v12  ;;  %v4960_v6 = vadd.f32 %v1003_v11, %v4787_v60  ;;  %v980_v48 = vmul.f32 %v4563_v32, %v4939_v19  ;;  %v5044_v31 = vld [vmem:[%s7293_s6 + $0x5] ss:$0 sm:$0xff] }
 0x293   : > { %3993 = vmatprep.mubr.msk.bf16.mxu0 %vm4933_vm1, %v3528_v49  ;;  %vm974_vm4 = vcmp.gt.f32.partialorder %v4923_v47, 0.0  ;;  %vm975_vm5 = vcmp.gt.f32.partialorder %v4945_v22, 0.0  ;;  %v982_v43 = vmul.f32 %v4563_v32, %v4923_v47  ;;  %v983_v55 = vmul.f32 %v4563_v32, %v4945_v22 }
 0x294   : > { %v4973_v3 = vadd.f32 %v1001_v35, %v4800_v45  ;;  %3994 = vmatmul.mubr.msk.bf16.vlgmr.msra.gmra.mxu0 %vm4918_vm0, %v3531_v52  ;;  %vm973_vm6 = vcmp.gt.f32.partialorder %v4957_v10, 0.0  ;;  %v981_v60 = vmul.f32 %v4563_v32, %v4957_v10  ;;  %v988_v62 = vadd.f32 %v4573_v37, %v980_v48  ;;  %vm4985_vm7 = vmpackc.low %vm975_vm5, %vm974_vm4 }
 0x295   : > { %vm4991_vm8 = vmpackc.low %vm973_vm6, %vm972_vm3  ;;  %v990_v4 = vadd.f32 %v4573_v37, %v982_v43  ;;  %v991_v5 = vadd.f32 %v4573_v37, %v983_v55  ;;  %4026 = vmatpush3.bf16.msra.mxu0 %v4451_v2  ;;  %v1112_v52 = vmul.f32 -0.546796, %v4565_v34  ;;  %v1115_v11 = vmul.f32 -0.546796, %v4582_v44 }
 0x296   : > { %v989_v8 = vadd.f32 %v4573_v37, %v981_v60  ;;  %v996_v51 = vsel %vm972_vm3, %v988_v62, 0.0  ;;  %4027 = vmatprep.subr.bf16.mxu0 %v4474_v7  ;;  %v1088_v35 = vmul.f32 1.546796, %v4897_v57  ;;  %v1113_v55 = vmul.f32 -0.546796, %v4591_v50 }
 0x297   : > { %v1004_v9 = vmul.f32 -11.8509865, %v996_v51  ;;  %v998_v13 = vsel %vm974_vm4, %v990_v4, 0.0  ;;  %v999_v53 = vsel %vm975_vm5, %v991_v5, 0.0  ;;  %v3537_v41 = vpack.c.bf16 %v991_v5, %v990_v4 }
 0x298   : > { %v997_v28 = vsel %vm973_vm6, %v989_v8, 0.0  ;;  %v3534_v16 = vpack.c.bf16 %v989_v8, %v988_v62  ;;  %v1006_v20 = vmul.f32 -11.8509865, %v998_v13  ;;  %v1007_v33 = vmul.f32 -11.8509865, %v999_v53 }
 0x299   : > { %v1005_v59 = vmul.f32 -11.8509865, %v997_v28  ;;  %v5007_v29 = vadd.f32 %v1004_v9, %v4841_v61  ;;  %4028 = vmatpush3.bf16.msra.mxu0 %v4474_v7  ;;  %v1116_v60 = vmul.f32 -0.546796, %v4602_v56  ;;  %v1091_v8 = vmul.f32 1.546796, %v4923_v47 }
 0x29a   : > { %3997 = vmatprep.mubr.msk.bf16.mxu0 %vm4991_vm8, %v3534_v16  ;;  %v5013_v0 = vadd.f32 %v1006_v20, %v4846_v38  ;;  %v5016_v36 = vadd.f32 %v1007_v33, %v4848_v40  ;;  %4029 = vmatprep.subr.bf16.mxu0 %v4487_v17  ;;  %v1109_v38 = vmul.f32 -0.546796, %v4557_v30  ;;  %v1085_v40 = vmul.f32 1.546796, %v4892_v1 }
 0x29b   : > { %v5020_v46 = vadd.f32 %v1005_v59, %v4851_v42  ;;  %v1086_v1 = vmul.f32 1.546796, %v4907_v18  ;;  %v1089_v51 = vmul.f32 1.546796, %v4939_v19  ;;  %v1114_v57 = vmul.f32 -0.546796, %v4613_v63 }
 0x29c   : > { %3998 = vmatmul.mubr.msk.bf16.gmra.mxu0 %vm4985_vm7, %v3537_v41  ;;  %v1092_v16 = vmul.f32 1.546796, %v4945_v22  ;;  %v1090_v20 = vmul.f32 1.546796, %v4957_v10 }
 0x29d   : > { %4030 = vmatpush3.bf16.msra.mxu0 %v4487_v17  ;;  %v1087_v17 = vmul.f32 1.546796, %v4884_v14  ;;  %v1110_v14 = vmul.f32 -0.546796, %v4575_v39 }
 0x29e   : > { %4031 = vmatprep.subr.bf16.mxu0 %v4498_v21 }
 0x2a1   : > { %4032 = vmatpush3.bf16.msra.mxu0 %v4498_v21 }
 0x2a2   : > { %4033 = vmatprep.subr.bf16.mxu0 %v4517_v23 }
 0x2a5   : > { %4034 = vmatpush3.bf16.msra.mxu0 %v4517_v23  ;;  %v1111_v23 = vmul.f32 -0.546796, %v4552_v27 }
 0x2a6   : > { %4035 = vmatprep.subr.bf16.mxu0 %v4526_v24 }
 0x2a9   : > { %4036 = vmatpush3.bf16.msra.mxu0 %v4526_v24 }
 0x2aa   : > { %4037 = vmatprep.subr.bf16.mxu0 %v4535_v25 }
 0x2ad   : > { %4038 = vmatpush3.bf16.msra.mxu0 %v4535_v25 }
 0x2ae   : > { %4039 = vmatprep.subr.bf16.mxu0 %v4544_v26 }
 0x2b1   : > { %4040 = vmatpush3.bf16.msra.mxu0 %v4544_v26 }
 0x2b2   : > { %4073 = vmatprep.subr.bf16.mxu0 %v4451_v2 }
 0x354   : > { %v3995_v7 = vpop.f32.mrf.mxu0 }
 0x355   : > { %v1095_v21 = vmul.f32 -0.5469189, %v3995_v7 }
 0x356   : > { %v1054_v61 = vpop.f32.mrf.mxu0 }
 0x357   : > { %v1103_v24 = vadd.f32 %v1095_v21, %v1087_v17  ;;  %v1093_v42 = vmul.f32 -0.5469189, %v1054_v61 }
 0x358   : > { %v3996_v2 = vpop.f32.mrf.mxu0 }
 0x359   : > { %v1119_v12 = vadd.f32 %v1111_v23, %v1103_v24  ;;  %v1101_v49 = vadd.f32 %v1093_v42, %v1085_v40  ;;  %v1096_v48 = vmul.f32 -0.5469189, %v3996_v2 }
 0x35a   : > { %v1057_v43 = vpop.f32.mrf.mxu0 }
 0x35b   : > { %v5053_v62 = vadd.f32 %v5044_v31, %v1119_v12  ;;  %v1117_v15 = vadd.f32 %v1109_v38, %v1101_v49  ;;  %v1104_v45 = vadd.f32 %v1096_v48, %v1088_v35  ;;  %v1094_v4 = vmul.f32 -0.5469189, %v1057_v43 }
 0x35c   : > { %v3999_v5 = vpop.f32.mrf.mxu0 }
 0x35d   : > { %v1148_v18 = vmul.f32 %v4563_v32, %v5053_v62  ;;  %v5061_v9 = vadd.f32 %v5044_v31, %v1117_v15  ;;  %v1120_v13 = vadd.f32 %v1112_v52, %v1104_v45  ;;  %v1102_v53 = vadd.f32 %v1094_v4, %v1086_v1 }
 0x35e   : > { %v1099_v41 = vmul.f32 -0.5469189, %v3999_v5  ;;  %v1070_v28 = vpop.f32.mrf.mxu0  ;;  %vm1140_vm9 = vcmp.gt.f32.partialorder %v5053_v62, 0.0 }
 0x35f   : > { %v5066_v47 = vadd.f32 %v5044_v31, %v1120_v13  ;;  %v1118_v19 = vadd.f32 %v1110_v14, %v1102_v53  ;;  %v1097_v33 = vmul.f32 -0.5469189, %v1070_v28  ;;  %vm1138_vm10 = vcmp.gt.f32.partialorder %v5061_v9, 0.0 }
 0x360   : > { %v1107_v59 = vadd.f32 %v1099_v41, %v1091_v8  ;;  %v4000_v7 = vpop.f32.mrf.mxu0  ;;  %v1146_v17 = vmul.f32 %v4563_v32, %v5061_v9  ;;  %v1156_v21 = vadd.f32 %v4573_v37, %v1148_v18 }
 0x361   : > { %v1149_v22 = vmul.f32 %v4563_v32, %v5066_v47  ;;  %v5076_v10 = vadd.f32 %v5044_v31, %v1118_v19  ;;  %v1105_v23 = vadd.f32 %v1097_v33, %v1089_v51  ;;  %v1100_v61 = vmul.f32 -0.5469189, %v4000_v7 }
 0x362   : > { %v1123_v38 = vadd.f32 %v1115_v11, %v1107_v59  ;;  %v1073_v24 = vpop.f32.mrf.mxu0  ;;  %v1154_v40 = vadd.f32 %v4573_v37, %v1146_v17  ;;  %vm1141_vm11 = vcmp.gt.f32.partialorder %v5066_v47, 0.0  ;;  %v1164_v42 = vsel %vm1140_vm9, %v1156_v21, 0.0 }
 0x363   : > { %v1121_v52 = vadd.f32 %v1113_v55, %v1105_v23  ;;  %v1108_v2 = vadd.f32 %v1100_v61, %v1092_v16  ;;  %v1098_v14 = vmul.f32 -0.5469189, %v1073_v24  ;;  %vm1139_vm12 = vcmp.gt.f32.partialorder %v5076_v10, 0.0  ;;  %vm5087_vm13 = vmpackc.low %vm1141_vm11, %vm1140_vm9  ;;  %v5180_v61 = vld [vmem:[%s7291_s4 + $0x30] sm:$0xff]  }
 0x364   : > { %v5092_v11 = vadd.f32 %v5044_v31, %v1123_v38  ;;  %v1147_v49 = vmul.f32 %v4563_v32, %v5076_v10  ;;  %v1162_v35 = vsel %vm1138_vm10, %v1154_v40, 0.0  ;;  %vm5102_vm14 = vmpackc.low %vm1139_vm12, %vm1138_vm10  ;;  %v1157_v43 = vadd.f32 %v4573_v37, %v1149_v22 }
 0x365   : > { %v5108_v1 = vadd.f32 %v5044_v31, %v1121_v52  ;;  %v1124_v55 = vadd.f32 %v1116_v60, %v1108_v2  ;;  %v1106_v15 = vadd.f32 %v1098_v14, %v1090_v20  ;;  %v1170_v45 = vmul.f32 -7.30429, %v1162_v35 }
 0x366   : > { %v1155_v4 = vadd.f32 %v4573_v37, %v1147_v49  ;;  %v1165_v5 = vsel %vm1141_vm11, %v1157_v43, 0.0  ;;  %v1172_v8 = vmul.f32 -7.30429, %v1164_v42  ;;  %v3544_v51 = vpack.c.bf16 %v1157_v43, %v1156_v21  ;;  %v5171_v21 = vld [vmem:[%s7291_s4 + $0x38] sm:$0xff]   ;;  %v5204_v43 = vld [vmem:[%s7291_s4 + $0x28] sm:$0xff]  }
 0x367   : > { %v5114_v18 = vadd.f32 %v5044_v31, %v1124_v55  ;;  %v1122_v13 = vadd.f32 %v1114_v57, %v1106_v15  ;;  %v5117_v53 = vadd.f32 %v1170_v45, %v4948_v54  ;;  %v1173_v41 = vmul.f32 -7.30429, %v1165_v5 }
 0x368   : > { %v1163_v60 = vsel %vm1139_vm12, %v1155_v4, 0.0  ;;  %v3541_v28 = vpack.c.bf16 %v1155_v4, %v1154_v40  ;;  %v5122_v16 = vadd.f32 %v1172_v8, %v4953_v58  ;;  %vm1142_vm15 = vcmp.gt.f32.partialorder %v5108_v1, 0.0 }
 0x369   : > { %v5126_v20 = vadd.f32 %v5044_v31, %v1122_v13  ;;  %v1171_v19 = vmul.f32 -7.30429, %v1163_v60  ;;  %v5129_v33 = vadd.f32 %v1173_v41, %v4960_v6  ;;  %v1150_v54 = vmul.f32 %v4563_v32, %v5108_v1 }
 0x36a   : > { %4017 = vmatprep.mubr.msk.bf16.mxu1 %vm5102_vm14, %v3541_v28  ;;  %vm1144_vm0 = vcmp.gt.f32.partialorder %v5092_v11, 0.0  ;;  %vm1145_vm1 = vcmp.gt.f32.partialorder %v5114_v18, 0.0  ;;  %v1152_v58 = vmul.f32 %v4563_v32, %v5092_v11  ;;  %v1153_v31 = vmul.f32 %v4563_v32, %v5114_v18 }
 0x36b   : > { %v5142_v57 = vadd.f32 %v1171_v19, %v4973_v3  ;;  %4018 = vmatmul.mubr.msk.bf16.vlgmr.msra.gmra.mxu1 %vm5087_vm13, %v3544_v51  ;;  %vm1143_vm3 = vcmp.gt.f32.partialorder %v5126_v20, 0.0  ;;  %v1151_v6 = vmul.f32 %v4563_v32, %v5126_v20  ;;  %v1158_v59 = vadd.f32 %v4573_v37, %v1150_v54  ;;  %vm5154_vm4 = vmpackc.low %vm1145_vm1, %vm1144_vm0 }
 0x36c   : > { %vm5162_vm5 = vmpackc.low %vm1143_vm3, %vm1142_vm15  ;;  %v1160_v32 = vadd.f32 %v4573_v37, %v1152_v58  ;;  %v1161_v17 = vadd.f32 %v4573_v37, %v1153_v31  ;;  %4050 = vmatpush3.bf16.msra.mxu1 %v5171_v21  ;;  %v1257_v15 = vmul.f32 1.5080066, %v5053_v62  ;;  %v1281_v4 = vmul.f32 -0.5080065, %v4552_v27 }
 0x36d   : > { %v1159_v22 = vadd.f32 %v4573_v37, %v1151_v6  ;;  %v1166_v23 = vsel %vm1142_vm15, %v1158_v59, 0.0  ;;  %4051 = vmatprep.subr.bf16.mxu1 %v5180_v61  ;;  %v1279_v8 = vmul.f32 -0.5080065, %v4557_v30  ;;  %v1255_v13 = vmul.f32 1.5080066, %v5061_v9 }
 0x36e   : > { %v1174_v38 = vmul.f32 -7.30429, %v1166_v23  ;;  %v1168_v24 = vsel %vm1144_vm0, %v1160_v32, 0.0  ;;  %v1169_v40 = vsel %vm1145_vm1, %v1161_v17, 0.0  ;;  %v3550_v42 = vpack.c.bf16 %v1161_v17, %v1160_v32 }
 0x36f   : > { %v1167_v37 = vsel %vm1143_vm3, %v1159_v22, 0.0  ;;  %v3547_v52 = vpack.c.bf16 %v1159_v22, %v1158_v59  ;;  %v1176_v2 = vmul.f32 -7.30429, %v1168_v24  ;;  %v1177_v14 = vmul.f32 -7.30429, %v1169_v40 }
 0x370   : > { %v1175_v12 = vmul.f32 -7.30429, %v1167_v37  ;;  %v5190_v49 = vadd.f32 %v1174_v38, %v5007_v29  ;;  %4052 = vmatpush3.bf16.msra.mxu1 %v5180_v61  ;;  %v1280_v62 = vmul.f32 -0.5080065, %v4575_v39  ;;  %v1285_v28 = vmul.f32 -0.5080065, %v4582_v44 }
 0x371   : > { %4021 = vmatprep.mubr.msk.bf16.mxu1 %vm5162_vm5, %v3547_v52  ;;  %v5196_v35 = vadd.f32 %v1176_v2, %v5013_v0  ;;  %v5199_v48 = vadd.f32 %v1177_v14, %v5016_v36  ;;  %4053 = vmatprep.subr.bf16.mxu1 %v5204_v43  ;;  %v5216_v0 = vld [vmem:[%s7291_s4 + $0x20] sm:$0xff]   ;;  %v5223_v36 = vld [vmem:[%s7291_s4 + $0x18] sm:$0xff]   ;;  %v1258_v58 = vmul.f32 1.5080066, %v5066_v47  ;;  %v1256_v9 = vmul.f32 1.5080066, %v5076_v10 }
 0x372   : > { %v5208_v29 = vadd.f32 %v1175_v12, %v5020_v46  ;;  %v5230_v46 = vld [vmem:[%s7291_s4 + $0x10] sm:$0xff]   ;;  %v1283_v59 = vmul.f32 -0.5080065, %v4591_v50  ;;  %v1286_v7 = vmul.f32 -0.5080065, %v4602_v56 }
 0x373   : > { %4022 = vmatmul.mubr.msk.bf16.gmra.mxu1 %vm5154_vm4, %v3550_v42  ;;  %v1261_v38 = vmul.f32 1.5080066, %v5092_v11  ;;  %v1259_v24 = vmul.f32 1.5080066, %v5108_v1  ;;  %v1284_v47 = vmul.f32 -0.5080065, %v4613_v63 }
 0x374   : > { %4054 = vmatpush3.bf16.msra.mxu1 %v5204_v43  ;;  %v5264_v10 = vld [vmem:[%s7293_s6] ss:$0 sm:$0xff]  ;;  %v1262_v11 = vmul.f32 1.5080066, %v5114_v18  ;;  %v1260_v1 = vmul.f32 1.5080066, %v5126_v20 }
 0x375   : > { %4055 = vmatprep.subr.bf16.mxu1 %v5216_v0  ;;  %v5283_v18 = vld [vmem:[%s7293_s6 + $0x1] ss:$0 sm:$0xff] }
 0x378   : > { %4056 = vmatpush3.bf16.msra.mxu1 %v5216_v0 }
 0x379   : > { %4057 = vmatprep.subr.bf16.mxu1 %v5223_v36 }
 0x37c   : > { %4058 = vmatpush3.bf16.msra.mxu1 %v5223_v36 }
 0x37d   : > { %4059 = vmatprep.subr.bf16.mxu1 %v5230_v46 }
 0x380   : > { %4060 = vmatpush3.bf16.msra.mxu1 %v5230_v46 }
 0x381   : > { %4061 = vmatprep.subr.bf16.mxu1 %v4535_v25 }
 0x384   : > { %4062 = vmatpush3.bf16.msra.mxu1 %v4535_v25  ;;  %v1282_v25 = vmul.f32 -0.5080065, %v4565_v34 }
 0x385   : > { %4063 = vmatprep.subr.bf16.mxu1 %v4544_v26 }
 0x388   : > { %4064 = vmatpush3.bf16.msra.mxu1 %v4544_v26  ;;  %v5247_v26 = vld [vmem:[%s7293_s6 + $0x6] ss:$0 sm:$0xff] }
 0x389   : > { %4097 = vmatprep.subr.bf16.mxu1 %v5171_v21 }
 0x42b   : > { %v4019_v55 = vpop.f32.mrf.mxu1 }
 0x42c   : > { %v1265_v45 = vmul.f32 -0.5083346, %v4019_v55 }
 0x42d   : > { %v1224_v5 = vpop.f32.mrf.mxu1 }
 0x42e   : > { %v1273_v51 = vadd.f32 %v1265_v45, %v1257_v15  ;;  %v1263_v41 = vmul.f32 -0.5083346, %v1224_v5 }
 0x42f   : > { %v4020_v60 = vpop.f32.mrf.mxu1 }
 0x430   : > { %v1289_v19 = vadd.f32 %v1281_v4, %v1273_v51  ;;  %v1271_v54 = vadd.f32 %v1263_v41, %v1255_v13  ;;  %v1266_v31 = vmul.f32 -0.5083346, %v4020_v60 }
 0x431   : > { %v1227_v6 = vpop.f32.mrf.mxu1 }
 0x432   : > { %v5256_v3 = vadd.f32 %v5247_v26, %v1289_v19  ;;  %v1287_v32 = vadd.f32 %v1279_v8, %v1271_v54  ;;  %v1274_v17 = vadd.f32 %v1266_v31, %v1258_v58  ;;  %v1264_v22 = vmul.f32 -0.5083346, %v1227_v6 }
 0x433   : > { %v4023_v23 = vpop.f32.mrf.mxu1 }
 0x434   : > { %v1318_v40 = vmul.f32 %v5264_v10, %v5256_v3  ;;  %v5269_v42 = vadd.f32 %v5247_v26, %v1287_v32  ;;  %v1290_v37 = vadd.f32 %v1282_v25, %v1274_v17  ;;  %v1272_v52 = vadd.f32 %v1264_v22, %v1256_v9 }
 0x435   : > { %v1269_v2 = vmul.f32 -0.5083346, %v4023_v23  ;;  %v1240_v14 = vpop.f32.mrf.mxu1  ;;  %vm1310_vm6 = vcmp.gt.f32.partialorder %v5256_v3, 0.0 }
 0x436   : > { %v5274_v12 = vadd.f32 %v5247_v26, %v1290_v37  ;;  %v1288_v55 = vadd.f32 %v1280_v62, %v1272_v52  ;;  %v1267_v15 = vmul.f32 -0.5083346, %v1240_v14  ;;  %vm1308_vm7 = vcmp.gt.f32.partialorder %v5269_v42, 0.0 }
 0x437   : > { %v1277_v45 = vadd.f32 %v1269_v2, %v1261_v38  ;;  %v4024_v4 = vpop.f32.mrf.mxu1  ;;  %v1316_v5 = vmul.f32 %v5264_v10, %v5269_v42  ;;  %v1326_v20 = vadd.f32 %v5283_v18, %v1318_v40 }
 0x438   : > { %v1319_v8 = vmul.f32 %v5264_v10, %v5274_v12  ;;  %v5289_v51 = vadd.f32 %v5247_v26, %v1288_v55  ;;  %v1275_v13 = vadd.f32 %v1267_v15, %v1259_v24  ;;  %v1270_v41 = vmul.f32 -0.5083346, %v4024_v4 }
 0x439   : > { %v1293_v25 = vadd.f32 %v1285_v28, %v1277_v45  ;;  %v1243_v60 = vpop.f32.mrf.mxu1  ;;  %v1324_v62 = vadd.f32 %v5283_v18, %v1316_v5  ;;  %vm1311_vm8 = vcmp.gt.f32.partialorder %v5274_v12, 0.0  ;;  %v1334_v19 = vsel %vm1310_vm6, %v1326_v20, 0.0 }
 0x43a   : > { %v1291_v54 = vadd.f32 %v1283_v59, %v1275_v13  ;;  %v1278_v58 = vadd.f32 %v1270_v41, %v1262_v11  ;;  %v1268_v31 = vmul.f32 -0.5083346, %v1243_v60  ;;  %vm1309_vm9 = vcmp.gt.f32.partialorder %v5289_v51, 0.0  ;;  %vm5300_vm10 = vmpackc.low %vm1311_vm8, %vm1310_vm6 }
 0x43b   : > { %v5305_v28 = vadd.f32 %v5247_v26, %v1293_v25  ;;  %v1317_v9 = vmul.f32 %v5264_v10, %v5289_v51  ;;  %v1332_v59 = vsel %vm1308_vm7, %v1324_v62, 0.0  ;;  %vm5315_vm11 = vmpackc.low %vm1309_vm9, %vm1308_vm7  ;;  %v1327_v17 = vadd.f32 %v5283_v18, %v1319_v8 }
 0x43c   : > { %v5321_v22 = vadd.f32 %v5247_v26, %v1291_v54  ;;  %v1294_v23 = vadd.f32 %v1286_v7, %v1278_v58  ;;  %v1276_v38 = vadd.f32 %v1268_v31, %v1260_v1  ;;  %v1340_v24 = vmul.f32 -4.596867, %v1332_v59 }
 0x43d   : > { %v1325_v40 = vadd.f32 %v5283_v18, %v1317_v9  ;;  %v1335_v37 = vsel %vm1311_vm8, %v1327_v17, 0.0  ;;  %v1342_v52 = vmul.f32 -4.596867, %v1334_v19  ;;  %v3557_v2 = vpack.c.bf16 %v1327_v17, %v1326_v20 }
 0x43e   : > { %v5327_v14 = vadd.f32 %v5247_v26, %v1294_v23  ;;  %v1292_v11 = vadd.f32 %v1284_v47, %v1276_v38  ;;  %v5330_v55 = vadd.f32 %v1340_v24, %v5117_v53  ;;  %v1343_v15 = vmul.f32 -4.596867, %v1335_v37 }
 0x43f   : > { %v1333_v7 = vsel %vm1309_vm9, %v1325_v40, 0.0  ;;  %v3554_v1 = vpack.c.bf16 %v1325_v40, %v1324_v62  ;;  %v5335_v45 = vadd.f32 %v1342_v52, %v5122_v16  ;;  %vm1312_vm12 = vcmp.gt.f32.partialorder %v5321_v22, 0.0 }
 0x440   : > { %v5339_v4 = vadd.f32 %v5247_v26, %v1292_v11  ;;  %v1341_v5 = vmul.f32 -4.596867, %v1333_v7  ;;  %v5342_v20 = vadd.f32 %v1343_v15, %v5129_v33  ;;  %v1320_v53 = vmul.f32 %v5264_v10, %v5321_v22 }
 0x441   : > { %4041 = vmatprep.mubr.msk.bf16.mxu0 %vm5315_vm11, %v3554_v1  ;;  %vm1314_vm13 = vcmp.gt.f32.partialorder %v5305_v28, 0.0  ;;  %vm1315_vm14 = vcmp.gt.f32.partialorder %v5327_v14, 0.0  ;;  %v1322_v16 = vmul.f32 %v5264_v10, %v5305_v28  ;;  %v1323_v26 = vmul.f32 %v5264_v10, %v5327_v14 }
 0x442   : > { %v5355_v47 = vadd.f32 %v1341_v5, %v5142_v57  ;;  %4042 = vmatmul.mubr.msk.bf16.vlgmr.msra.gmra.mxu0 %vm5300_vm10, %v3557_v2  ;;  %vm1313_vm15 = vcmp.gt.f32.partialorder %v5339_v4, 0.0  ;;  %v1321_v33 = vmul.f32 %v5264_v10, %v5339_v4  ;;  %v1328_v8 = vadd.f32 %v5283_v18, %v1320_v53  ;;  %vm5367_vm0 = vmpackc.low %vm1315_vm14, %vm1314_vm13  ;;  %v5436_v53 = vld [vmem:[%s7293_s6 + $0x7] ss:$0 sm:$0xff] }
 0x443   : > { %vm5373_vm1 = vmpackc.low %vm1313_vm15, %vm1312_vm12  ;;  %v1330_v41 = vadd.f32 %v5283_v18, %v1322_v16  ;;  %v1331_v25 = vadd.f32 %v5283_v18, %v1323_v26  ;;  %4074 = vmatpush3.bf16.msra.mxu0 %v5171_v21  ;;  %v1451_v52 = vmul.f32 -0.46921703, %v4552_v27  ;;  %v1449_v11 = vmul.f32 -0.46921703, %v4557_v30 }
 0x444   : > { %v1329_v60 = vadd.f32 %v5283_v18, %v1321_v33  ;;  %v1336_v62 = vsel %vm1312_vm12, %v1328_v8, 0.0  ;;  %4075 = vmatprep.subr.bf16.mxu0 %v5180_v61  ;;  %v1425_v7 = vmul.f32 1.4692171, %v5269_v42  ;;  %v1452_v5 = vmul.f32 -0.46921703, %v4565_v34 }
 0x445   : > { %v1344_v19 = vmul.f32 -4.596867, %v1336_v62  ;;  %v1338_v54 = vsel %vm1314_vm13, %v1330_v41, 0.0  ;;  %v1339_v58 = vsel %vm1315_vm14, %v1331_v25, 0.0  ;;  %v3563_v31 = vpack.c.bf16 %v1331_v25, %v1330_v41 }
 0x446   : > { %v1337_v6 = vsel %vm1313_vm15, %v1329_v60, 0.0  ;;  %v3560_v9 = vpack.c.bf16 %v1329_v60, %v1328_v8  ;;  %v1346_v59 = vmul.f32 -4.596867, %v1338_v54  ;;  %v1347_v32 = vmul.f32 -4.596867, %v1339_v58 }
 0x447   : > { %v1345_v17 = vmul.f32 -4.596867, %v1337_v6  ;;  %v5389_v23 = vadd.f32 %v1344_v19, %v5190_v49  ;;  %4076 = vmatpush3.bf16.msra.mxu0 %v5180_v61  ;;  %v5416_v49 = vld [vmem:[%s7291_s4 + $0x8] sm:$0xff]   ;;  %v1455_v26 = vmul.f32 -0.46921703, %v4582_v44 }
 0x448   : > { %4045 = vmatprep.mubr.msk.bf16.mxu0 %vm5373_vm1, %v3560_v9  ;;  %v5395_v38 = vadd.f32 %v1346_v59, %v5196_v35  ;;  %v5398_v24 = vadd.f32 %v1347_v32, %v5199_v48  ;;  %4077 = vmatprep.subr.bf16.mxu0 %v5204_v43  ;;  %v5423_v35 = vld [vmem:[%s7291_s4] sm:$0xff]   ;;  %v1428_v13 = vmul.f32 1.4692171, %v5274_v12  ;;  %v1426_v42 = vmul.f32 1.4692171, %v5289_v51 }
 0x449   : > { %v5402_v40 = vadd.f32 %v1345_v17, %v5208_v29  ;;  %v1427_v29 = vmul.f32 1.4692171, %v5256_v3  ;;  %v1450_v3 = vmul.f32 -0.46921703, %v4575_v39  ;;  %v1453_v25 = vmul.f32 -0.46921703, %v4591_v50 }
 0x44a   : > { %4046 = vmatmul.mubr.msk.bf16.gmra.mxu0 %vm5367_vm0, %v3563_v31  ;;  %v1456_v60 = vmul.f32 -0.46921703, %v4602_v56  ;;  %v1431_v6 = vmul.f32 1.4692171, %v5305_v28  ;;  %v1429_v9 = vmul.f32 1.4692171, %v5321_v22 }
 0x44b   : > { %4078 = vmatpush3.bf16.msra.mxu0 %v5204_v43  ;;  %v1454_v12 = vmul.f32 -0.46921703, %v4613_v63 }
 0x44c   : > { %4079 = vmatprep.subr.bf16.mxu0 %v5216_v0 }
 0x44f   : > { %4080 = vmatpush3.bf16.msra.mxu0 %v5216_v0 }
 0x450   : > { %4081 = vmatprep.subr.bf16.mxu0 %v5223_v36 }
 0x453   : > { %4082 = vmatpush3.bf16.msra.mxu0 %v5223_v36 }
 0x454   : > { %4083 = vmatprep.subr.bf16.mxu0 %v5230_v46 }
 0x457   : > { %4084 = vmatpush3.bf16.msra.mxu0 %v5230_v46 }
 0x458   : > { %4085 = vmatprep.subr.bf16.mxu0 %v5416_v49 }
 0x45b   : > { %4086 = vmatpush3.bf16.msra.mxu0 %v5416_v49 }
 0x45c   : > { %4087 = vmatprep.subr.bf16.mxu0 %v5423_v35 }
 0x45f   : > { %4088 = vmatpush3.bf16.msra.mxu0 %v5423_v35 }
 0x460   : > { %4121 = vmatprep.subr.bf16.mxu0 %v5171_v21 }
 0x502   : > { %v4043_v48 = vpop.f32.mrf.mxu0 }
 0x503   : > { %v1435_v37 = vmul.f32 -0.47002345, %v4043_v48 }
 0x504   : > { %v1394_v2 = vpop.f32.mrf.mxu0 }
 0x505   : > { %v1443_v15 = vadd.f32 %v1435_v37, %v1427_v29  ;;  %v1433_v1 = vmul.f32 -0.47002345, %v1394_v2  ;;  %v1432_v37 = vmul.f32 1.4692171, %v5327_v14 }
 0x506   : > { %v4044_v16 = vpop.f32.mrf.mxu0 }
 0x507   : > { %v1459_v33 = vadd.f32 %v1451_v52, %v1443_v15  ;;  %v1441_v8 = vadd.f32 %v1433_v1, %v1425_v7  ;;  %v1436_v57 = vmul.f32 -0.47002345, %v4044_v16  ;;  %v1430_v52 = vmul.f32 1.4692171, %v5339_v4 }
 0x508   : > { %v1397_v41 = vpop.f32.mrf.mxu0 }
 0x509   : > { %v5445_v62 = vadd.f32 %v5436_v53, %v1459_v33  ;;  %v1457_v19 = vadd.f32 %v1449_v11, %v1441_v8  ;;  %v1444_v54 = vadd.f32 %v1436_v57, %v1428_v13  ;;  %v1434_v58 = vmul.f32 -0.47002345, %v1397_v41 }
 0x50a   : > { %v4047_v31 = vpop.f32.mrf.mxu0 }
 0x50b   : > { %v1488_v51 = vmul.f32 %v5264_v10, %v5445_v62  ;;  %v5453_v59 = vadd.f32 %v5436_v53, %v1457_v19  ;;  %v1460_v32 = vadd.f32 %v1452_v5, %v1444_v54  ;;  %v1442_v17 = vadd.f32 %v1434_v58, %v1426_v42 }
 0x50c   : > { %v1439_v48 = vmul.f32 -0.47002345, %v4047_v31  ;;  %v1410_v29 = vpop.f32.mrf.mxu0  ;;  %vm1480_vm3 = vcmp.gt.f32.partialorder %v5445_v62, 0.0 }
 0x50d   : > { %v5458_v28 = vadd.f32 %v5436_v53, %v1460_v32  ;;  %v1458_v22 = vadd.f32 %v1450_v3, %v1442_v17  ;;  %v1437_v2 = vmul.f32 -0.47002345, %v1410_v29  ;;  %vm1478_vm4 = vcmp.gt.f32.partialorder %v5453_v59, 0.0 }
 0x50e   : > { %v1447_v11 = vadd.f32 %v1439_v48, %v1431_v6  ;;  %v4048_v15 = vpop.f32.mrf.mxu0  ;;  %v1486_v7 = vmul.f32 %v5264_v10, %v5453_v59  ;;  %v1496_v1 = vadd.f32 %v5283_v18, %v1488_v51 }
 0x50f   : > { %v1489_v14 = vmul.f32 %v5264_v10, %v5458_v28  ;;  %v5468_v4 = vadd.f32 %v5436_v53, %v1458_v22  ;;  %v1445_v5 = vadd.f32 %v1437_v2, %v1429_v9  ;;  %v1440_v16 = vmul.f32 -0.47002345, %v4048_v15 }
 0x510   : > { %v1463_v3 = vadd.f32 %v1455_v26, %v1447_v11  ;;  %v1413_v33 = vpop.f32.mrf.mxu0  ;;  %v1494_v8 = vadd.f32 %v5283_v18, %v1486_v7  ;;  %vm1481_vm5 = vcmp.gt.f32.partialorder %v5458_v28, 0.0  ;;  %v1504_v13 = vsel %vm1480_vm3, %v1496_v1, 0.0 }
 0x511   : > { %v1461_v57 = vadd.f32 %v1453_v25, %v1445_v5  ;;  %v1448_v41 = vadd.f32 %v1440_v16, %v1432_v37  ;;  %v1438_v42 = vmul.f32 -0.47002345, %v1413_v33  ;;  %vm1479_vm6 = vcmp.gt.f32.partialorder %v5468_v4, 0.0  ;;  %vm5479_vm7 = vmpackc.low %vm1481_vm5, %vm1480_vm3 }
 0x512   : > { %v5484_v26 = vadd.f32 %v5436_v53, %v1463_v3  ;;  %v1487_v54 = vmul.f32 %v5264_v10, %v5468_v4  ;;  %v1502_v25 = vsel %vm1478_vm4, %v1494_v8, 0.0  ;;  %vm5494_vm8 = vmpackc.low %vm1479_vm6, %vm1478_vm4  ;;  %v1497_v31 = vadd.f32 %v5283_v18, %v1489_v14 }
 0x513   : > { %v5500_v6 = vadd.f32 %v5436_v53, %v1461_v57  ;;  %v1464_v9 = vadd.f32 %v1456_v60, %v1448_v41  ;;  %v1446_v51 = vadd.f32 %v1438_v42, %v1430_v52  ;;  %v1510_v32 = vmul.f32 -2.9553902, %v1502_v25 }
 0x514   : > { %v1495_v17 = vadd.f32 %v5283_v18, %v1487_v54  ;;  %v1505_v48 = vsel %vm1481_vm5, %v1497_v31, 0.0  ;;  %v1512_v29 = vmul.f32 -2.9553902, %v1504_v13  ;;  %v3570_v37 = vpack.c.bf16 %v1497_v31, %v1496_v1 }
 0x515   : > { %v5506_v22 = vadd.f32 %v5436_v53, %v1464_v9  ;;  %v1462_v2 = vadd.f32 %v1454_v12, %v1446_v51  ;;  %v5509_v11 = vadd.f32 %v1510_v32, %v5330_v55  ;;  %v1513_v15 = vmul.f32 -2.9553902, %v1505_v48 }
 0x516   : > { %v1503_v60 = vsel %vm1479_vm6, %v1495_v17, 0.0  ;;  %v3567_v52 = vpack.c.bf16 %v1495_v17, %v1494_v8  ;;  %v5514_v7 = vadd.f32 %v1512_v29, %v5335_v45  ;;  %vm1482_vm9 = vcmp.gt.f32.partialorder %v5500_v6, 0.0 }
 0x517   : > { %v5518_v14 = vadd.f32 %v5436_v53, %v1462_v2  ;;  %v1511_v1 = vmul.f32 -2.9553902, %v1503_v60  ;;  %v5521_v5 = vadd.f32 %v1513_v15, %v5342_v20  ;;  %v1490_v55 = vmul.f32 %v5264_v10, %v5500_v6 }
 0x518   : > { %4065 = vmatprep.mubr.msk.bf16.mxu1 %vm5494_vm8, %v3567_v52  ;;  %vm1484_vm10 = vcmp.gt.f32.partialorder %v5484_v26, 0.0  ;;  %vm1485_vm11 = vcmp.gt.f32.partialorder %v5506_v22, 0.0  ;;  %v1492_v45 = vmul.f32 %v5264_v10, %v5484_v26  ;;  %v1493_v53 = vmul.f32 %v5264_v10, %v5506_v22 }
 0x519   : > { %v5534_v12 = vadd.f32 %v1511_v1, %v5355_v47  ;;  %4066 = vmatmul.mubr.msk.bf16.vlgmr.msra.gmra.mxu1 %vm5479_vm7, %v3570_v37  ;;  %vm1483_vm12 = vcmp.gt.f32.partialorder %v5518_v14, 0.0  ;;  %v1491_v20 = vmul.f32 %v5264_v10, %v5518_v14  ;;  %v1498_v16 = vadd.f32 %v5283_v18, %v1490_v55  ;;  %vm5546_vm13 = vmpackc.low %vm1485_vm11, %vm1484_vm10  ;;  %v5605_v55 = vld [vmem:[%s7293_s6 + $0x8] ss:$0 sm:$0xff] }
 0x51a   : > { %vm5552_vm14 = vmpackc.low %vm1483_vm12, %vm1482_vm9  ;;  %v1500_v33 = vadd.f32 %v5283_v18, %v1492_v45  ;;  %v1501_v8 = vadd.f32 %v5283_v18, %v1493_v53  ;;  %4098 = vmatpush3.bf16.msra.mxu1 %v5171_v21  ;;  %v1619_v2 = vmul.f32 -0.43042755, %v4557_v30  ;;  %v1595_v60 = vmul.f32 1.4304276, %v5453_v59 }
 0x51b   : > { %v1499_v13 = vadd.f32 %v5283_v18, %v1491_v20  ;;  %v1506_v57 = vsel %vm1482_vm9, %v1498_v16, 0.0  ;;  %4099 = vmatprep.subr.bf16.mxu1 %v5180_v61  ;;  %v1622_v1 = vmul.f32 -0.43042755, %v4565_v34  ;;  %v1625_v53 = vmul.f32 -0.43042755, %v4582_v44 }
 0x51c   : > { %v1514_v41 = vmul.f32 -2.9553902, %v1506_v57  ;;  %v1508_v42 = vsel %vm1484_vm10, %v1500_v33, 0.0  ;;  %v1509_v19 = vsel %vm1485_vm11, %v1501_v8, 0.0  ;;  %v3576_v54 = vpack.c.bf16 %v1501_v8, %v1500_v33 }
 0x51d   : > { %v1507_v25 = vsel %vm1483_vm12, %v1499_v13, 0.0  ;;  %v3573_v58 = vpack.c.bf16 %v1499_v13, %v1498_v16  ;;  %v1516_v31 = vmul.f32 -2.9553902, %v1508_v42  ;;  %v1517_v9 = vmul.f32 -2.9553902, %v1509_v19 }
 0x51e   : > { %v1515_v51 = vmul.f32 -2.9553902, %v1507_v25  ;;  %v5568_v32 = vadd.f32 %v1514_v41, %v5389_v23  ;;  %4100 = vmatpush3.bf16.msra.mxu1 %v5180_v61  ;;  %v1598_v3 = vmul.f32 1.4304276, %v5458_v28  ;;  %v1596_v59 = vmul.f32 1.4304276, %v5468_v4 }
 0x51f   : > { %4069 = vmatprep.mubr.msk.bf16.mxu1 %vm5552_vm14, %v3573_v58  ;;  %v5574_v17 = vadd.f32 %v1516_v31, %v5395_v38  ;;  %v5577_v48 = vadd.f32 %v1517_v9, %v5398_v24  ;;  %4101 = vmatprep.subr.bf16.mxu1 %v5204_v43  ;;  %v1597_v38 = vmul.f32 1.4304276, %v5445_v62  ;;  %v1620_v62 = vmul.f32 -0.43042755, %v4575_v39 }
 0x520   : > { %v5581_v29 = vadd.f32 %v1515_v51, %v5402_v40  ;;  %v1621_v40 = vmul.f32 -0.43042755, %v4552_v27  ;;  %v1623_v8 = vmul.f32 -0.43042755, %v4591_v50  ;;  %v1626_v13 = vmul.f32 -0.43042755, %v4602_v56 }
 0x521   : > { %4070 = vmatmul.mubr.msk.bf16.gmra.mxu1 %vm5546_vm13, %v3576_v54  ;;  %v1601_v25 = vmul.f32 1.4304276, %v5484_v26  ;;  %v1599_v58 = vmul.f32 1.4304276, %v5500_v6  ;;  %v1624_v28 = vmul.f32 -0.43042755, %v4613_v63 }
 0x522   : > { %4102 = vmatpush3.bf16.msra.mxu1 %v5204_v43 }
 0x523   : > { %4103 = vmatprep.subr.bf16.mxu1 %v5216_v0 }
 0x526   : > { %4104 = vmatpush3.bf16.msra.mxu1 %v5216_v0 }
 0x527   : > { %4105 = vmatprep.subr.bf16.mxu1 %v5223_v36 }
 0x52a   : > { %4106 = vmatpush3.bf16.msra.mxu1 %v5223_v36 }
 0x52b   : > { %4107 = vmatprep.subr.bf16.mxu1 %v5230_v46 }
 0x52e   : > { %4108 = vmatpush3.bf16.msra.mxu1 %v5230_v46 }
 0x52f   : > { %4109 = vmatprep.subr.bf16.mxu1 %v5416_v49 }
 0x532   : > { %4110 = vmatpush3.bf16.msra.mxu1 %v5416_v49 }
 0x533   : > { %4111 = vmatprep.subr.bf16.mxu1 %v5423_v35 }
 0x536   : > { %4112 = vmatpush3.bf16.msra.mxu1 %v5423_v35 }
 0x537   : > { %4145 = vmatprep.subr.bf16.mxu1 %v5171_v21 }
 0x5d9   : > { %v4067_v23 = vpop.f32.mrf.mxu1 }
 0x5da   : > { %v1605_v24 = vmul.f32 -0.4322533, %v4067_v23 }
 0x5db   : > { %v1564_v37 = vpop.f32.mrf.mxu1 }
 0x5dc   : > { %v1613_v15 = vadd.f32 %v1605_v24, %v1597_v38  ;;  %v1603_v52 = vmul.f32 -0.4322533, %v1564_v37  ;;  %v1602_v24 = vmul.f32 1.4304276, %v5506_v22 }
 0x5dd   : > { %v4068_v45 = vpop.f32.mrf.mxu1 }
 0x5de   : > { %v1629_v20 = vadd.f32 %v1621_v40, %v1613_v15  ;;  %v1611_v16 = vadd.f32 %v1603_v52, %v1595_v60  ;;  %v1606_v47 = vmul.f32 -0.4322533, %v4068_v45  ;;  %v1600_v40 = vmul.f32 1.4304276, %v5518_v14 }
 0x5df   : > { %v1567_v33 = vpop.f32.mrf.mxu1 }
 0x5e0   : > { %v5614_v57 = vadd.f32 %v5605_v55, %v1629_v20  ;;  %v1627_v41 = vadd.f32 %v1619_v2, %v1611_v16  ;;  %v1614_v42 = vadd.f32 %v1606_v47, %v1598_v3  ;;  %v1604_v19 = vmul.f32 -0.4322533, %v1567_v33 }
 0x5e1   : > { %v4071_v54 = vpop.f32.mrf.mxu1 }
 0x5e2   : > { %v1658_v4 = vmul.f32 %v5264_v10, %v5614_v57  ;;  %v5622_v31 = vadd.f32 %v5605_v55, %v1627_v41  ;;  %v1630_v9 = vadd.f32 %v1622_v1, %v1614_v42  ;;  %v1612_v51 = vadd.f32 %v1604_v19, %v1596_v59 }
 0x5e3   : > { %v1609_v23 = vmul.f32 -0.4322533, %v4071_v54  ;;  %v1580_v38 = vpop.f32.mrf.mxu1  ;;  %vm1650_vm15 = vcmp.gt.f32.partialorder %v5614_v57, 0.0 }
 0x5e4   : > { %v5627_v26 = vadd.f32 %v5605_v55, %v1630_v9  ;;  %v1628_v6 = vadd.f32 %v1620_v62, %v1612_v51  ;;  %v1607_v37 = vmul.f32 -0.4322533, %v1580_v38  ;;  %vm1648_vm0 = vcmp.gt.f32.partialorder %v5622_v31, 0.0 }
 0x5e5   : > { %v1617_v2 = vadd.f32 %v1609_v23, %v1601_v25  ;;  %v4072_v15 = vpop.f32.mrf.mxu1  ;;  %v1656_v60 = vmul.f32 %v5264_v10, %v5622_v31  ;;  %v1666_v52 = vadd.f32 %v5283_v18, %v1658_v4 }
 0x5e6   : > { %v1659_v22 = vmul.f32 %v5264_v10, %v5627_v26  ;;  %v5637_v14 = vadd.f32 %v5605_v55, %v1628_v6  ;;  %v1615_v1 = vadd.f32 %v1607_v37, %v1599_v58  ;;  %v1610_v45 = vmul.f32 -0.4322533, %v4072_v15 }
 0x5e7   : > { %v1633_v62 = vadd.f32 %v1625_v53, %v1617_v2  ;;  %v1583_v20 = vpop.f32.mrf.mxu1  ;;  %v1664_v16 = vadd.f32 %v5283_v18, %v1656_v60  ;;  %vm1651_vm1 = vcmp.gt.f32.partialorder %v5627_v26, 0.0  ;;  %v1674_v3 = vsel %vm1650_vm15, %v1666_v52, 0.0 }
 0x5e8   : > { %v1631_v47 = vadd.f32 %v1623_v8, %v1615_v1  ;;  %v1618_v33 = vadd.f32 %v1610_v45, %v1602_v24  ;;  %v1608_v59 = vmul.f32 -0.4322533, %v1583_v20  ;;  %vm1649_vm3 = vcmp.gt.f32.partialorder %v5637_v14, 0.0  ;;  %vm5648_vm4 = vmpackc.low %vm1651_vm1, %vm1650_vm15 }
 0x5e9   : > { %v5653_v53 = vadd.f32 %v5605_v55, %v1633_v62  ;;  %v1657_v42 = vmul.f32 %v5264_v10, %v5637_v14  ;;  %v1672_v8 = vsel %vm1648_vm0, %v1664_v16, 0.0  ;;  %vm5663_vm5 = vmpackc.low %vm1649_vm3, %vm1648_vm0  ;;  %v1667_v54 = vadd.f32 %v5283_v18, %v1659_v22 }
 0x5ea   : > { %v5669_v25 = vadd.f32 %v5605_v55, %v1631_v47  ;;  %v1634_v58 = vadd.f32 %v1626_v13, %v1618_v33  ;;  %v1616_v4 = vadd.f32 %v1608_v59, %v1600_v40  ;;  %v1680_v9 = vmul.f32 -1.9428546, %v1672_v8 }
 0x5eb   : > { %v1665_v51 = vadd.f32 %v5283_v18, %v1657_v42  ;;  %v1675_v23 = vsel %vm1651_vm1, %v1667_v54, 0.0  ;;  %v1682_v38 = vmul.f32 -1.9428546, %v1674_v3  ;;  %v3583_v24 = vpack.c.bf16 %v1667_v54, %v1666_v52 }
 0x5ec   : > { %v5675_v6 = vadd.f32 %v5605_v55, %v1634_v58  ;;  %v1632_v37 = vadd.f32 %v1624_v28, %v1616_v4  ;;  %v5678_v2 = vadd.f32 %v1680_v9, %v5509_v11  ;;  %v1683_v15 = vmul.f32 -1.9428546, %v1675_v23 }
 0x5ed   : > { %v1673_v13 = vsel %vm1649_vm3, %v1665_v51, 0.0  ;;  %v3580_v40 = vpack.c.bf16 %v1665_v51, %v1664_v16  ;;  %v5683_v60 = vadd.f32 %v1682_v38, %v5514_v7  ;;  %vm1652_vm6 = vcmp.gt.f32.partialorder %v5669_v25, 0.0 }
 0x5ee   : > { %v5687_v22 = vadd.f32 %v5605_v55, %v1632_v37  ;;  %v1681_v52 = vmul.f32 -1.9428546, %v1673_v13  ;;  %v5690_v1 = vadd.f32 %v1683_v15, %v5521_v5  ;;  %v1660_v11 = vmul.f32 %v5264_v10, %v5669_v25  ;;  %v5774_v37 = vld [vmem:[%s7293_s6 + $0x9] ss:$0 sm:$0xff] }
 0x5ef   : > { %4089 = vmatprep.mubr.msk.bf16.mxu0 %vm5663_vm5, %v3580_v40  ;;  %vm1654_vm7 = vcmp.gt.f32.partialorder %v5653_v53, 0.0  ;;  %vm1655_vm8 = vcmp.gt.f32.partialorder %v5675_v6, 0.0  ;;  %v1662_v7 = vmul.f32 %v5264_v10, %v5653_v53  ;;  %v1663_v55 = vmul.f32 %v5264_v10, %v5675_v6 }
 0x5f0   : > { %v5703_v28 = vadd.f32 %v1681_v52, %v5534_v12  ;;  %4090 = vmatmul.mubr.msk.bf16.vlgmr.msra.gmra.mxu0 %vm5648_vm4, %v3583_v24  ;;  %vm1653_vm9 = vcmp.gt.f32.partialorder %v5687_v22, 0.0  ;;  %v1661_v5 = vmul.f32 %v5264_v10, %v5687_v22  ;;  %v1668_v45 = vadd.f32 %v5283_v18, %v1660_v11  ;;  %vm5715_vm10 = vmpackc.low %vm1655_vm8, %vm1654_vm7 }
 0x5f1   : > { %vm5721_vm11 = vmpackc.low %vm1653_vm9, %vm1652_vm6  ;;  %v1670_v20 = vadd.f32 %v5283_v18, %v1662_v7  ;;  %v1671_v16 = vadd.f32 %v5283_v18, %v1663_v55  ;;  %4122 = vmatpush3.bf16.msra.mxu0 %v5171_v21  ;;  %v1792_v24 = vmul.f32 -0.39163804, %v4565_v34  ;;  %v1795_v15 = vmul.f32 -0.39163804, %v4582_v44 }
 0x5f2   : > { %v1669_v3 = vadd.f32 %v5283_v18, %v1661_v5  ;;  %v1676_v47 = vsel %vm1652_vm6, %v1668_v45, 0.0  ;;  %4123 = vmatprep.subr.bf16.mxu0 %v5180_v61  ;;  %v1768_v52 = vmul.f32 1.391638, %v5627_v26  ;;  %v1793_v55 = vmul.f32 -0.39163804, %v4591_v50 }
 0x5f3   : > { %v1684_v33 = vmul.f32 -1.9428546, %v1676_v47  ;;  %v1678_v59 = vsel %vm1654_vm7, %v1670_v20, 0.0  ;;  %v1679_v41 = vsel %vm1655_vm8, %v1671_v16, 0.0  ;;  %v3589_v42 = vpack.c.bf16 %v1671_v16, %v1670_v20 }
 0x5f4   : > { %v1677_v8 = vsel %vm1653_vm9, %v1669_v3, 0.0  ;;  %v3586_v19 = vpack.c.bf16 %v1669_v3, %v1668_v45  ;;  %v1686_v54 = vmul.f32 -1.9428546, %v1678_v59  ;;  %v1687_v58 = vmul.f32 -1.9428546, %v1679_v41 }
 0x5f5   : > { %v1685_v4 = vmul.f32 -1.9428546, %v1677_v8  ;;  %v5737_v9 = vadd.f32 %v1684_v33, %v5568_v32  ;;  %4124 = vmatpush3.bf16.msra.mxu0 %v5180_v61  ;;  %v1796_v5 = vmul.f32 -0.39163804, %v4602_v56  ;;  %v1771_v3 = vmul.f32 1.391638, %v5653_v53 }
 0x5f6   : > { %4093 = vmatprep.mubr.msk.bf16.mxu0 %vm5721_vm11, %v3586_v19  ;;  %v5743_v51 = vadd.f32 %v1686_v54, %v5574_v17  ;;  %v5746_v23 = vadd.f32 %v1687_v58, %v5577_v48  ;;  %4125 = vmatprep.subr.bf16.mxu0 %v5204_v43  ;;  %v1789_v17 = vmul.f32 -0.39163804, %v4557_v30  ;;  %v1765_v48 = vmul.f32 1.391638, %v5622_v31 }
 0x5f7   : > { %v5750_v38 = vadd.f32 %v1685_v4, %v5581_v29  ;;  %v1766_v31 = vmul.f32 1.391638, %v5637_v14  ;;  %v1769_v47 = vmul.f32 1.391638, %v5669_v25  ;;  %v1794_v26 = vmul.f32 -0.39163804, %v4613_v63 }
 0x5f8   : > { %4094 = vmatmul.mubr.msk.bf16.gmra.mxu0 %vm5715_vm10, %v3589_v42  ;;  %v1772_v19 = vmul.f32 1.391638, %v5675_v6  ;;  %v1770_v54 = vmul.f32 1.391638, %v5687_v22 }
 0x5f9   : > { %4126 = vmatpush3.bf16.msra.mxu0 %v5204_v43  ;;  %v1767_v43 = vmul.f32 1.391638, %v5614_v57  ;;  %v1790_v57 = vmul.f32 -0.39163804, %v4575_v39 }
 0x5fa   : > { %4127 = vmatprep.subr.bf16.mxu0 %v5216_v0 }
 0x5fd   : > { %4128 = vmatpush3.bf16.msra.mxu0 %v5216_v0 }
 0x5fe   : > { %4129 = vmatprep.subr.bf16.mxu0 %v5223_v36 }
 0x601   : > { %4130 = vmatpush3.bf16.msra.mxu0 %v5223_v36  ;;  %v1791_v36 = vmul.f32 -0.39163804, %v4552_v27 }
 0x602   : > { %4131 = vmatprep.subr.bf16.mxu0 %v5230_v46 }
 0x605   : > { %4132 = vmatpush3.bf16.msra.mxu0 %v5230_v46 }
 0x606   : > { %4133 = vmatprep.subr.bf16.mxu0 %v5416_v49 }
 0x609   : > { %4134 = vmatpush3.bf16.msra.mxu0 %v5416_v49 }
 0x60a   : > { %4135 = vmatprep.subr.bf16.mxu0 %v5423_v35 }
 0x60d   : > { %4136 = vmatpush3.bf16.msra.mxu0 %v5423_v35 }
 0x60e   : > { %4169 = vmatprep.subr.bf16.mxu0 %v5171_v21 }
 0x6b0   : > { %v4091_v61 = vpop.f32.mrf.mxu0 }
 0x6b1   : > { %v1775_v0 = vmul.f32 -0.39544863, %v4091_v61 }
 0x6b2   : > { %v1734_v32 = vpop.f32.mrf.mxu0 }
 0x6b3   : > { %v1783_v46 = vadd.f32 %v1775_v0, %v1767_v43  ;;  %v1773_v29 = vmul.f32 -0.39544863, %v1734_v32 }
 0x6b4   : > { %v4092_v21 = vpop.f32.mrf.mxu0 }
 0x6b5   : > { %v1799_v13 = vadd.f32 %v1791_v36, %v1783_v46  ;;  %v1781_v40 = vadd.f32 %v1773_v29, %v1765_v48  ;;  %v1776_v11 = vmul.f32 -0.39544863, %v4092_v21 }
 0x6b6   : > { %v1737_v7 = vpop.f32.mrf.mxu0 }
 0x6b7   : > { %v5783_v45 = vadd.f32 %v5774_v37, %v1799_v13  ;;  %v1797_v62 = vadd.f32 %v1789_v17, %v1781_v40  ;;  %v1784_v12 = vadd.f32 %v1776_v11, %v1768_v52  ;;  %v1774_v20 = vmul.f32 -0.39544863, %v1737_v7 }
 0x6b8   : > { %v4095_v16 = vpop.f32.mrf.mxu0 }
 0x6b9   : > { %v1828_v14 = vmul.f32 %v5264_v10, %v5783_v45  ;;  %v5791_v33 = vadd.f32 %v5774_v37, %v1797_v62  ;;  %v1800_v59 = vadd.f32 %v1792_v24, %v1784_v12  ;;  %v1782_v41 = vadd.f32 %v1774_v20, %v1766_v31 }
 0x6ba   : > { %v1779_v42 = vmul.f32 -0.39544863, %v4095_v16  ;;  %v1750_v8 = vpop.f32.mrf.mxu0  ;;  %vm1820_vm12 = vcmp.gt.f32.partialorder %v5783_v45, 0.0 }
 0x6bb   : > { %v5796_v53 = vadd.f32 %v5774_v37, %v1800_v59  ;;  %v1798_v25 = vadd.f32 %v1790_v57, %v1782_v41  ;;  %v1777_v58 = vmul.f32 -0.39544863, %v1750_v8  ;;  %vm1818_vm13 = vcmp.gt.f32.partialorder %v5791_v33, 0.0 }
 0x6bc   : > { %v1787_v4 = vadd.f32 %v1779_v42, %v1771_v3  ;;  %v4096_v61 = vpop.f32.mrf.mxu0  ;;  %v1826_v43 = vmul.f32 %v5264_v10, %v5791_v33  ;;  %v1836_v0 = vadd.f32 %v5283_v18, %v1828_v14 }
 0x6bd   : > { %v1829_v6 = vmul.f32 %v5264_v10, %v5796_v53  ;;  %v5806_v22 = vadd.f32 %v5774_v37, %v1798_v25  ;;  %v1785_v36 = vadd.f32 %v1777_v58, %v1769_v47  ;;  %v1780_v32 = vmul.f32 -0.39544863, %v4096_v61 }
 0x6be   : > { %v1803_v17 = vadd.f32 %v1795_v15, %v1787_v4  ;;  %v1753_v46 = vpop.f32.mrf.mxu0  ;;  %v1834_v48 = vadd.f32 %v5283_v18, %v1826_v43  ;;  %vm1821_vm14 = vcmp.gt.f32.partialorder %v5796_v53, 0.0  ;;  %v1844_v29 = vsel %vm1820_vm12, %v1836_v0, 0.0 }
 0x6bf   : > { %v1801_v24 = vadd.f32 %v1793_v55, %v1785_v36  ;;  %v1788_v21 = vadd.f32 %v1780_v32, %v1772_v19  ;;  %v1778_v57 = vmul.f32 -0.39544863, %v1753_v46  ;;  %vm1819_vm15 = vcmp.gt.f32.partialorder %v5806_v22, 0.0  ;;  %vm5817_vm0 = vmpackc.low %vm1821_vm14, %vm1820_vm12  ;;  %v5910_v32 = vld [vmem:[%s7291_s4 + $0x30] sm:$0xff]  }
 0x6c0   : > { %v5822_v15 = vadd.f32 %v5774_v37, %v1803_v17  ;;  %v1827_v40 = vmul.f32 %v5264_v10, %v5806_v22  ;;  %v1842_v52 = vsel %vm1818_vm13, %v1834_v48, 0.0  ;;  %vm5832_vm1 = vmpackc.low %vm1819_vm15, %vm1818_vm13  ;;  %v1837_v7 = vadd.f32 %v5283_v18, %v1829_v6 }
 0x6c1   : > { %v5838_v31 = vadd.f32 %v5774_v37, %v1801_v24  ;;  %v1804_v55 = vadd.f32 %v1796_v5, %v1788_v21  ;;  %v1786_v62 = vadd.f32 %v1778_v57, %v1770_v54  ;;  %v1850_v12 = vmul.f32 -1.308096, %v1842_v52 }
 0x6c2   : > { %v1835_v20 = vadd.f32 %v5283_v18, %v1827_v40  ;;  %v1845_v16 = vsel %vm1821_vm14, %v1837_v7, 0.0  ;;  %v1852_v3 = vmul.f32 -1.308096, %v1844_v29  ;;  %v3596_v47 = vpack.c.bf16 %v1837_v7, %v1836_v0  ;;  %v5901_v0 = vld [vmem:[%s7291_s4 + $0x38] sm:$0xff]   ;;  %v5934_v7 = vld [vmem:[%s7291_s4 + $0x28] sm:$0xff]  }
 0x6c3   : > { %v5844_v14 = vadd.f32 %v5774_v37, %v1804_v55  ;;  %v1802_v59 = vadd.f32 %v1794_v26, %v1786_v62  ;;  %v5847_v41 = vadd.f32 %v1850_v12, %v5678_v2  ;;  %v1853_v42 = vmul.f32 -1.308096, %v1845_v16 }
 0x6c4   : > { %v1843_v5 = vsel %vm1819_vm15, %v1835_v20, 0.0  ;;  %v3593_v8 = vpack.c.bf16 %v1835_v20, %v1834_v48  ;;  %v5852_v19 = vadd.f32 %v1852_v3, %v5683_v60  ;;  %vm1822_vm3 = vcmp.gt.f32.partialorder %v5838_v31, 0.0 }
 0x6c5   : > { %v5856_v54 = vadd.f32 %v5774_v37, %v1802_v59  ;;  %v1851_v25 = vmul.f32 -1.308096, %v1843_v5  ;;  %v5859_v58 = vadd.f32 %v1853_v42, %v5690_v1  ;;  %v1830_v2 = vmul.f32 %v5264_v10, %v5838_v31 }
 0x6c6   : > { %4113 = vmatprep.mubr.msk.bf16.mxu1 %vm5832_vm1, %v3593_v8  ;;  %vm1824_vm4 = vcmp.gt.f32.partialorder %v5822_v15, 0.0  ;;  %vm1825_vm5 = vcmp.gt.f32.partialorder %v5844_v14, 0.0  ;;  %v1832_v60 = vmul.f32 %v5264_v10, %v5822_v15  ;;  %v1833_v37 = vmul.f32 %v5264_v10, %v5844_v14 }
 0x6c7   : > { %v5872_v26 = vadd.f32 %v1851_v25, %v5703_v28  ;;  %4114 = vmatmul.mubr.msk.bf16.vlgmr.msra.gmra.mxu1 %vm5817_vm0, %v3596_v47  ;;  %vm1823_vm6 = vcmp.gt.f32.partialorder %v5856_v54, 0.0  ;;  %v1831_v1 = vmul.f32 %v5264_v10, %v5856_v54  ;;  %v1838_v4 = vadd.f32 %v5283_v18, %v1830_v2  ;;  %vm5884_vm7 = vmpackc.low %vm1825_vm5, %vm1824_vm4 }
 0x6c8   : > { %vm5892_vm8 = vmpackc.low %vm1823_vm6, %vm1822_vm3  ;;  %v1840_v10 = vadd.f32 %v5283_v18, %v1832_v60  ;;  %v1841_v43 = vadd.f32 %v5283_v18, %v1833_v37  ;;  %4146 = vmatpush3.bf16.msra.mxu1 %v5901_v0  ;;  %v1937_v62 = vmul.f32 1.3528485, %v5783_v45  ;;  %v1961_v20 = vmul.f32 -0.35284856, %v4552_v27 }
 0x6c9   : > { %v1839_v6 = vadd.f32 %v5283_v18, %v1831_v1  ;;  %v1846_v36 = vsel %vm1822_vm3, %v1838_v4, 0.0  ;;  %4147 = vmatprep.subr.bf16.mxu1 %v5910_v32  ;;  %v1959_v3 = vmul.f32 -0.35284856, %v4557_v30  ;;  %v1935_v59 = vmul.f32 1.3528485, %v5791_v33 }
 0x6ca   : > { %v1854_v17 = vmul.f32 -1.308096, %v1846_v36  ;;  %v1848_v46 = vsel %vm1824_vm4, %v1840_v10, 0.0  ;;  %v1849_v48 = vsel %vm1825_vm5, %v1841_v43, 0.0  ;;  %v3602_v29 = vpack.c.bf16 %v1841_v43, %v1840_v10 }
 0x6cb   : > { %v1847_v18 = vsel %vm1823_vm6, %v1839_v6, 0.0  ;;  %v3599_v24 = vpack.c.bf16 %v1839_v6, %v1838_v4  ;;  %v1856_v21 = vmul.f32 -1.308096, %v1848_v46  ;;  %v1857_v57 = vmul.f32 -1.308096, %v1849_v48 }
 0x6cc   : > { %v1855_v13 = vmul.f32 -1.308096, %v1847_v18  ;;  %v5920_v40 = vadd.f32 %v1854_v17, %v5737_v9  ;;  %4148 = vmatpush3.bf16.msra.mxu1 %v5910_v32  ;;  %v1960_v45 = vmul.f32 -0.35284856, %v4575_v39  ;;  %v1965_v8 = vmul.f32 -0.35284856, %v4582_v44 }
 0x6cd   : > { %4117 = vmatprep.mubr.msk.bf16.mxu1 %vm5892_vm8, %v3599_v24  ;;  %v5926_v52 = vadd.f32 %v1856_v21, %v5743_v51  ;;  %v5929_v11 = vadd.f32 %v1857_v57, %v5746_v23  ;;  %4149 = vmatprep.subr.bf16.mxu1 %v5934_v7  ;;  %v5946_v51 = vld [vmem:[%s7291_s4 + $0x20] sm:$0xff]   ;;  %v5953_v23 = vld [vmem:[%s7291_s4 + $0x18] sm:$0xff]   ;;  %v1938_v60 = vmul.f32 1.3528485, %v5796_v53  ;;  %v1936_v33 = vmul.f32 1.3528485, %v5806_v22 }
 0x6ce   : > { %v5938_v9 = vadd.f32 %v1855_v13, %v5750_v38  ;;  %v5960_v38 = vld [vmem:[%s7291_s4 + $0x10] sm:$0xff]   ;;  %v1963_v4 = vmul.f32 -0.35284856, %v4591_v50  ;;  %v1966_v61 = vmul.f32 -0.35284856, %v4602_v56 }
 0x6cf   : > { %4118 = vmatmul.mubr.msk.bf16.gmra.mxu1 %vm5884_vm7, %v3602_v29  ;;  %v1941_v17 = vmul.f32 1.3528485, %v5822_v15  ;;  %v1939_v46 = vmul.f32 1.3528485, %v5838_v31  ;;  %v1964_v53 = vmul.f32 -0.35284856, %v4613_v63 }
 0x6d0   : > { %4150 = vmatpush3.bf16.msra.mxu1 %v5934_v7  ;;  %v5994_v22 = vld [vmem:[%s7293_s6] ss:$0 sm:$0xff]  ;;  %v1942_v15 = vmul.f32 1.3528485, %v5844_v14  ;;  %v1940_v31 = vmul.f32 1.3528485, %v5856_v54 }
 0x6d1   : > { %4151 = vmatprep.subr.bf16.mxu1 %v5946_v51  ;;  %v6013_v14 = vld [vmem:[%s7293_s6 + $0x1] ss:$0 sm:$0xff] }
 0x6d4   : > { %4152 = vmatpush3.bf16.msra.mxu1 %v5946_v51 }
 0x6d5   : > { %4153 = vmatprep.subr.bf16.mxu1 %v5953_v23 }
 0x6d8   : > { %4154 = vmatpush3.bf16.msra.mxu1 %v5953_v23 }
 0x6d9   : > { %4155 = vmatprep.subr.bf16.mxu1 %v5960_v38 }
 0x6dc   : > { %4156 = vmatpush3.bf16.msra.mxu1 %v5960_v38 }
 0x6dd   : > { %4157 = vmatprep.subr.bf16.mxu1 %v5416_v49 }
 0x6e0   : > { %4158 = vmatpush3.bf16.msra.mxu1 %v5416_v49  ;;  %v1962_v49 = vmul.f32 -0.35284856, %v4565_v34 }
 0x6e1   : > { %4159 = vmatprep.subr.bf16.mxu1 %v5423_v35 }
 0x6e4   : > { %4160 = vmatpush3.bf16.msra.mxu1 %v5423_v35  ;;  %v5977_v35 = vld [vmem:[%s7293_s6 + $0xa] ss:$0 sm:$0xff] }
 0x6e5   : > { %4193 = vmatprep.subr.bf16.mxu1 %v5901_v0 }
 0x787   : > { %v4115_v55 = vpop.f32.mrf.mxu1 }
 0x788   : > { %v1945_v12 = vmul.f32 -0.36019573, %v4115_v55 }
 0x789   : > { %v1904_v16 = vpop.f32.mrf.mxu1 }
 0x78a   : > { %v1953_v47 = vadd.f32 %v1945_v12, %v1937_v62  ;;  %v1943_v42 = vmul.f32 -0.36019573, %v1904_v16 }
 0x78b   : > { %v4116_v5 = vpop.f32.mrf.mxu1 }
 0x78c   : > { %v1969_v25 = vadd.f32 %v1961_v20, %v1953_v47  ;;  %v1951_v2 = vadd.f32 %v1943_v42, %v1935_v59  ;;  %v1946_v37 = vmul.f32 -0.36019573, %v4116_v5 }
 0x78d   : > { %v1907_v1 = vpop.f32.mrf.mxu1 }
 0x78e   : > { %v5986_v28 = vadd.f32 %v5977_v35, %v1969_v25  ;;  %v1967_v10 = vadd.f32 %v1959_v3, %v1951_v2  ;;  %v1954_v43 = vadd.f32 %v1946_v37, %v1938_v60  ;;  %v1944_v6 = vmul.f32 -0.36019573, %v1907_v1 }
 0x78f   : > { %v4119_v36 = vpop.f32.mrf.mxu1 }
 0x790   : > { %v1998_v48 = vmul.f32 %v5994_v22, %v5986_v28  ;;  %v5999_v29 = vadd.f32 %v5977_v35, %v1967_v10  ;;  %v1970_v18 = vadd.f32 %v1962_v49, %v1954_v43  ;;  %v1952_v24 = vadd.f32 %v1944_v6, %v1936_v33 }
 0x791   : > { %v1949_v21 = vmul.f32 -0.36019573, %v4119_v36  ;;  %v1920_v57 = vpop.f32.mrf.mxu1  ;;  %vm1990_vm9 = vcmp.gt.f32.partialorder %v5986_v28, 0.0 }
 0x792   : > { %v6004_v13 = vadd.f32 %v5977_v35, %v1970_v18  ;;  %v1968_v55 = vadd.f32 %v1960_v45, %v1952_v24  ;;  %v1947_v62 = vmul.f32 -0.36019573, %v1920_v57  ;;  %vm1988_vm10 = vcmp.gt.f32.partialorder %v5999_v29, 0.0 }
 0x793   : > { %v1957_v12 = vadd.f32 %v1949_v21, %v1941_v17  ;;  %v4120_v20 = vpop.f32.mrf.mxu1  ;;  %v1996_v16 = vmul.f32 %v5994_v22, %v5999_v29  ;;  %v2006_v54 = vadd.f32 %v6013_v14, %v1998_v48 }
 0x794   : > { %v1999_v3 = vmul.f32 %v5994_v22, %v6004_v13  ;;  %v6019_v47 = vadd.f32 %v5977_v35, %v1968_v55  ;;  %v1955_v59 = vadd.f32 %v1947_v62, %v1939_v46  ;;  %v1950_v42 = vmul.f32 -0.36019573, %v4120_v20 }
 0x795   : > { %v1973_v49 = vadd.f32 %v1965_v8, %v1957_v12  ;;  %v1923_v5 = vpop.f32.mrf.mxu1  ;;  %v2004_v45 = vadd.f32 %v6013_v14, %v1996_v16  ;;  %vm1991_vm11 = vcmp.gt.f32.partialorder %v6004_v13, 0.0  ;;  %v2014_v25 = vsel %vm1990_vm9, %v2006_v54, 0.0 }
 0x796   : > { %v1971_v2 = vadd.f32 %v1963_v4, %v1955_v59  ;;  %v1958_v60 = vadd.f32 %v1950_v42, %v1942_v15  ;;  %v1948_v37 = vmul.f32 -0.36019573, %v1923_v5  ;;  %vm1989_vm12 = vcmp.gt.f32.partialorder %v6019_v47, 0.0  ;;  %vm6030_vm13 = vmpackc.low %vm1991_vm11, %vm1990_vm9 }
 0x797   : > { %v6035_v8 = vadd.f32 %v5977_v35, %v1973_v49  ;;  %v1997_v33 = vmul.f32 %v5994_v22, %v6019_v47  ;;  %v2012_v4 = vsel %vm1988_vm10, %v2004_v45, 0.0  ;;  %vm6045_vm14 = vmpackc.low %vm1989_vm12, %vm1988_vm10  ;;  %v2007_v43 = vadd.f32 %v6013_v14, %v1999_v3 }
 0x798   : > { %v6051_v6 = vadd.f32 %v5977_v35, %v1971_v2  ;;  %v1974_v36 = vadd.f32 %v1966_v61, %v1958_v60  ;;  %v1956_v17 = vadd.f32 %v1948_v37, %v1940_v31  ;;  %v2020_v46 = vmul.f32 -0.9042515, %v2012_v4 }
 0x799   : > { %v2005_v48 = vadd.f32 %v6013_v14, %v1997_v33  ;;  %v2015_v18 = vsel %vm1991_vm11, %v2007_v43, 0.0  ;;  %v2022_v24 = vmul.f32 -0.9042515, %v2014_v25  ;;  %v3609_v21 = vpack.c.bf16 %v2007_v43, %v2006_v54 }
 0x79a   : > { %v6057_v57 = vadd.f32 %v5977_v35, %v1974_v36  ;;  %v1972_v15 = vadd.f32 %v1964_v53, %v1956_v17  ;;  %v6060_v55 = vadd.f32 %v2020_v46, %v5847_v41  ;;  %v2023_v62 = vmul.f32 -0.9042515, %v2015_v18 }
 0x79b   : > { %v2013_v61 = vsel %vm1989_vm12, %v2005_v48, 0.0  ;;  %v3606_v31 = vpack.c.bf16 %v2005_v48, %v2004_v45  ;;  %v6065_v12 = vadd.f32 %v2022_v24, %v5852_v19  ;;  %vm1992_vm15 = vcmp.gt.f32.partialorder %v6051_v6, 0.0 }
 0x79c   : > { %v6069_v20 = vadd.f32 %v5977_v35, %v1972_v15  ;;  %v2021_v16 = vmul.f32 -0.9042515, %v2013_v61  ;;  %v6072_v54 = vadd.f32 %v2023_v62, %v5859_v58  ;;  %v2000_v41 = vmul.f32 %v5994_v22, %v6051_v6 }
 0x79d   : > { %4137 = vmatprep.mubr.msk.bf16.mxu0 %vm6045_vm14, %v3606_v31  ;;  %vm1994_vm0 = vcmp.gt.f32.partialorder %v6035_v8, 0.0  ;;  %vm1995_vm1 = vcmp.gt.f32.partialorder %v6057_v57, 0.0  ;;  %v2002_v19 = vmul.f32 %v5994_v22, %v6035_v8  ;;  %v2003_v35 = vmul.f32 %v5994_v22, %v6057_v57 }
 0x79e   : > { %v6085_v53 = vadd.f32 %v2021_v16, %v5872_v26  ;;  %4138 = vmatmul.mubr.msk.bf16.vlgmr.msra.gmra.mxu0 %vm6030_vm13, %v3609_v21  ;;  %vm1993_vm3 = vcmp.gt.f32.partialorder %v6069_v20, 0.0  ;;  %v2001_v58 = vmul.f32 %v5994_v22, %v6069_v20  ;;  %v2008_v3 = vadd.f32 %v6013_v14, %v2000_v41  ;;  %vm6097_vm4 = vmpackc.low %vm1995_vm1, %vm1994_vm0  ;;  %v6166_v41 = vld [vmem:[%s7293_s6 + $0xb] ss:$0 sm:$0xff] }
 0x79f   : > { %vm6103_vm5 = vmpackc.low %vm1993_vm3, %vm1992_vm15  ;;  %v2010_v42 = vadd.f32 %v6013_v14, %v2002_v19  ;;  %v2011_v49 = vadd.f32 %v6013_v14, %v2003_v35  ;;  %4170 = vmatpush3.bf16.msra.mxu0 %v5901_v0  ;;  %v2131_v24 = vmul.f32 -0.31405908, %v4552_v27  ;;  %v2129_v15 = vmul.f32 -0.31405908, %v4557_v30 }
 0x7a0   : > { %v2009_v5 = vadd.f32 %v6013_v14, %v2001_v58  ;;  %v2016_v45 = vsel %vm1992_vm15, %v2008_v3, 0.0  ;;  %4171 = vmatprep.subr.bf16.mxu0 %v5910_v32  ;;  %v2105_v61 = vmul.f32 1.314059, %v5999_v29  ;;  %v2132_v16 = vmul.f32 -0.31405908, %v4565_v34 }
 0x7a1   : > { %v2024_v25 = vmul.f32 -0.9042515, %v2016_v45  ;;  %v2018_v2 = vsel %vm1994_vm0, %v2010_v42, 0.0  ;;  %v2019_v60 = vsel %vm1995_vm1, %v2011_v49, 0.0  ;;  %v3615_v37 = vpack.c.bf16 %v2011_v49, %v2010_v42 }
 0x7a2   : > { %v2017_v1 = vsel %vm1993_vm3, %v2009_v5, 0.0  ;;  %v3612_v33 = vpack.c.bf16 %v2009_v5, %v2008_v3  ;;  %v2026_v4 = vmul.f32 -0.9042515, %v2018_v2  ;;  %v2027_v10 = vmul.f32 -0.9042515, %v2019_v60 }
 0x7a3   : > { %v2025_v43 = vmul.f32 -0.9042515, %v2017_v1  ;;  %v6119_v36 = vadd.f32 %v2024_v25, %v5920_v40  ;;  %4172 = vmatpush3.bf16.msra.mxu0 %v5910_v32  ;;  %v6146_v40 = vld [vmem:[%s7291_s4 + $0x8] sm:$0xff]   ;;  %v2135_v35 = vmul.f32 -0.31405908, %v4582_v44 }
 0x7a4   : > { %4141 = vmatprep.mubr.msk.bf16.mxu0 %vm6103_vm5, %v3612_v33  ;;  %v6125_v17 = vadd.f32 %v2026_v4, %v5926_v52  ;;  %v6128_v46 = vadd.f32 %v2027_v10, %v5929_v11  ;;  %4173 = vmatprep.subr.bf16.mxu0 %v5934_v7  ;;  %v6153_v52 = vld [vmem:[%s7291_s4] sm:$0xff]   ;;  %v2108_v59 = vmul.f32 1.314059, %v6004_v13  ;;  %v2106_v29 = vmul.f32 1.314059, %v6019_v47 }
 0x7a5   : > { %v6132_v48 = vadd.f32 %v2025_v43, %v5938_v9  ;;  %v2107_v9 = vmul.f32 1.314059, %v5986_v28  ;;  %v2130_v28 = vmul.f32 -0.31405908, %v4575_v39  ;;  %v2133_v49 = vmul.f32 -0.31405908, %v4591_v50 }
 0x7a6   : > { %4142 = vmatmul.mubr.msk.bf16.gmra.mxu0 %vm6097_vm4, %v3615_v37  ;;  %v2136_v5 = vmul.f32 -0.31405908, %v4602_v56  ;;  %v2111_v1 = vmul.f32 1.314059, %v6035_v8  ;;  %v2109_v33 = vmul.f32 1.314059, %v6051_v6 }
 0x7a7   : > { %4174 = vmatpush3.bf16.msra.mxu0 %v5934_v7  ;;  %v2134_v13 = vmul.f32 -0.31405908, %v4613_v63 }
 0x7a8   : > { %4175 = vmatprep.subr.bf16.mxu0 %v5946_v51 }
 0x7ab   : > { %4176 = vmatpush3.bf16.msra.mxu0 %v5946_v51 }
 0x7ac   : > { %4177 = vmatprep.subr.bf16.mxu0 %v5953_v23 }
 0x7af   : > { %4178 = vmatpush3.bf16.msra.mxu0 %v5953_v23 }
 0x7b0   : > { %4179 = vmatprep.subr.bf16.mxu0 %v5960_v38 }
 0x7b3   : > { %4180 = vmatpush3.bf16.msra.mxu0 %v5960_v38 }
 0x7b4   : > { %4181 = vmatprep.subr.bf16.mxu0 %v6146_v40 }
 0x7b7   : > { %4182 = vmatpush3.bf16.msra.mxu0 %v6146_v40 }
 0x7b8   : > { %4183 = vmatprep.subr.bf16.mxu0 %v6153_v52 }
 0x7bb   : > { %4184 = vmatpush3.bf16.msra.mxu0 %v6153_v52 }
 0x7bc   : > { %4217 = vmatprep.subr.bf16.mxu0 %v5901_v0 }
 0x85e   : > { %v4139_v11 = vpop.f32.mrf.mxu0 }
 0x85f   : > { %v2115_v18 = vmul.f32 -0.3271923, %v4139_v11 }
 0x860   : > { %v2074_v21 = vpop.f32.mrf.mxu0 }
 0x861   : > { %v2123_v62 = vadd.f32 %v2115_v18, %v2107_v9  ;;  %v2113_v31 = vmul.f32 -0.3271923, %v2074_v21  ;;  %v2112_v18 = vmul.f32 1.314059, %v6057_v57 }
 0x862   : > { %v4140_v19 = vpop.f32.mrf.mxu0 }
 0x863   : > { %v2139_v58 = vadd.f32 %v2131_v24, %v2123_v62  ;;  %v2121_v3 = vadd.f32 %v2113_v31, %v2105_v61  ;;  %v2116_v26 = vmul.f32 -0.3271923, %v4140_v19  ;;  %v2110_v24 = vmul.f32 1.314059, %v6069_v20 }
 0x864   : > { %v2077_v42 = vpop.f32.mrf.mxu0 }
 0x865   : > { %v6175_v45 = vadd.f32 %v6166_v41, %v2139_v58  ;;  %v2137_v25 = vadd.f32 %v2129_v15, %v2121_v3  ;;  %v2124_v2 = vadd.f32 %v2116_v26, %v2108_v59  ;;  %v2114_v60 = vmul.f32 -0.3271923, %v2077_v42 }
 0x866   : > { %v4143_v37 = vpop.f32.mrf.mxu0 }
 0x867   : > { %v2168_v47 = vmul.f32 %v5994_v22, %v6175_v45  ;;  %v6183_v4 = vadd.f32 %v6166_v41, %v2137_v25  ;;  %v2140_v10 = vadd.f32 %v2132_v16, %v2124_v2  ;;  %v2122_v43 = vadd.f32 %v2114_v60, %v2106_v29 }
 0x868   : > { %v2119_v11 = vmul.f32 -0.3271923, %v4143_v37  ;;  %v2090_v9 = vpop.f32.mrf.mxu0  ;;  %vm2160_vm6 = vcmp.gt.f32.partialorder %v6175_v45, 0.0 }
 0x869   : > { %v6188_v8 = vadd.f32 %v6166_v41, %v2140_v10  ;;  %v2138_v6 = vadd.f32 %v2130_v28, %v2122_v43  ;;  %v2117_v21 = vmul.f32 -0.3271923, %v2090_v9  ;;  %vm2158_vm7 = vcmp.gt.f32.partialorder %v6183_v4, 0.0 }
 0x86a   : > { %v2127_v15 = vadd.f32 %v2119_v11, %v2111_v1  ;;  %v4144_v62 = vpop.f32.mrf.mxu0  ;;  %v2166_v61 = vmul.f32 %v5994_v22, %v6183_v4  ;;  %v2176_v31 = vadd.f32 %v6013_v14, %v2168_v47 }
 0x86b   : > { %v2169_v57 = vmul.f32 %v5994_v22, %v6188_v8  ;;  %v6198_v20 = vadd.f32 %v6166_v41, %v2138_v6  ;;  %v2125_v16 = vadd.f32 %v2117_v21, %v2109_v33  ;;  %v2120_v19 = vmul.f32 -0.3271923, %v4144_v62 }
 0x86c   : > { %v2143_v28 = vadd.f32 %v2135_v35, %v2127_v15  ;;  %v2093_v58 = vpop.f32.mrf.mxu0  ;;  %v2174_v3 = vadd.f32 %v6013_v14, %v2166_v61  ;;  %vm2161_vm8 = vcmp.gt.f32.partialorder %v6188_v8, 0.0  ;;  %v2184_v59 = vsel %vm2160_vm6, %v2176_v31, 0.0 }
 0x86d   : > { %v2141_v26 = vadd.f32 %v2133_v49, %v2125_v16  ;;  %v2128_v42 = vadd.f32 %v2120_v19, %v2112_v18  ;;  %v2118_v29 = vmul.f32 -0.3271923, %v2093_v58  ;;  %vm2159_vm9 = vcmp.gt.f32.partialorder %v6198_v20, 0.0  ;;  %vm6209_vm10 = vmpackc.low %vm2161_vm8, %vm2160_vm6 }
 0x86e   : > { %v6214_v35 = vadd.f32 %v6166_v41, %v2143_v28  ;;  %v2167_v2 = vmul.f32 %v5994_v22, %v6198_v20  ;;  %v2182_v49 = vsel %vm2158_vm7, %v2174_v3, 0.0  ;;  %vm6224_vm11 = vmpackc.low %vm2159_vm9, %vm2158_vm7  ;;  %v2177_v37 = vadd.f32 %v6013_v14, %v2169_v57 }
 0x86f   : > { %v6230_v1 = vadd.f32 %v6166_v41, %v2141_v26  ;;  %v2144_v33 = vadd.f32 %v2136_v5, %v2128_v42  ;;  %v2126_v47 = vadd.f32 %v2118_v29, %v2110_v24  ;;  %v2190_v10 = vmul.f32 -0.6439514, %v2182_v49 }
 0x870   : > { %v2175_v43 = vadd.f32 %v6013_v14, %v2167_v2  ;;  %v2185_v11 = vsel %vm2161_vm8, %v2177_v37, 0.0  ;;  %v2192_v9 = vmul.f32 -0.6439514, %v2184_v59  ;;  %v3622_v18 = vpack.c.bf16 %v2177_v37, %v2176_v31 }
 0x871   : > { %v6236_v6 = vadd.f32 %v6166_v41, %v2144_v33  ;;  %v2142_v21 = vadd.f32 %v2134_v13, %v2126_v47  ;;  %v6239_v15 = vadd.f32 %v2190_v10, %v6060_v55  ;;  %v2193_v62 = vmul.f32 -0.6439514, %v2185_v11 }
 0x872   : > { %v2183_v5 = vsel %vm2159_vm9, %v2175_v43, 0.0  ;;  %v3619_v24 = vpack.c.bf16 %v2175_v43, %v2174_v3  ;;  %v6244_v61 = vadd.f32 %v2192_v9, %v6065_v12  ;;  %vm2162_vm12 = vcmp.gt.f32.partialorder %v6230_v1, 0.0 }
 0x873   : > { %v6248_v57 = vadd.f32 %v6166_v41, %v2142_v21  ;;  %v2191_v31 = vmul.f32 -0.6439514, %v2183_v5  ;;  %v6251_v16 = vadd.f32 %v2193_v62, %v6072_v54  ;;  %v2170_v55 = vmul.f32 %v5994_v22, %v6230_v1 }
 0x874   : > { %4161 = vmatprep.mubr.msk.bf16.mxu1 %vm6224_vm11, %v3619_v24  ;;  %vm2164_vm13 = vcmp.gt.f32.partialorder %v6214_v35, 0.0  ;;  %vm2165_vm14 = vcmp.gt.f32.partialorder %v6236_v6, 0.0  ;;  %v2172_v12 = vmul.f32 %v5994_v22, %v6214_v35  ;;  %v2173_v41 = vmul.f32 %v5994_v22, %v6236_v6 }
 0x875   : > { %v6264_v13 = vadd.f32 %v2191_v31, %v6085_v53  ;;  %4162 = vmatmul.mubr.msk.bf16.vlgmr.msra.gmra.mxu1 %vm6209_vm10, %v3622_v18  ;;  %vm2163_vm15 = vcmp.gt.f32.partialorder %v6248_v57, 0.0  ;;  %v2171_v54 = vmul.f32 %v5994_v22, %v6248_v57  ;;  %v2178_v19 = vadd.f32 %v6013_v14, %v2170_v55  ;;  %vm6276_vm0 = vmpackc.low %vm2165_vm14, %vm2164_vm13  ;;  %v6335_v55 = vld [vmem:[%s7293_s6 + $0xc] ss:$0 sm:$0xff] }
 0x876   : > { %vm6282_vm1 = vmpackc.low %vm2163_vm15, %vm2162_vm12  ;;  %v2180_v58 = vadd.f32 %v6013_v14, %v2172_v12  ;;  %v2181_v3 = vadd.f32 %v6013_v14, %v2173_v41  ;;  %4194 = vmatpush3.bf16.msra.mxu1 %v5901_v0  ;;  %v2299_v21 = vmul.f32 -0.27526957, %v4557_v30  ;;  %v2275_v5 = vmul.f32 1.2752696, %v6183_v4 }
 0x877   : > { %v2179_v59 = vadd.f32 %v6013_v14, %v2171_v54  ;;  %v2186_v26 = vsel %vm2162_vm12, %v2178_v19, 0.0  ;;  %4195 = vmatprep.subr.bf16.mxu1 %v5910_v32  ;;  %v2302_v31 = vmul.f32 -0.27526957, %v4565_v34  ;;  %v2305_v41 = vmul.f32 -0.27526957, %v4582_v44 }
 0x878   : > { %v2194_v42 = vmul.f32 -0.6439514, %v2186_v26  ;;  %v2188_v29 = vsel %vm2164_vm13, %v2180_v58, 0.0  ;;  %v2189_v25 = vsel %vm2165_vm14, %v2181_v3, 0.0  ;;  %v3628_v2 = vpack.c.bf16 %v2181_v3, %v2180_v58 }
 0x879   : > { %v2187_v49 = vsel %vm2163_vm15, %v2179_v59, 0.0  ;;  %v3625_v60 = vpack.c.bf16 %v2179_v59, %v2178_v19  ;;  %v2196_v37 = vmul.f32 -0.6439514, %v2188_v29  ;;  %v2197_v33 = vmul.f32 -0.6439514, %v2189_v25 }
 0x87a   : > { %v2195_v47 = vmul.f32 -0.6439514, %v2187_v49  ;;  %v6298_v10 = vadd.f32 %v2194_v42, %v6119_v36  ;;  %4196 = vmatpush3.bf16.msra.mxu1 %v5910_v32  ;;  %v2278_v28 = vmul.f32 1.2752696, %v6188_v8  ;;  %v2276_v4 = vmul.f32 1.2752696, %v6198_v20 }
 0x87b   : > { %4165 = vmatprep.mubr.msk.bf16.mxu1 %vm6282_vm1, %v3625_v60  ;;  %v6304_v43 = vadd.f32 %v2196_v37, %v6125_v17  ;;  %v6307_v11 = vadd.f32 %v2197_v33, %v6128_v46  ;;  %4197 = vmatprep.subr.bf16.mxu1 %v5934_v7  ;;  %v2277_v17 = vmul.f32 1.2752696, %v6175_v45  ;;  %v2300_v45 = vmul.f32 -0.27526957, %v4575_v39 }
 0x87c   : > { %v6311_v9 = vadd.f32 %v2195_v47, %v6132_v48  ;;  %v2301_v48 = vmul.f32 -0.27526957, %v4552_v27  ;;  %v2303_v3 = vmul.f32 -0.27526957, %v4591_v50  ;;  %v2306_v59 = vmul.f32 -0.27526957, %v4602_v56 }
 0x87d   : > { %4166 = vmatmul.mubr.msk.bf16.gmra.mxu1 %vm6276_vm0, %v3628_v2  ;;  %v2281_v49 = vmul.f32 1.2752696, %v6214_v35  ;;  %v2279_v60 = vmul.f32 1.2752696, %v6230_v1  ;;  %v2304_v8 = vmul.f32 -0.27526957, %v4613_v63 }
 0x87e   : > { %4198 = vmatpush3.bf16.msra.mxu1 %v5934_v7 }
 0x87f   : > { %4199 = vmatprep.subr.bf16.mxu1 %v5946_v51 }
 0x882   : > { %4200 = vmatpush3.bf16.msra.mxu1 %v5946_v51 }
 0x883   : > { %4201 = vmatprep.subr.bf16.mxu1 %v5953_v23 }
 0x886   : > { %4202 = vmatpush3.bf16.msra.mxu1 %v5953_v23 }
 0x887   : > { %4203 = vmatprep.subr.bf16.mxu1 %v5960_v38 }
 0x88a   : > { %4204 = vmatpush3.bf16.msra.mxu1 %v5960_v38 }
 0x88b   : > { %4205 = vmatprep.subr.bf16.mxu1 %v6146_v40 }
 0x88e   : > { %4206 = vmatpush3.bf16.msra.mxu1 %v6146_v40 }
 0x88f   : > { %4207 = vmatprep.subr.bf16.mxu1 %v6153_v52 }
 0x892   : > { %4208 = vmatpush3.bf16.msra.mxu1 %v6153_v52 }
 0x893   : > { %4241 = vmatprep.subr.bf16.mxu1 %v5901_v0 }
 0x935   : > { %v4163_v36 = vpop.f32.mrf.mxu1 }
 0x936   : > { %v2285_v46 = vmul.f32 -0.29714534, %v4163_v36 }
 0x937   : > { %v2244_v18 = vpop.f32.mrf.mxu1 }
 0x938   : > { %v2293_v62 = vadd.f32 %v2285_v46, %v2277_v17  ;;  %v2283_v24 = vmul.f32 -0.29714534, %v2244_v18  ;;  %v2282_v46 = vmul.f32 1.2752696, %v6236_v6 }
 0x939   : > { %v4164_v12 = vpop.f32.mrf.mxu1 }
 0x93a   : > { %v2309_v54 = vadd.f32 %v2301_v48, %v2293_v62  ;;  %v2291_v19 = vadd.f32 %v2283_v24, %v2275_v5  ;;  %v2286_v53 = vmul.f32 -0.29714534, %v4164_v12  ;;  %v2280_v48 = vmul.f32 1.2752696, %v6248_v57 }
 0x93b   : > { %v2247_v58 = vpop.f32.mrf.mxu1 }
 0x93c   : > { %v6344_v26 = vadd.f32 %v6335_v55, %v2309_v54  ;;  %v2307_v42 = vadd.f32 %v2299_v21, %v2291_v19  ;;  %v2294_v29 = vadd.f32 %v2286_v53, %v2278_v28  ;;  %v2284_v25 = vmul.f32 -0.29714534, %v2247_v58 }
 0x93d   : > { %v4167_v2 = vpop.f32.mrf.mxu1 }
 0x93e   : > { %v2338_v20 = vmul.f32 %v5994_v22, %v6344_v26  ;;  %v6352_v37 = vadd.f32 %v6335_v55, %v2307_v42  ;;  %v2310_v33 = vadd.f32 %v2302_v31, %v2294_v29  ;;  %v2292_v47 = vadd.f32 %v2284_v25, %v2276_v4 }
 0x93f   : > { %v2289_v36 = vmul.f32 -0.29714534, %v4167_v2  ;;  %v2260_v17 = vpop.f32.mrf.mxu1  ;;  %vm2330_vm3 = vcmp.gt.f32.partialorder %v6344_v26, 0.0 }
 0x940   : > { %v6357_v35 = vadd.f32 %v6335_v55, %v2310_v33  ;;  %v2308_v1 = vadd.f32 %v2300_v45, %v2292_v47  ;;  %v2287_v18 = vmul.f32 -0.29714534, %v2260_v17  ;;  %vm2328_vm4 = vcmp.gt.f32.partialorder %v6352_v37, 0.0 }
 0x941   : > { %v2297_v21 = vadd.f32 %v2289_v36, %v2281_v49  ;;  %v4168_v62 = vpop.f32.mrf.mxu1  ;;  %v2336_v5 = vmul.f32 %v5994_v22, %v6352_v37  ;;  %v2346_v24 = vadd.f32 %v6013_v14, %v2338_v20 }
 0x942   : > { %v2339_v6 = vmul.f32 %v5994_v22, %v6357_v35  ;;  %v6367_v57 = vadd.f32 %v6335_v55, %v2308_v1  ;;  %v2295_v31 = vadd.f32 %v2287_v18, %v2279_v60  ;;  %v2290_v12 = vmul.f32 -0.29714534, %v4168_v62 }
 0x943   : > { %v2313_v45 = vadd.f32 %v2305_v41, %v2297_v21  ;;  %v2263_v54 = vpop.f32.mrf.mxu1  ;;  %v2344_v19 = vadd.f32 %v6013_v14, %v2336_v5  ;;  %vm2331_vm5 = vcmp.gt.f32.partialorder %v6357_v35, 0.0  ;;  %v2354_v28 = vsel %vm2330_vm3, %v2346_v24, 0.0 }
 0x944   : > { %v2311_v53 = vadd.f32 %v2303_v3, %v2295_v31  ;;  %v2298_v58 = vadd.f32 %v2290_v12, %v2282_v46  ;;  %v2288_v4 = vmul.f32 -0.29714534, %v2263_v54  ;;  %vm2329_vm6 = vcmp.gt.f32.partialorder %v6367_v57, 0.0  ;;  %vm6378_vm7 = vmpackc.low %vm2331_vm5, %vm2330_vm3 }
 0x945   : > { %v6383_v41 = vadd.f32 %v6335_v55, %v2313_v45  ;;  %v2337_v29 = vmul.f32 %v5994_v22, %v6367_v57  ;;  %v2352_v3 = vsel %vm2328_vm4, %v2344_v19, 0.0  ;;  %vm6393_vm8 = vmpackc.low %vm2329_vm6, %vm2328_vm4  ;;  %v2347_v2 = vadd.f32 %v6013_v14, %v2339_v6 }
 0x946   : > { %v6399_v49 = vadd.f32 %v6335_v55, %v2311_v53  ;;  %v2314_v60 = vadd.f32 %v2306_v59, %v2298_v58  ;;  %v2296_v20 = vadd.f32 %v2288_v4, %v2280_v48  ;;  %v2360_v33 = vmul.f32 -0.4743634, %v2352_v3 }
 0x947   : > { %v2345_v47 = vadd.f32 %v6013_v14, %v2337_v29  ;;  %v2355_v36 = vsel %vm2331_vm5, %v2347_v2, 0.0  ;;  %v2362_v17 = vmul.f32 -0.4743634, %v2354_v28  ;;  %v3635_v46 = vpack.c.bf16 %v2347_v2, %v2346_v24 }
 0x948   : > { %v6405_v1 = vadd.f32 %v6335_v55, %v2314_v60  ;;  %v2312_v18 = vadd.f32 %v2304_v8, %v2296_v20  ;;  %v6408_v21 = vadd.f32 %v2360_v33, %v6239_v15  ;;  %v2363_v62 = vmul.f32 -0.4743634, %v2355_v36 }
 0x949   : > { %v2353_v59 = vsel %vm2329_vm6, %v2345_v47, 0.0  ;;  %v3632_v48 = vpack.c.bf16 %v2345_v47, %v2344_v19  ;;  %v6413_v5 = vadd.f32 %v2362_v17, %v6244_v61  ;;  %vm2332_vm9 = vcmp.gt.f32.partialorder %v6399_v49, 0.0 }
 0x94a   : > { %v6417_v6 = vadd.f32 %v6335_v55, %v2312_v18  ;;  %v2361_v24 = vmul.f32 -0.4743634, %v2353_v59  ;;  %v6420_v31 = vadd.f32 %v2363_v62, %v6251_v16  ;;  %v2340_v15 = vmul.f32 %v5994_v22, %v6399_v49  ;;  %v6504_v18 = vld [vmem:[%s7293_s6 + $0xd] ss:$0 sm:$0xff] }
 0x94b   : > { %4185 = vmatprep.mubr.msk.bf16.mxu0 %vm6393_vm8, %v3632_v48  ;;  %vm2334_vm10 = vcmp.gt.f32.partialorder %v6383_v41, 0.0  ;;  %vm2335_vm11 = vcmp.gt.f32.partialorder %v6405_v1, 0.0  ;;  %v2342_v61 = vmul.f32 %v5994_v22, %v6383_v41  ;;  %v2343_v55 = vmul.f32 %v5994_v22, %v6405_v1 }
 0x94c   : > { %v6433_v8 = vadd.f32 %v2361_v24, %v6264_v13  ;;  %4186 = vmatmul.mubr.msk.bf16.vlgmr.msra.gmra.mxu0 %vm6378_vm7, %v3635_v46  ;;  %vm2333_vm12 = vcmp.gt.f32.partialorder %v6417_v6, 0.0  ;;  %v2341_v16 = vmul.f32 %v5994_v22, %v6417_v6  ;;  %v2348_v12 = vadd.f32 %v6013_v14, %v2340_v15  ;;  %vm6445_vm13 = vmpackc.low %vm2335_vm11, %vm2334_vm10 }
 0x94d   : > { %vm6451_vm14 = vmpackc.low %vm2333_vm12, %vm2332_vm9  ;;  %v2350_v54 = vadd.f32 %v6013_v14, %v2342_v61  ;;  %v2351_v19 = vadd.f32 %v6013_v14, %v2343_v55  ;;  %4218 = vmatpush3.bf16.msra.mxu0 %v5901_v0  ;;  %v2472_v46 = vmul.f32 -0.23648009, %v4565_v34  ;;  %v2475_v62 = vmul.f32 -0.23648009, %v4582_v44 }
 0x94e   : > { %v2349_v28 = vadd.f32 %v6013_v14, %v2341_v16  ;;  %v2356_v53 = vsel %vm2332_vm9, %v2348_v12, 0.0  ;;  %4219 = vmatprep.subr.bf16.mxu0 %v5910_v32  ;;  %v2448_v24 = vmul.f32 1.2364801, %v6357_v35  ;;  %v2473_v55 = vmul.f32 -0.23648009, %v4591_v50 }
 0x94f   : > { %v2364_v58 = vmul.f32 -0.4743634, %v2356_v53  ;;  %v2358_v4 = vsel %vm2334_vm10, %v2350_v54, 0.0  ;;  %v2359_v42 = vsel %vm2335_vm11, %v2351_v19, 0.0  ;;  %v3641_v29 = vpack.c.bf16 %v2351_v19, %v2350_v54 }
 0x950   : > { %v2357_v3 = vsel %vm2333_vm12, %v2349_v28, 0.0  ;;  %v3638_v25 = vpack.c.bf16 %v2349_v28, %v2348_v12  ;;  %v2366_v2 = vmul.f32 -0.4743634, %v2358_v4  ;;  %v2367_v60 = vmul.f32 -0.4743634, %v2359_v42 }
 0x951   : > { %v2365_v20 = vmul.f32 -0.4743634, %v2357_v3  ;;  %v6467_v33 = vadd.f32 %v2364_v58, %v6298_v10  ;;  %4220 = vmatpush3.bf16.msra.mxu0 %v5910_v32  ;;  %v2476_v16 = vmul.f32 -0.23648009, %v4602_v56  ;;  %v2451_v28 = vmul.f32 1.2364801, %v6383_v41 }
 0x952   : > { %4189 = vmatprep.mubr.msk.bf16.mxu0 %vm6451_vm14, %v3638_v25  ;;  %v6473_v47 = vadd.f32 %v2366_v2, %v6304_v43  ;;  %v6476_v36 = vadd.f32 %v2367_v60, %v6307_v11  ;;  %4221 = vmatprep.subr.bf16.mxu0 %v5934_v7  ;;  %v2469_v43 = vmul.f32 -0.23648009, %v4557_v30  ;;  %v2445_v11 = vmul.f32 1.2364801, %v6352_v37 }
 0x953   : > { %v6480_v17 = vadd.f32 %v2365_v20, %v6311_v9  ;;  %v2446_v37 = vmul.f32 1.2364801, %v6367_v57  ;;  %v2449_v53 = vmul.f32 1.2364801, %v6399_v49  ;;  %v2474_v35 = vmul.f32 -0.23648009, %v4613_v63 }
 0x954   : > { %4190 = vmatmul.mubr.msk.bf16.gmra.mxu0 %vm6445_vm13, %v3641_v29  ;;  %v2452_v25 = vmul.f32 1.2364801, %v6405_v1  ;;  %v2450_v2 = vmul.f32 1.2364801, %v6417_v6 }
 0x955   : > { %4222 = vmatpush3.bf16.msra.mxu0 %v5934_v7  ;;  %v2447_v7 = vmul.f32 1.2364801, %v6344_v26  ;;  %v2470_v26 = vmul.f32 -0.23648009, %v4575_v39 }
 0x956   : > { %4223 = vmatprep.subr.bf16.mxu0 %v5946_v51 }
 0x959   : > { %4224 = vmatpush3.bf16.msra.mxu0 %v5946_v51 }
 0x95a   : > { %4225 = vmatprep.subr.bf16.mxu0 %v5953_v23 }
 0x95d   : > { %4226 = vmatpush3.bf16.msra.mxu0 %v5953_v23  ;;  %v2471_v23 = vmul.f32 -0.23648009, %v4552_v27 }
 0x95e   : > { %4227 = vmatprep.subr.bf16.mxu0 %v5960_v38 }
 0x961   : > { %4228 = vmatpush3.bf16.msra.mxu0 %v5960_v38 }
 0x962   : > { %4229 = vmatprep.subr.bf16.mxu0 %v6146_v40 }
 0x965   : > { %4230 = vmatpush3.bf16.msra.mxu0 %v6146_v40 }
 0x966   : > { %4231 = vmatprep.subr.bf16.mxu0 %v6153_v52 }
 0x969   : > { %4232 = vmatpush3.bf16.msra.mxu0 %v6153_v52 }
 0x96a   : > { %4265 = vmatprep.subr.bf16.mxu0 %v5901_v0 }
 0xa0c   : > { %v4187_v32 = vpop.f32.mrf.mxu0 }
 0xa0d   : > { %v2455_v51 = vmul.f32 -0.27065378, %v4187_v32 }
 0xa0e   : > { %v2414_v10 = vpop.f32.mrf.mxu0 }
 0xa0f   : > { %v2463_v38 = vadd.f32 %v2455_v51, %v2447_v7  ;;  %v2453_v9 = vmul.f32 -0.27065378, %v2414_v10 }
 0xa10   : > { %v4188_v0 = vpop.f32.mrf.mxu0 }
 0xa11   : > { %v2479_v59 = vadd.f32 %v2471_v23, %v2463_v38  ;;  %v2461_v48 = vadd.f32 %v2453_v9, %v2445_v11  ;;  %v2456_v15 = vmul.f32 -0.27065378, %v4188_v0 }
 0xa12   : > { %v2417_v61 = vpop.f32.mrf.mxu0 }
 0xa13   : > { %v6513_v12 = vadd.f32 %v6504_v18, %v2479_v59  ;;  %v2477_v45 = vadd.f32 %v2469_v43, %v2461_v48  ;;  %v2464_v13 = vadd.f32 %v2456_v15, %v2448_v24  ;;  %v2454_v54 = vmul.f32 -0.27065378, %v2417_v61 }
 0xa14   : > { %v4191_v19 = vpop.f32.mrf.mxu0 }
 0xa15   : > { %v2508_v57 = vmul.f32 %v5994_v22, %v6513_v12  ;;  %v6521_v58 = vadd.f32 %v6504_v18, %v2477_v45  ;;  %v2480_v4 = vadd.f32 %v2472_v46, %v2464_v13  ;;  %v2462_v42 = vadd.f32 %v2454_v54, %v2446_v37 }
 0xa16   : > { %v2459_v29 = vmul.f32 -0.27065378, %v4191_v19  ;;  %v2430_v3 = vpop.f32.mrf.mxu0  ;;  %vm2500_vm15 = vcmp.gt.f32.partialorder %v6513_v12, 0.0 }
 0xa17   : > { %v6526_v41 = vadd.f32 %v6504_v18, %v2480_v4  ;;  %v2478_v49 = vadd.f32 %v2470_v26, %v2462_v42  ;;  %v2457_v60 = vmul.f32 -0.27065378, %v2430_v3  ;;  %vm2498_vm0 = vcmp.gt.f32.partialorder %v6521_v58, 0.0 }
 0xa18   : > { %v2467_v20 = vadd.f32 %v2459_v29, %v2451_v28  ;;  %v4192_v32 = vpop.f32.mrf.mxu0  ;;  %v2506_v7 = vmul.f32 %v5994_v22, %v6521_v58  ;;  %v2516_v51 = vadd.f32 %v6013_v14, %v2508_v57 }
 0xa19   : > { %v2509_v1 = vmul.f32 %v5994_v22, %v6526_v41  ;;  %v6536_v6 = vadd.f32 %v6504_v18, %v2478_v49  ;;  %v2465_v23 = vadd.f32 %v2457_v60, %v2449_v53  ;;  %v2460_v10 = vmul.f32 -0.27065378, %v4192_v32 }
 0xa1a   : > { %v2483_v43 = vadd.f32 %v2475_v62, %v2467_v20  ;;  %v2433_v38 = vpop.f32.mrf.mxu0  ;;  %v2514_v11 = vadd.f32 %v6013_v14, %v2506_v7  ;;  %vm2501_vm1 = vcmp.gt.f32.partialorder %v6526_v41, 0.0  ;;  %v2524_v9 = vsel %vm2500_vm15, %v2516_v51, 0.0 }
 0xa1b   : > { %v2481_v46 = vadd.f32 %v2473_v55, %v2465_v23  ;;  %v2468_v0 = vadd.f32 %v2460_v10, %v2452_v25  ;;  %v2458_v26 = vmul.f32 -0.27065378, %v2433_v38  ;;  %vm2499_vm3 = vcmp.gt.f32.partialorder %v6536_v6, 0.0  ;;  %vm6547_vm4 = vmpackc.low %vm2501_vm1, %vm2500_vm15  ;;  %v6640_v10 = vld [vmem:[%s7291_s4 + $0x30] sm:$0xff]  }
 0xa1c   : > { %v6552_v62 = vadd.f32 %v6504_v18, %v2483_v43  ;;  %v2507_v48 = vmul.f32 %v5994_v22, %v6536_v6  ;;  %v2522_v24 = vsel %vm2498_vm0, %v2514_v11, 0.0  ;;  %vm6562_vm5 = vmpackc.low %vm2499_vm3, %vm2498_vm0  ;;  %v2517_v61 = vadd.f32 %v6013_v14, %v2509_v1 }
 0xa1d   : > { %v6568_v37 = vadd.f32 %v6504_v18, %v2481_v46  ;;  %v2484_v55 = vadd.f32 %v2476_v16, %v2468_v0  ;;  %v2466_v45 = vadd.f32 %v2458_v26, %v2450_v2  ;;  %v2530_v13 = vmul.f32 -0.36309803, %v2522_v24 }
 0xa1e   : > { %v2515_v54 = vadd.f32 %v6013_v14, %v2507_v48  ;;  %v2525_v19 = vsel %vm2501_vm1, %v2517_v61, 0.0  ;;  %v2532_v28 = vmul.f32 -0.36309803, %v2524_v9  ;;  %v3648_v53 = vpack.c.bf16 %v2517_v61, %v2516_v51  ;;  %v6631_v51 = vld [vmem:[%s7291_s4 + $0x38] sm:$0xff]   ;;  %v6664_v61 = vld [vmem:[%s7291_s4 + $0x28] sm:$0xff]  }
 0xa1f   : > { %v6574_v57 = vadd.f32 %v6504_v18, %v2484_v55  ;;  %v2482_v4 = vadd.f32 %v2474_v35, %v2466_v45  ;;  %v6577_v42 = vadd.f32 %v2530_v13, %v6408_v21  ;;  %v2533_v29 = vmul.f32 -0.36309803, %v2525_v19 }
 0xa20   : > { %v2523_v16 = vsel %vm2499_vm3, %v2515_v54, 0.0  ;;  %v3645_v3 = vpack.c.bf16 %v2515_v54, %v2514_v11  ;;  %v6582_v25 = vadd.f32 %v2532_v28, %v6413_v5  ;;  %vm2502_vm6 = vcmp.gt.f32.partialorder %v6568_v37, 0.0 }
 0xa21   : > { %v6586_v2 = vadd.f32 %v6504_v18, %v2482_v4  ;;  %v2531_v49 = vmul.f32 -0.36309803, %v2523_v16  ;;  %v6589_v60 = vadd.f32 %v2533_v29, %v6420_v31  ;;  %v2510_v21 = vmul.f32 %v5994_v22, %v6568_v37 }
 0xa22   : > { %4209 = vmatprep.mubr.msk.bf16.mxu1 %vm6562_vm5, %v3645_v3  ;;  %vm2504_vm7 = vcmp.gt.f32.partialorder %v6552_v62, 0.0  ;;  %vm2505_vm8 = vcmp.gt.f32.partialorder %v6574_v57, 0.0  ;;  %v2512_v5 = vmul.f32 %v5994_v22, %v6552_v62  ;;  %v2513_v18 = vmul.f32 %v5994_v22, %v6574_v57 }
 0xa23   : > { %v6602_v35 = vadd.f32 %v2531_v49, %v6433_v8  ;;  %4210 = vmatmul.mubr.msk.bf16.vlgmr.msra.gmra.mxu1 %vm6547_vm4, %v3648_v53  ;;  %vm2503_vm9 = vcmp.gt.f32.partialorder %v6586_v2, 0.0  ;;  %v2511_v31 = vmul.f32 %v5994_v22, %v6586_v2  ;;  %v2518_v20 = vadd.f32 %v6013_v14, %v2510_v21  ;;  %vm6614_vm10 = vmpackc.low %vm2505_vm8, %vm2504_vm7 }
 0xa24   : > { %vm6622_vm11 = vmpackc.low %vm2503_vm9, %vm2502_vm6  ;;  %v2520_v22 = vadd.f32 %v6013_v14, %v2512_v5  ;;  %v2521_v7 = vadd.f32 %v6013_v14, %v2513_v18  ;;  %4242 = vmatpush3.bf16.msra.mxu1 %v6631_v51  ;;  %v2617_v45 = vmul.f32 1.1976906, %v6513_v12  ;;  %v2641_v54 = vmul.f32 -0.19769059, %v4552_v27 }
 0xa25   : > { %v2519_v1 = vadd.f32 %v6013_v14, %v2511_v31  ;;  %v2526_v23 = vsel %vm2502_vm6, %v2518_v20, 0.0  ;;  %4243 = vmatprep.subr.bf16.mxu1 %v6640_v10  ;;  %v2639_v28 = vmul.f32 -0.19769059, %v4557_v30  ;;  %v2615_v4 = vmul.f32 1.1976906, %v6521_v58 }
 0xa26   : > { %v2534_v43 = vmul.f32 -0.36309803, %v2526_v23  ;;  %v2528_v38 = vsel %vm2504_vm7, %v2520_v22, 0.0  ;;  %v2529_v11 = vsel %vm2505_vm8, %v2521_v7, 0.0  ;;  %v3654_v9 = vpack.c.bf16 %v2521_v7, %v2520_v22 }
 0xa27   : > { %v2527_v14 = vsel %vm2503_vm9, %v2519_v1, 0.0  ;;  %v3651_v46 = vpack.c.bf16 %v2519_v1, %v2518_v20  ;;  %v2536_v0 = vmul.f32 -0.36309803, %v2528_v38  ;;  %v2537_v26 = vmul.f32 -0.36309803, %v2529_v11 }
 0xa28   : > { %v2535_v59 = vmul.f32 -0.36309803, %v2527_v14  ;;  %v6650_v48 = vadd.f32 %v2534_v43, %v6467_v33  ;;  %4244 = vmatpush3.bf16.msra.mxu1 %v6640_v10  ;;  %v2642_v16 = vmul.f32 -0.19769059, %v4565_v34  ;;  %v2640_v12 = vmul.f32 -0.19769059, %v4575_v39 }
 0xa29   : > { %4213 = vmatprep.mubr.msk.bf16.mxu1 %vm6622_vm11, %v3651_v46  ;;  %v6656_v24 = vadd.f32 %v2536_v0, %v6473_v47  ;;  %v6659_v15 = vadd.f32 %v2537_v26, %v6476_v36  ;;  %4245 = vmatprep.subr.bf16.mxu1 %v6664_v61  ;;  %v6676_v47 = vld [vmem:[%s7291_s4 + $0x20] sm:$0xff]   ;;  %v6683_v36 = vld [vmem:[%s7291_s4 + $0x18] sm:$0xff]   ;;  %v2645_v3 = vmul.f32 -0.19769059, %v4582_v44  ;;  %v2618_v5 = vmul.f32 1.1976906, %v6526_v41 }
 0xa2a   : > { %v6668_v33 = vadd.f32 %v2535_v59, %v6480_v17  ;;  %v6690_v17 = vld [vmem:[%s7291_s4 + $0x10] sm:$0xff]   ;;  %v2616_v58 = vmul.f32 1.1976906, %v6536_v6  ;;  %v2643_v20 = vmul.f32 -0.19769059, %v4591_v50 }
 0xa2b   : > { %4214 = vmatmul.mubr.msk.bf16.gmra.mxu1 %vm6614_vm10, %v3654_v9  ;;  %v2646_v32 = vmul.f32 -0.19769059, %v4602_v56  ;;  %v2621_v43 = vmul.f32 1.1976906, %v6552_v62  ;;  %v2619_v38 = vmul.f32 1.1976906, %v6568_v37 }
 0xa2c   : > { %4246 = vmatpush3.bf16.msra.mxu1 %v6664_v61  ;;  %v2644_v41 = vmul.f32 -0.19769059, %v4613_v63  ;;  %v6723_v6 = vld [vmem:[%s7293_s6] ss:$0 sm:$0xff]  ;;  %v2622_v62 = vmul.f32 1.1976906, %v6574_v57 }
 0xa2d   : > { %4247 = vmatprep.subr.bf16.mxu1 %v6676_v47  ;;  %v2620_v37 = vmul.f32 1.1976906, %v6586_v2  ;;  %v6742_v57 = vld [vmem:[%s7293_s6 + $0x1] ss:$0 sm:$0xff] }
 0xa30   : > { %4248 = vmatpush3.bf16.msra.mxu1 %v6676_v47 }
 0xa31   : > { %4249 = vmatprep.subr.bf16.mxu1 %v6683_v36 }
 0xa34   : > { %4250 = vmatpush3.bf16.msra.mxu1 %v6683_v36 }
 0xa35   : > { %4251 = vmatprep.subr.bf16.mxu1 %v6690_v17 }
 0xa38   : > { %4252 = vmatpush3.bf16.msra.mxu1 %v6690_v17 }
 0xa39   : > { %4253 = vmatprep.subr.bf16.mxu1 %v6146_v40 }
 0xa3c   : > { %4254 = vmatpush3.bf16.msra.mxu1 %v6146_v40  ;;  %v6706_v40 = vld [vmem:[%s7293_s6 + $0xe] ss:$0 sm:$0xff] }
 0xa3d   : > { %4255 = vmatprep.subr.bf16.mxu1 %v6153_v52 }
 0xa40   : > { %4256 = vmatpush3.bf16.msra.mxu1 %v6153_v52 }
 0xae3   : > { %v4211_v55 = vpop.f32.mrf.mxu1 }
 0xae4   : > { %v2625_v13 = vmul.f32 -0.24812555, %v4211_v55 }
 0xae5   : > { %v2584_v19 = vpop.f32.mrf.mxu1 }
 0xae6   : > { %v2633_v53 = vadd.f32 %v2625_v13, %v2617_v45  ;;  %v2623_v29 = vmul.f32 -0.24812555, %v2584_v19 }
 0xae7   : > { %v4212_v52 = vpop.f32.mrf.mxu1 }
 0xae8   : > { %v2649_v49 = vadd.f32 %v2641_v54, %v2633_v53  ;;  %v2631_v21 = vadd.f32 %v2623_v29, %v2615_v4  ;;  %v2626_v18 = vmul.f32 -0.24812555, %v4212_v52 }
 0xae9   : > { %v2587_v31 = vpop.f32.mrf.mxu1 }
 0xaea   : > { %v6715_v8 = vadd.f32 %v6706_v40, %v2649_v49  ;;  %v2647_v22 = vadd.f32 %v2639_v28, %v2631_v21  ;;  %v2634_v7 = vadd.f32 %v2626_v18, %v2618_v5  ;;  %v2624_v1 = vmul.f32 -0.24812555, %v2587_v31 }
 0xaeb   : > { %v4215_v23 = vpop.f32.mrf.mxu1 }
 0xaec   : > { %v2678_v11 = vmul.f32 %v6723_v6, %v6715_v8  ;;  %v6728_v9 = vadd.f32 %v6706_v40, %v2647_v22  ;;  %v2650_v14 = vadd.f32 %v2642_v16, %v2634_v7  ;;  %v2632_v46 = vadd.f32 %v2624_v1, %v2616_v58 }
 0xaed   : > { %v2629_v0 = vmul.f32 -0.24812555, %v4215_v23  ;;  %v2600_v26 = vpop.f32.mrf.mxu1  ;;  %vm2670_vm12 = vcmp.gt.f32.partialorder %v6715_v8, 0.0 }
 0xaee   : > { %v6733_v59 = vadd.f32 %v6706_v40, %v2650_v14  ;;  %v2648_v55 = vadd.f32 %v2640_v12, %v2632_v46  ;;  %v2627_v45 = vmul.f32 -0.24812555, %v2600_v26  ;;  %vm2668_vm13 = vcmp.gt.f32.partialorder %v6728_v9, 0.0 }
 0xaef   : > { %v2637_v13 = vadd.f32 %v2629_v0, %v2621_v43  ;;  %v4216_v54 = vpop.f32.mrf.mxu1  ;;  %v2676_v19 = vmul.f32 %v6723_v6, %v6728_v9  ;;  %v2686_v2 = vadd.f32 %v6742_v57, %v2678_v11 }
 0xaf0   : > { %v2679_v28 = vmul.f32 %v6723_v6, %v6733_v59  ;;  %v6748_v53 = vadd.f32 %v6706_v40, %v2648_v55  ;;  %v2635_v4 = vadd.f32 %v2627_v45, %v2619_v38  ;;  %v2630_v29 = vmul.f32 -0.24812555, %v4216_v54 }
 0xaf1   : > { %v2653_v16 = vadd.f32 %v2645_v3, %v2637_v13  ;;  %v2603_v52 = vpop.f32.mrf.mxu1  ;;  %v2684_v12 = vadd.f32 %v6742_v57, %v2676_v19  ;;  %vm2671_vm14 = vcmp.gt.f32.partialorder %v6733_v59, 0.0  ;;  %v2694_v49 = vsel %vm2670_vm12, %v2686_v2, 0.0 }
 0xaf2   : > { %v2651_v21 = vadd.f32 %v2643_v20, %v2635_v4  ;;  %v2638_v5 = vadd.f32 %v2630_v29, %v2622_v62  ;;  %v2628_v18 = vmul.f32 -0.24812555, %v2603_v52  ;;  %vm2669_vm15 = vcmp.gt.f32.partialorder %v6748_v53, 0.0  ;;  %vm6759_vm0 = vmpackc.low %vm2671_vm14, %vm2670_vm12 }
 0xaf3   : > { %v6764_v3 = vadd.f32 %v6706_v40, %v2653_v16  ;;  %v2677_v58 = vmul.f32 %v6723_v6, %v6748_v53  ;;  %v2692_v20 = vsel %vm2668_vm13, %v2684_v12, 0.0  ;;  %vm6774_vm1 = vmpackc.low %vm2669_vm15, %vm2668_vm13  ;;  %v2687_v7 = vadd.f32 %v6742_v57, %v2679_v28 }
 0xaf4   : > { %v6780_v1 = vadd.f32 %v6706_v40, %v2651_v21  ;;  %v2654_v23 = vadd.f32 %v2646_v32, %v2638_v5  ;;  %v2636_v43 = vadd.f32 %v2628_v18, %v2620_v37  ;;  %v2700_v38 = vmul.f32 -0.29011953, %v2692_v20 }
 0xaf5   : > { %v2685_v11 = vadd.f32 %v6742_v57, %v2677_v58  ;;  %v2695_v14 = vsel %vm2671_vm14, %v2687_v7, 0.0  ;;  %v2702_v46 = vmul.f32 -0.29011953, %v2694_v49  ;;  %v3661_v0 = vpack.c.bf16 %v2687_v7, %v2686_v2 }
 0xaf6   : > { %v6786_v26 = vadd.f32 %v6706_v40, %v2654_v23  ;;  %v2652_v62 = vadd.f32 %v2644_v41, %v2636_v43  ;;  %v6789_v55 = vadd.f32 %v2700_v38, %v6577_v42  ;;  %v2703_v45 = vmul.f32 -0.29011953, %v2695_v14 }
 0xaf7   : > { %v2693_v32 = vsel %vm2669_vm15, %v2685_v11, 0.0  ;;  %v3658_v37 = vpack.c.bf16 %v2685_v11, %v2684_v12  ;;  %v6794_v13 = vadd.f32 %v2702_v46, %v6582_v25  ;;  %vm2672_vm3 = vcmp.gt.f32.partialorder %v6780_v1, 0.0 }
 0xaf8   : > { %v6798_v54 = vadd.f32 %v6706_v40, %v2652_v62  ;;  %v2701_v19 = vmul.f32 -0.29011953, %v2693_v32  ;;  %v6801_v2 = vadd.f32 %v2703_v45, %v6589_v60  ;;  %v2680_v42 = vmul.f32 %v6723_v6, %v6780_v1 }
 0xaf9   : > { %4233 = vmatprep.mubr.msk.bf16.mxu0 %vm6774_vm1, %v3658_v37  ;;  %vm2674_vm4 = vcmp.gt.f32.partialorder %v6764_v3, 0.0  ;;  %vm2675_vm5 = vcmp.gt.f32.partialorder %v6786_v26, 0.0  ;;  %v2682_v25 = vmul.f32 %v6723_v6, %v6764_v3  ;;  %v2683_v40 = vmul.f32 %v6723_v6, %v6786_v26 }
 0xafa   : > { %v6814_v41 = vadd.f32 %v2701_v19, %v6602_v35  ;;  %4234 = vmatmul.mubr.msk.bf16.vlgmr.msra.gmra.mxu0 %vm6759_vm0, %v3661_v0  ;;  %vm2673_vm6 = vcmp.gt.f32.partialorder %v6798_v54, 0.0  ;;  %v2681_v60 = vmul.f32 %v6723_v6, %v6798_v54  ;;  %v2688_v28 = vadd.f32 %v6742_v57, %v2680_v42  ;;  %vm6826_vm7 = vmpackc.low %vm2675_vm5, %vm2674_vm4  ;;  %v6886_v0 = vld [vmem:[%s7293_s6 + $0xf] ss:$0 sm:$0xff] }
 0xafb   : > { %vm6832_vm8 = vmpackc.low %vm2673_vm6, %vm2672_vm3  ;;  %v2690_v29 = vadd.f32 %v6742_v57, %v2682_v25  ;;  %v2691_v16 = vadd.f32 %v6742_v57, %v2683_v40  ;;  %4266 = vmatpush3.bf16.msra.mxu0 %v6631_v51  ;;  %v2785_v11 = vmul.f32 1.1589011, %v6728_v9  ;;  %v2812_v46 = vmul.f32 -0.1589011, %v4565_v34 }
 0xafc   : > { %v2689_v52 = vadd.f32 %v6742_v57, %v2681_v60  ;;  %v2696_v12 = vsel %vm2672_vm3, %v2688_v28, 0.0  ;;  %4267 = vmatprep.subr.bf16.mxu0 %v6640_v10  ;;  %v2815_v45 = vmul.f32 -0.1589011, %v4582_v44  ;;  %v2788_v19 = vmul.f32 1.1589011, %v6733_v59 }
 0xafd   : > { %v2704_v49 = vmul.f32 -0.29011953, %v2696_v12  ;;  %v2698_v21 = vsel %vm2674_vm4, %v2690_v29, 0.0  ;;  %v2699_v5 = vsel %vm2675_vm5, %v2691_v16, 0.0  ;;  %v3667_v18 = vpack.c.bf16 %v2691_v16, %v2690_v29 }
 0xafe   : > { %v2697_v31 = vsel %vm2673_vm6, %v2689_v52, 0.0  ;;  %v3664_v58 = vpack.c.bf16 %v2689_v52, %v2688_v28  ;;  %v2706_v20 = vmul.f32 -0.29011953, %v2698_v21  ;;  %v2707_v22 = vmul.f32 -0.29011953, %v2699_v5 }
 0xaff   : > { %v2705_v51 = vmul.f32 -0.29011953, %v2697_v31  ;;  %v6848_v7 = vadd.f32 %v2704_v49, %v6650_v48  ;;  %4268 = vmatpush3.bf16.msra.mxu0 %v6640_v10  ;;  %v4371_v10 = vld [vmem:[%s7291_s4 + $0x8] sm:$0xff]   ;;  %v4372_v48 = vld [vmem:[%s7291_s4] sm:$0xff]   ;;  %v2786_v9 = vmul.f32 1.1589011, %v6748_v53 }
 0xb00   : > { %4237 = vmatprep.mubr.msk.bf16.mxu0 %vm6832_vm8, %v3664_v58  ;;  %v6854_v23 = vadd.f32 %v2706_v20, %v6656_v24  ;;  %v6857_v43 = vadd.f32 %v2707_v22, %v6659_v15  ;;  %4269 = vmatprep.subr.bf16.mxu0 %v6664_v61  ;;  %v2787_v15 = vmul.f32 1.1589011, %v6715_v8  ;;  %v2810_v8 = vmul.f32 -0.1589011, %v4575_v39 }
 0xb01   : > { %v6861_v38 = vadd.f32 %v2705_v51, %v6668_v33  ;;  %v2811_v33 = vmul.f32 -0.1589011, %v4552_v27  ;;  %v2813_v40 = vmul.f32 -0.1589011, %v4591_v50  ;;  %v2816_v60 = vmul.f32 -0.1589011, %v4602_v56 }
 0xb02   : > { %4238 = vmatmul.mubr.msk.bf16.gmra.mxu0 %vm6826_vm7, %v3667_v18  ;;  %v2791_v52 = vmul.f32 1.1589011, %v6764_v3  ;;  %v2789_v12 = vmul.f32 1.1589011, %v6780_v1  ;;  %v2814_v59 = vmul.f32 -0.1589011, %v4613_v63 }
 0xb03   : > { %4270 = vmatpush3.bf16.msra.mxu0 %v6664_v61  ;;  %v2792_v58 = vmul.f32 1.1589011, %v6786_v26  ;;  %v2790_v20 = vmul.f32 1.1589011, %v6798_v54 }
 0xb04   : > { %4271 = vmatprep.subr.bf16.mxu0 %v6676_v47 }
 0xb07   : > { %4272 = vmatpush3.bf16.msra.mxu0 %v6676_v47 }
 0xb08   : > { %4273 = vmatprep.subr.bf16.mxu0 %v6683_v36 }
 0xb0b   : > { %4274 = vmatpush3.bf16.msra.mxu0 %v6683_v36  ;;  %v2809_v36 = vmul.f32 -0.1589011, %v4557_v30 }
 0xb0c   : > { %4275 = vmatprep.subr.bf16.mxu0 %v6690_v17 }
 0xb0f   : > { %4276 = vmatpush3.bf16.msra.mxu0 %v6690_v17 }
 0xb10   : > { %4277 = vmatprep.subr.bf16.mxu0 %v4371_v10 }
 0xb13   : > { %4278 = vmatpush3.bf16.msra.mxu0 %v4371_v10 }
 0xb14   : > { %4279 = vmatprep.subr.bf16.mxu0 %v4372_v48 }
 0xb17   : > { %4280 = vmatpush3.bf16.msra.mxu0 %v4372_v48 }
 0xbba   : > { %v4235_v24 = vpop.f32.mrf.mxu0 }
 0xbbb   : > { %v2795_v61 = vmul.f32 -0.22975816, %v4235_v24 }
 0xbbc   : > { %v2754_v47 = vpop.f32.mrf.mxu0 }
 0xbbd   : > { %v2803_v17 = vadd.f32 %v2795_v61, %v2787_v15  ;;  %v2793_v14 = vmul.f32 -0.22975816, %v2754_v47 }
 0xbbe   : > { %v4236_v62 = vpop.f32.mrf.mxu0 }
 0xbbf   : > { %v2819_v32 = vadd.f32 %v2811_v33, %v2803_v17  ;;  %v2801_v37 = vadd.f32 %v2793_v14, %v2785_v11  ;;  %v2796_v42 = vmul.f32 -0.22975816, %v4236_v62 }
 0xbc0   : > { %v2757_v25 = vpop.f32.mrf.mxu0 }
 0xbc1   : > { %v6895_v28 = vadd.f32 %v6886_v0, %v2819_v32  ;;  %v2817_v4 = vadd.f32 %v2809_v36, %v2801_v37  ;;  %v2804_v35 = vadd.f32 %v2796_v42, %v2788_v19  ;;  %v2794_v29 = vmul.f32 -0.22975816, %v2757_v25 }
 0xbc2   : > { %v4239_v16 = vpop.f32.mrf.mxu0  ;;  %v2981_v37 = vmul.f32 -0.12011161, %v4552_v27 }
 0xbc3   : > { %v2848_v53 = vmul.f32 %v6723_v6, %v6895_v28  ;;  %v6903_v49 = vadd.f32 %v6886_v0, %v2817_v4  ;;  %v2820_v21 = vadd.f32 %v2812_v46, %v2804_v35  ;;  %v2802_v5 = vadd.f32 %v2794_v29, %v2786_v9 }
 0xbc4   : > { %v2799_v18 = vmul.f32 -0.22975816, %v4239_v16  ;;  %v2770_v31 = vpop.f32.mrf.mxu0  ;;  %vm2840_vm9 = vcmp.gt.f32.partialorder %v6895_v28, 0.0 }
 0xbc5   : > { %v6908_v3 = vadd.f32 %v6886_v0, %v2820_v21  ;;  %v2818_v1 = vadd.f32 %v2810_v8, %v2802_v5  ;;  %v2797_v22 = vmul.f32 -0.22975816, %v2770_v31  ;;  %vm2838_vm10 = vcmp.gt.f32.partialorder %v6903_v49, 0.0 }
 0xbc6   : > { %v2807_v51 = vadd.f32 %v2799_v18, %v2791_v52  ;;  %v4240_v10 = vpop.f32.mrf.mxu0  ;;  %v2846_v48 = vmul.f32 %v6723_v6, %v6903_v49  ;;  %v2856_v24 = vadd.f32 %v6742_v57, %v2848_v53 }
 0xbc7   : > { %v2849_v26 = vmul.f32 %v6723_v6, %v6908_v3  ;;  %v6918_v54 = vadd.f32 %v6886_v0, %v2818_v1  ;;  %v2805_v15 = vadd.f32 %v2797_v22, %v2789_v12  ;;  %v2800_v61 = vmul.f32 -0.22975816, %v4240_v10 }
 0xbc8   : > { %v2823_v33 = vadd.f32 %v2815_v45, %v2807_v51  ;;  %v2773_v47 = vpop.f32.mrf.mxu0  ;;  %v2854_v36 = vadd.f32 %v6742_v57, %v2846_v48  ;;  %vm2841_vm11 = vcmp.gt.f32.partialorder %v6908_v3, 0.0  ;;  %v2864_v17 = vsel %vm2840_vm9, %v2856_v24, 0.0 }
 0xbc9   : > { %v2821_v11 = vadd.f32 %v2813_v40, %v2805_v15  ;;  %v2808_v14 = vadd.f32 %v2800_v61, %v2792_v58  ;;  %v2798_v46 = vmul.f32 -0.22975816, %v2773_v47  ;;  %vm2839_vm12 = vcmp.gt.f32.partialorder %v6918_v54, 0.0  ;;  %vm6929_vm13 = vmpackc.low %vm2841_vm11, %vm2840_vm9 }
 0xbca   : > { %v6934_v8 = vadd.f32 %v6886_v0, %v2823_v33  ;;  %v2847_v45 = vmul.f32 %v6723_v6, %v6918_v54  ;;  %v2862_v32 = vsel %vm2838_vm10, %v2854_v36, 0.0  ;;  %vm6944_vm14 = vmpackc.low %vm2839_vm12, %vm2838_vm10  ;;  %v2857_v19 = vadd.f32 %v6742_v57, %v2849_v26 }
 0xbcb   : > { %v6950_v42 = vadd.f32 %v6886_v0, %v2821_v11  ;;  %v2824_v25 = vadd.f32 %v2816_v60, %v2808_v14  ;;  %v2806_v9 = vadd.f32 %v2798_v46, %v2790_v20  ;;  %v2870_v40 = vmul.f32 -0.24302676, %v2862_v32  ;;  %v4335_v32 = vld [vmem:[%s7292_s5 + $0x38] sm:$0xff]  }
 0xbcc   : > { %v2855_v4 = vadd.f32 %v6742_v57, %v2847_v45  ;;  %v2865_v35 = vsel %vm2841_vm11, %v2857_v19, 0.0  ;;  %v2872_v29 = vmul.f32 -0.24302676, %v2864_v17  ;;  %v3674_v16 = vpack.c.bf16 %v2857_v19, %v2856_v24  ;;  %4289 = vmatprep.subr.bf16.mxu1 %v4335_v32 }
 0xbcd   : > { %v6956_v52 = vadd.f32 %v6886_v0, %v2824_v25  ;;  %v2822_v12 = vadd.f32 %v2814_v59, %v2806_v9  ;;  %v6959_v53 = vadd.f32 %v2870_v40, %v6789_v55  ;;  %v2873_v21 = vmul.f32 -0.24302676, %v2865_v35 }
 0xbce   : > { %v2863_v60 = vsel %vm2839_vm12, %v2855_v4, 0.0  ;;  %v3671_v5 = vpack.c.bf16 %v2855_v4, %v2854_v36  ;;  %v6964_v18 = vadd.f32 %v2872_v29, %v6794_v13  ;;  %vm2842_vm15 = vcmp.gt.f32.partialorder %v6950_v42, 0.0  ;;  %v7039_v29 = vld [vmem:[%s7293_s6 + $0x10] ss:$0 sm:$0xff] }
 0xbcf   : > { %v6968_v31 = vadd.f32 %v6886_v0, %v2822_v12  ;;  %v2871_v58 = vmul.f32 -0.24302676, %v2863_v60  ;;  %v6971_v20 = vadd.f32 %v2873_v21, %v6801_v2  ;;  %v2850_v55 = vmul.f32 %v6723_v6, %v6950_v42 }
 0xbd0   : > { %4257 = vmatprep.mubr.msk.bf16.mxu1 %vm6944_vm14, %v3671_v5  ;;  %vm2844_vm0 = vcmp.gt.f32.partialorder %v6934_v8, 0.0  ;;  %vm2845_vm1 = vcmp.gt.f32.partialorder %v6956_v52, 0.0  ;;  %v2852_v13 = vmul.f32 %v6723_v6, %v6934_v8  ;;  %v2853_v0 = vmul.f32 %v6723_v6, %v6956_v52 }
 0xbd1   : > { %v6984_v59 = vadd.f32 %v2871_v58, %v6814_v41  ;;  %4258 = vmatmul.mubr.msk.bf16.vlgmr.msra.gmra.mxu1 %vm6929_vm13, %v3674_v16  ;;  %vm2843_vm3 = vcmp.gt.f32.partialorder %v6968_v31, 0.0  ;;  %v2851_v2 = vmul.f32 %v6723_v6, %v6968_v31  ;;  %v2858_v1 = vadd.f32 %v6742_v57, %v2850_v55  ;;  %vm6996_vm4 = vmpackc.low %vm2845_vm1, %vm2844_vm0 }
 0xbd2   : > { %vm3676_vm5 = vmpackc.low %vm2843_vm3, %vm2842_vm15  ;;  %v2860_v41 = vadd.f32 %v6742_v57, %v2852_v13  ;;  %v2861_v51 = vadd.f32 %v6742_v57, %v2853_v0  ;;  %4290 = vmatpush3.bf16.msra.mxu1 %v4335_v32  ;;  %v2979_v25 = vmul.f32 -0.12011161, %v4557_v30  ;;  %v2955_v40 = vmul.f32 1.1201116, %v6903_v49 }
 0xbd3   : > { %v2859_v10 = vadd.f32 %v6742_v57, %v2851_v2  ;;  %v2866_v48 = vsel %vm2842_vm15, %v2858_v1, 0.0  ;;  %v2982_v35 = vmul.f32 -0.12011161, %v4565_v34  ;;  %v2985_v12 = vmul.f32 -0.12011161, %v4582_v44 }
 0xbd4   : > { %v2874_v24 = vmul.f32 -0.24302676, %v2866_v48  ;;  %v2868_v26 = vsel %vm2844_vm0, %v2860_v41, 0.0  ;;  %v2869_v15 = vsel %vm2845_vm1, %v2861_v51, 0.0  ;;  %v3680_v61 = vpack.c.bf16 %v2861_v51, %v2860_v41 }
 0xbd5   : > { %v2867_v33 = vsel %vm2843_vm3, %v2859_v10, 0.0  ;;  %v3677_v47 = vpack.c.bf16 %v2859_v10, %v2858_v1  ;;  %v2876_v36 = vmul.f32 -0.24302676, %v2868_v26  ;;  %v2877_v17 = vmul.f32 -0.24302676, %v2869_v15 }
 0xbd6   : > { %v2875_v11 = vmul.f32 -0.24302676, %v2867_v33  ;;  %v7012_v14 = vadd.f32 %v2874_v24, %v6848_v7  ;;  %v4336_v7 = vld [vmem:[%s7292_s5 + $0x30] sm:$0xff]   ;;  %v2958_v5 = vmul.f32 1.1201116, %v6908_v3 }
 0xbd7   : > { %4261 = vmatprep.mubr.msk.bf16.mxu1 %vm3676_vm5, %v3677_v47  ;;  %v7015_v46 = vadd.f32 %v2876_v36, %v6854_v23  ;;  %v7018_v62 = vadd.f32 %v2877_v17, %v6857_v43  ;;  %4291 = vmatprep.subr.bf16.mxu1 %v4336_v7  ;;  %v2957_v43 = vmul.f32 1.1201116, %v6895_v28  ;;  %v2980_v28 = vmul.f32 -0.12011161, %v4575_v39 }
 0xbd8   : > { %v7021_v45 = vadd.f32 %v2875_v11, %v6861_v38  ;;  %4292 = vmatpush3.bf16.msra.mxu1 %v4336_v7  ;;  %v2956_v49 = vmul.f32 1.1201116, %v6918_v54  ;;  %v2983_v13 = vmul.f32 -0.12011161, %v4591_v50  ;;  %v2986_v0 = vmul.f32 -0.12011161, %v4602_v56 }
 0xbd9   : > { %4262 = vmatmul.mubr.msk.bf16.gmra.mxu1 %vm6996_vm4, %v3680_v61  ;;  %v2961_v10 = vmul.f32 1.1201116, %v6934_v8  ;;  %v2959_v48 = vmul.f32 1.1201116, %v6950_v42  ;;  %v2984_v3 = vmul.f32 -0.12011161, %v4613_v63 }
 0xbda   : > { %v2962_v47 = vmul.f32 1.1201116, %v6956_v52  ;;  %v2960_v36 = vmul.f32 1.1201116, %v6968_v31 }
 0xc91   : > { %v4259_v23 = vpop.f32.mrf.mxu1 }
 0xc92   : > { %v2965_v38 = vmul.f32 -0.21558043, %v4259_v23 }
 0xc93   : > { %v2924_v19 = vpop.f32.mrf.mxu1 }
 0xc94   : > { %v2973_v9 = vadd.f32 %v2965_v38, %v2957_v43  ;;  %v2963_v4 = vmul.f32 -0.21558043, %v2924_v19 }
 0xc95   : > { %v4260_v16 = vpop.f32.mrf.mxu1 }
 0xc96   : > { %v2989_v21 = vadd.f32 %v2981_v37, %v2973_v9  ;;  %v2971_v60 = vadd.f32 %v2963_v4, %v2955_v40  ;;  %v2966_v58 = vmul.f32 -0.21558043, %v4260_v16 }
 0xc97   : > { %v2927_v55 = vpop.f32.mrf.mxu1 }
 0xc98   : > { %v7048_v2 = vadd.f32 %v7039_v29, %v2989_v21  ;;  %v2987_v1 = vadd.f32 %v2979_v25, %v2971_v60  ;;  %v2974_v22 = vadd.f32 %v2966_v58, %v2958_v5  ;;  %v2964_v41 = vmul.f32 -0.21558043, %v2927_v55  ;;  %v4342_v60 = vld [vmem:[%s7292_s5] sm:$0xff]  }
 0xc99   : > { %v4263_v51 = vpop.f32.mrf.mxu1 }
 0xc9a   : > { %v3018_v54 = vmul.f32 %v6723_v6, %v7048_v2  ;;  %v7056_v24 = vadd.f32 %v7039_v29, %v2987_v1  ;;  %v2990_v26 = vadd.f32 %v2982_v35, %v2974_v22  ;;  %v2972_v15 = vadd.f32 %v2964_v41, %v2956_v49 }
 0xc9b   : > { %v2969_v61 = vmul.f32 -0.21558043, %v4263_v51  ;;  %v2940_v33 = vpop.f32.mrf.mxu1  ;;  %vm3010_vm6 = vcmp.gt.f32.partialorder %v7048_v2, 0.0 }
 0xc9c   : > { %v7061_v8 = vadd.f32 %v7039_v29, %v2990_v26  ;;  %v2988_v42 = vadd.f32 %v2980_v28, %v2972_v15  ;;  %v2967_v17 = vmul.f32 -0.21558043, %v2940_v33  ;;  %vm3008_vm7 = vcmp.gt.f32.partialorder %v7056_v24, 0.0 }
 0xc9d   : > { %v2977_v11 = vadd.f32 %v2969_v61, %v2961_v10  ;;  %v4264_v32 = vpop.f32.mrf.mxu1  ;;  %v3016_v7 = vmul.f32 %v6723_v6, %v7056_v24  ;;  %v3026_v23 = vadd.f32 %v6742_v57, %v3018_v54 }
 0xc9e   : > { %v3019_v52 = vmul.f32 %v6723_v6, %v7061_v8  ;;  %v7071_v31 = vadd.f32 %v7039_v29, %v2988_v42  ;;  %v2975_v43 = vadd.f32 %v2967_v17, %v2959_v48  ;;  %v2970_v38 = vmul.f32 -0.21558043, %v4264_v32 }
 0xc9f   : > { %v2993_v37 = vadd.f32 %v2985_v12, %v2977_v11  ;;  %v2943_v19 = vpop.f32.mrf.mxu1  ;;  %v3024_v25 = vadd.f32 %v6742_v57, %v3016_v7  ;;  %vm3011_vm8 = vcmp.gt.f32.partialorder %v7061_v8, 0.0  ;;  %v3034_v9 = vsel %vm3010_vm6, %v3026_v23, 0.0 }
 0xca0   : > { %v2991_v40 = vadd.f32 %v2983_v13, %v2975_v43  ;;  %v2978_v4 = vadd.f32 %v2970_v38, %v2962_v47  ;;  %v2968_v35 = vmul.f32 -0.21558043, %v2943_v19  ;;  %vm3009_vm9 = vcmp.gt.f32.partialorder %v7071_v31, 0.0  ;;  %vm7082_vm10 = vmpackc.low %vm3011_vm8, %vm3010_vm6 }
 0xca1   : > { %v7087_v28 = vadd.f32 %v7039_v29, %v2993_v37  ;;  %v3017_v12 = vmul.f32 %v6723_v6, %v7071_v31  ;;  %v3032_v21 = vsel %vm3008_vm7, %v3024_v25, 0.0  ;;  %vm7097_vm11 = vmpackc.low %vm3009_vm9, %vm3008_vm7  ;;  %v3027_v5 = vadd.f32 %v6742_v57, %v3019_v52 }
 0xca2   : > { %v7103_v58 = vadd.f32 %v7039_v29, %v2991_v40  ;;  %v2994_v55 = vadd.f32 %v2986_v0, %v2978_v4  ;;  %v2976_v49 = vadd.f32 %v2968_v35, %v2960_v36  ;;  %v3040_v13 = vmul.f32 -0.21428335, %v3032_v21  ;;  %v4337_v21 = vld [vmem:[%s7292_s5 + $0x28] sm:$0xff]  }
 0xca3   : > { %v3025_v1 = vadd.f32 %v6742_v57, %v3017_v12  ;;  %v3035_v22 = vsel %vm3011_vm8, %v3027_v5, 0.0  ;;  %v3042_v41 = vmul.f32 -0.21428335, %v3034_v9  ;;  %v3687_v51 = vpack.c.bf16 %v3027_v5, %v3026_v23  ;;  %4293 = vmatprep.subr.bf16.mxu1 %v4337_v21 }
 0xca4   : > { %v7109_v10 = vadd.f32 %v7039_v29, %v2994_v55  ;;  %v2992_v48 = vadd.f32 %v2984_v3, %v2976_v49  ;;  %v7112_v54 = vadd.f32 %v3040_v13, %v6959_v53  ;;  %v3043_v26 = vmul.f32 -0.21428335, %v3035_v22  ;;  %4294 = vmatpush3.bf16.msra.mxu1 %v4337_v21 }
 0xca5   : > { %v3033_v0 = vsel %vm3009_vm9, %v3025_v1, 0.0  ;;  %v3684_v15 = vpack.c.bf16 %v3025_v1, %v3024_v25  ;;  %v7117_v61 = vadd.f32 %v3042_v41, %v6964_v18  ;;  %vm3012_vm12 = vcmp.gt.f32.partialorder %v7103_v58, 0.0 }
 0xca6   : > { %v7121_v33 = vadd.f32 %v7039_v29, %v2992_v48  ;;  %v3041_v47 = vmul.f32 -0.21428335, %v3033_v0  ;;  %v7124_v36 = vadd.f32 %v3043_v26, %v6971_v20  ;;  %v3020_v53 = vmul.f32 %v6723_v6, %v7103_v58  ;;  %v7202_v48 = vld [vmem:[%s7293_s6 + $0x11] ss:$0 sm:$0xff] }
 0xca7   : > { %4281 = vmatprep.mubr.msk.bf16.mxu0 %vm7097_vm11, %v3684_v15  ;;  %vm3014_vm13 = vcmp.gt.f32.partialorder %v7087_v28, 0.0  ;;  %vm3015_vm14 = vcmp.gt.f32.partialorder %v7109_v10, 0.0  ;;  %v3022_v18 = vmul.f32 %v6723_v6, %v7087_v28  ;;  %v3023_v29 = vmul.f32 %v6723_v6, %v7109_v10 }
 0xca8   : > { %v7137_v3 = vadd.f32 %v3041_v47, %v6984_v59  ;;  %4282 = vmatmul.mubr.msk.bf16.vlgmr.msra.gmra.mxu0 %vm7082_vm10, %v3687_v51  ;;  %vm3013_vm15 = vcmp.gt.f32.partialorder %v7121_v33, 0.0  ;;  %v3021_v20 = vmul.f32 %v6723_v6, %v7121_v33  ;;  %v3028_v42 = vadd.f32 %v6742_v57, %v3020_v53  ;;  %vm7149_vm0 = vmpackc.low %vm3015_vm14, %vm3014_vm13 }
 0xca9   : > { %vm3689_vm1 = vmpackc.low %vm3013_vm15, %vm3012_vm12  ;;  %v3030_v59 = vadd.f32 %v6742_v57, %v3022_v18  ;;  %v3031_v11 = vadd.f32 %v6742_v57, %v3023_v29  ;;  %v3127_v55 = vmul.f32 1.0813221, %v7048_v2  ;;  %v3151_v22 = vmul.f32 -0.08132211, %v4552_v27 }
 0xcaa   : > { %v3029_v32 = vadd.f32 %v6742_v57, %v3021_v20  ;;  %v3036_v7 = vsel %vm3012_vm12, %v3028_v42, 0.0  ;;  %v3125_v41 = vmul.f32 1.0813221, %v7056_v24  ;;  %v3149_v26 = vmul.f32 -0.08132211, %v4557_v30 }
 0xcab   : > { %v3044_v23 = vmul.f32 -0.21428335, %v3036_v7  ;;  %v3038_v52 = vsel %vm3014_vm13, %v3030_v59, 0.0  ;;  %v3039_v43 = vsel %vm3015_vm14, %v3031_v11, 0.0  ;;  %v3693_v38 = vpack.c.bf16 %v3031_v11, %v3030_v59 }
 0xcac   : > { %v3037_v37 = vsel %vm3013_vm15, %v3029_v32, 0.0  ;;  %v3690_v19 = vpack.c.bf16 %v3029_v32, %v3028_v42  ;;  %v3046_v25 = vmul.f32 -0.21428335, %v3038_v52  ;;  %v3047_v9 = vmul.f32 -0.21428335, %v3039_v43 }
 0xcad   : > { %v3045_v40 = vmul.f32 -0.21428335, %v3037_v37  ;;  %v7165_v4 = vadd.f32 %v3044_v23, %v7012_v14  ;;  %v4338_v14 = vld [vmem:[%s7292_s5 + $0x20] sm:$0xff]   ;;  %v3152_v15 = vmul.f32 -0.08132211, %v4565_v34 }
 0xcae   : > { %4285 = vmatprep.mubr.msk.bf16.mxu0 %vm3689_vm1, %v3690_v19  ;;  %v7168_v35 = vadd.f32 %v3046_v25, %v7015_v46  ;;  %v7171_v16 = vadd.f32 %v3047_v9, %v7018_v62  ;;  %v4339_v46 = vld [vmem:[%s7292_s5 + $0x18] sm:$0xff]   ;;  %4295 = vmatprep.subr.bf16.mxu1 %v4338_v14  ;;  %v4340_v62 = vld [vmem:[%s7292_s5 + $0x10] sm:$0xff]   ;;  %v3128_v53 = vmul.f32 1.0813221, %v7061_v8  ;;  %v3150_v27 = vmul.f32 -0.08132211, %v4575_v39 }
 0xcaf   : > { %v7174_v12 = vadd.f32 %v3045_v40, %v7021_v45  ;;  %4296 = vmatpush3.bf16.msra.mxu1 %v4338_v14  ;;  %v4341_v45 = vld [vmem:[%s7292_s5 + $0x8] sm:$0xff]   ;;  %v3155_v24 = vmul.f32 -0.08132211, %v4582_v44  ;;  %v3153_v20 = vmul.f32 -0.08132211, %v4591_v50 }
 0xcb0   : > { %4286 = vmatmul.mubr.msk.bf16.gmra.mxu0 %vm7149_vm0, %v3693_v38  ;;  %4297 = vmatprep.subr.bf16.mxu1 %v4339_v46  ;;  %v3126_v11 = vmul.f32 1.0813221, %v7071_v31  ;;  %v3156_v32 = vmul.f32 -0.08132211, %v4602_v56  ;;  %v3154_v8 = vmul.f32 -0.08132211, %v4613_v63 }
 0xcb1   : > { %v3131_v44 = vmul.f32 1.0813221, %v7087_v28  ;;  %v3129_v38 = vmul.f32 1.0813221, %v7103_v58  ;;  %v3132_v37 = vmul.f32 1.0813221, %v7109_v10 }
 0xcb2   : > { %v3130_v19 = vmul.f32 1.0813221, %v7121_v33 }
 0xcb3   : > { %4298 = vmatpush3.bf16.msra.mxu1 %v4339_v46 }
 0xcb4   : > { %4299 = vmatprep.subr.bf16.mxu1 %v4340_v62 }
 0xcb7   : > { %4300 = vmatpush3.bf16.msra.mxu1 %v4340_v62 }
 0xcb8   : > { %4301 = vmatprep.subr.bf16.mxu1 %v4341_v45 }
 0xcbb   : > { %4302 = vmatpush3.bf16.msra.mxu1 %v4341_v45 }
 0xcbc   : > { %4303 = vmatprep.subr.bf16.mxu1 %v4342_v60 }
 0xcbf   : > { %4304 = vmatpush3.bf16.msra.mxu1 %v4342_v60 }
 0xd68   : > { %v4283_v5 = vpop.f32.mrf.mxu0 }
 0xd69   : > { %v3135_v49 = vmul.f32 -0.20554113, %v4283_v5 }
 0xd6a   : > { %v3094_v13 = vpop.f32.mrf.mxu0 }
 0xd6b   : > { %v3143_v1 = vadd.f32 %v3135_v49, %v3127_v55  ;;  %v3133_v51 = vmul.f32 -0.20554113, %v3094_v13 }
 0xd6c   : > { %v4284_v0 = vpop.f32.mrf.mxu0 }
 0xd6d   : > { %v3159_v47 = vadd.f32 %v3151_v22, %v3143_v1  ;;  %v3141_v2 = vadd.f32 %v3133_v51, %v3125_v41  ;;  %v3136_v18 = vmul.f32 -0.20554113, %v4284_v0 }
 0xd6e   : > { %v3097_v29 = vpop.f32.mrf.mxu0 }
 0xd6f   : > { %v3172_v42 = vadd.f32 %v7202_v48, %v3159_v47  ;;  %v3157_v17 = vadd.f32 %v3149_v26, %v3141_v2  ;;  %v3144_v59 = vadd.f32 %v3136_v18, %v3128_v53  ;;  %v3134_v30 = vmul.f32 -0.20554113, %v3097_v29 }
 0xd70   : > { %v4287_v34 = vpop.f32.mrf.mxu0 }
 0xd71   : > { %v3188_v7 = vmul.f32 %v6723_v6, %v3172_v42  ;;  %v3170_v39 = vadd.f32 %v7202_v48, %v3157_v17  ;;  %v3160_v23 = vadd.f32 %v3152_v15, %v3144_v59  ;;  %v3142_v50 = vadd.f32 %v3134_v30, %v3126_v11 }
 0xd72   : > { %v3139_v52 = vmul.f32 -0.20554113, %v4287_v34  ;;  %v3110_v43 = vpop.f32.mrf.mxu0  ;;  %vm3180_vm3 = vcmp.gt.f32.partialorder %v3172_v42, 0.0 }
 0xd73   : > { %v3196_v31 = vadd.f32 %v6742_v57, %v3188_v7  ;;  %v3186_v56 = vmul.f32 %v6723_v6, %v3170_v39  ;;  %v3173_v63 = vadd.f32 %v7202_v48, %v3160_v23  ;;  %v3158_v25 = vadd.f32 %v3150_v27, %v3142_v50 }
 0xd74   : > { %v3147_v9 = vadd.f32 %v3139_v52, %v3131_v44  ;;  %v3137_v40 = vmul.f32 -0.20554113, %v3110_v43  ;;  %v4288_v28 = vpop.f32.mrf.mxu0  ;;  %vm3178_vm4 = vcmp.gt.f32.partialorder %v3170_v39, 0.0 }
 0xd75   : > { %v3204_v21 = vsel %vm3180_vm3, %v3196_v31, 0.0  ;;  %v3189_v14 = vmul.f32 %v6723_v6, %v3173_v63  ;;  %v3140_v58 = vmul.f32 -0.20554113, %v4288_v28  ;;  %v3171_v10 = vadd.f32 %v7202_v48, %v3158_v25  ;;  %v4373_v25 = vld [vmem:[%s4467_s21 + $0x10] sm:$0xff] }
 0xd76   : > { %v3212_v46 = vmul.f32 -0.19977765, %v3204_v21  ;;  %v3163_v62 = vadd.f32 %v3155_v24, %v3147_v9  ;;  %v3145_v45 = vadd.f32 %v3137_v40, %v3129_v38  ;;  %v3113_v60 = vpop.f32.mrf.mxu0  ;;  %v3194_v49 = vadd.f32 %v6742_v57, %v3186_v56  ;;  %v4375_v21 = vld [vmem:[%s4467_s21 + $0x18] sm:$0xff] }
 0xd77   : > { %v3197_v5 = vadd.f32 %v6742_v57, %v3189_v14  ;;  %v3148_v55 = vadd.f32 %v3140_v58, %v3132_v37  ;;  %v3138_v33 = vmul.f32 -0.20554113, %v3113_v60  ;;  %vm3181_vm5 = vcmp.gt.f32.partialorder %v3173_v63, 0.0 }
 0xd78   : > { %v3220_v13 = vadd.f32 %v3212_v46, %v7117_v61  ;;  %v3187_v1 = vmul.f32 %v6723_v6, %v3171_v10  ;;  %v3176_v22 = vadd.f32 %v7202_v48, %v3163_v62  ;;  %v3161_v51 = vadd.f32 %v3153_v20, %v3145_v45 }
 0xd79   : > { %v3205_v41 = vsel %vm3181_vm5, %v3197_v5, 0.0  ;;  %v3164_v26 = vadd.f32 %v3156_v32, %v3148_v55  ;;  %v3146_v0 = vadd.f32 %v3138_v33, %v3130_v19  ;;  %vm3179_vm6 = vcmp.gt.f32.partialorder %v3171_v10, 0.0  ;;  %v4376_v10 = vld [vmem:[%s4467_s21 + $0x8] sm:$0xff]  ;;  %v4377_v55 = vld [vmem:[%s4467_s21 + $0x30] sm:$0xff] }
 0xd7a   : > { %v3213_v15 = vmul.f32 -0.19977765, %v3205_v41  ;;  %v3192_v47 = vmul.f32 %v6723_v6, %v3176_v22  ;;  %v3195_v2 = vadd.f32 %v6742_v57, %v3187_v1  ;;  %v3174_v53 = vadd.f32 %v7202_v48, %v3161_v51 }
 0xd7b   : > { %v3177_v18 = vadd.f32 %v7202_v48, %v3164_v26  ;;  %v3162_v61 = vadd.f32 %v3154_v8, %v3146_v0  ;;  %v3202_v29 = vsel %vm3178_vm4, %v3194_v49, 0.0  ;;  %vm3184_vm7 = vcmp.gt.f32.partialorder %v3176_v22, 0.0  ;;  %v4378_v22 = vld [vmem:[%s4467_s21 + $0x20] sm:$0xff] }
 0xd7c   : > { %v3221_v27 = vadd.f32 %v3213_v15, %v7124_v36  ;;  %v3203_v24 = vsel %vm3179_vm6, %v3195_v2, 0.0  ;;  %v3210_v42 = vmul.f32 -0.19977765, %v3202_v29  ;;  %v3200_v20 = vadd.f32 %v6742_v57, %v3192_v47  ;;  %v4379_v15 = vld [vmem:[%s4467_s21 + $0x38] sm:$0xff] }
 0xd7d   : > { %v3190_v17 = vmul.f32 %v6723_v6, %v3174_v53  ;;  %v3193_v59 = vmul.f32 %v6723_v6, %v3177_v18  ;;  %v3175_v30 = vadd.f32 %v7202_v48, %v3162_v61  ;;  %v3211_v11 = vmul.f32 -0.19977765, %v3203_v24  ;;  %v4380_v61 = vld [vmem:[%s4467_s21 + $0x28] sm:$0xff] }
 0xd7e   : > { %v3218_v34 = vadd.f32 %v3210_v42, %v7112_v54  ;;  %v3235_v32 = vpack.c.bf16 %v3221_v27, %v3220_v13  ;;  %vm3182_vm8 = vcmp.gt.f32.partialorder %v3174_v53, 0.0  ;;  %v3208_v7 = vsel %vm3184_vm7, %v3200_v20, 0.0 }
 0xd7f   : > { %v3198_v8 = vadd.f32 %v6742_v57, %v3190_v17  ;;  %v3201_v36 = vadd.f32 %v6742_v57, %v3193_v59  ;;  %vm3185_vm9 = vcmp.gt.f32.partialorder %v3177_v18, 0.0  ;;  %v3191_v39 = vmul.f32 %v6723_v6, %v3175_v30 }
 0xd80   : > { %v3219_v23 = vadd.f32 %v3211_v11, %v7137_v3  ;;  %v3216_v44 = vmul.f32 -0.19977765, %v3208_v7  ;;  %vm3183_vm10 = vcmp.gt.f32.partialorder %v3175_v30, 0.0  ;;  %v3228_v9 = vmul.f32 86.32579, %v4373_v25 }
 0xd81   : > { %v3206_v50 = vsel %vm3182_vm8, %v3198_v8, 0.0  ;;  %v3209_v52 = vsel %vm3185_vm9, %v3201_v36, 0.0  ;;  %v3199_v48 = vadd.f32 %v6742_v57, %v3191_v39  ;;  %v3229_v14 = vmul.f32 86.32579, %v4375_v21 }
 0xd82   : > { %v3234_v43 = vpack.c.bf16 %v3219_v23, %v3218_v34  ;;  %v3214_v54 = vmul.f32 -0.19977765, %v3206_v50  ;;  %v3217_v38 = vmul.f32 -0.19977765, %v3209_v52  ;;  %v3224_v37 = vadd.f32 %v3216_v44, %v7168_v35  ;;  %v4374_v35 = vld [vmem:[%s4467_s21] sm:$0xff] }
 0xd83   : > { %v3207_v31 = vsel %vm3183_vm10, %v3199_v48, 0.0  ;;  %v3226_v40 = vmul.f32 86.32579, %v4374_v35  ;;  %v3227_v62 = vmul.f32 86.32579, %v4376_v10 }
 0xd84   : > { %4305 = vmatprep.mubr.bf16.mxu1 %v3234_v43  ;;  %v3222_v56 = vadd.f32 %v3214_v54, %v7165_v4  ;;  %v3225_v6 = vadd.f32 %v3217_v38, %v7171_v16  ;;  %v3215_v3 = vmul.f32 -0.19977765, %v3207_v31  ;;  %v3704_v4 = vld [vmem:[%s7294_s7] ss:$0 sm:$0xff]  ;;  %v3232_v33 = vmul.f32 86.32579, %v4377_v55 }
 0xd85   : > { %4306 = vmatmul.mubr.bf16.vlgmr.msra.gmra.mxu1 %v3235_v32  ;;  %v3230_v41 = vmul.f32 86.32579, %v4378_v22  ;;  %v3233_v47 = vmul.f32 86.32579, %v4379_v15  ;;  %v3231_v29 = vmul.f32 86.32579, %v4380_v61 }
 0xd86   : > { %v3237_v63 = vpack.c.bf16 %v3225_v6, %v3224_v37  ;;  %v3223_v57 = vadd.f32 %v3215_v3, %v7174_v12 }
 0xd88   : > { %v3236_v19 = vpack.c.bf16 %v3223_v57, %v3222_v56 }
 0xd8a   : > { %4309 = vmatprep.mubr.bf16.mxu1 %v3236_v19 }
 0xd8d   : > { %4310 = vmatmul.mubr.bf16.gmra.mxu1 %v3237_v63 }
 0xe45   : > { %v4307_v28 = vpop.f32.mrf.mxu1 }
 0xe46   : > { %v3369_v16 = vadd.f32 %v4307_v28, %v3228_v9 }
 0xe47   : > { %v3336_v12 = vpop.f32.mrf.mxu1 }
 0xe48   : > { %v3384_v58 = vadd.f32 %v3704_v4, %v3369_v16  ;;  %v3367_v46 = vadd.f32 %v3336_v12, %v3226_v40 }
 0xe49   : > { %v4308_v45 = vpop.f32.mrf.mxu1 }
 0xe4a   : > { %3392 = vst.msk [vmem:[%s7261_s26 + $0x10] sm:$0xff] %vm469_vm2, %v3384_v58  ;;  %v3382_v60 = vadd.f32 %v3704_v4, %v3367_v46  ;;  %v3370_v5 = vadd.f32 %v4308_v45, %v3229_v14 }
 0xe4b   : > { %v3339_v49 = vpop.f32.mrf.mxu1 }
 0xe4c   : > { %3390 = vst.msk [vmem:[%s7261_s26] sm:$0xff] %vm469_vm2, %v3382_v60  ;;  %v3385_v13 = vadd.f32 %v3704_v4, %v3370_v5  ;;  %v3368_v1 = vadd.f32 %v3339_v49, %v3227_v62 }
 0xe4d   : > { %v4311_v51 = vpop.f32.mrf.mxu1 }
 0xe4e   : > { %3393 = vst.msk [vmem:[%s7261_s26 + $0x18] sm:$0xff] %vm469_vm2, %v3385_v13  ;;  %v3383_v26 = vadd.f32 %v3704_v4, %v3368_v1  ;;  %v3373_v0 = vadd.f32 %v4311_v51, %v3232_v33 }
 0xe4f   : > { %v3352_v2 = vpop.f32.mrf.mxu1 }
 0xe50   : > { %3391 = vst.msk [vmem:[%s7261_s26 + $0x8] sm:$0xff] %vm469_vm2, %v3383_v26  ;;  %v3388_v53 = vadd.f32 %v3704_v4, %v3373_v0  ;;  %v3371_v18 = vadd.f32 %v3352_v2, %v3230_v41 }
 0xe51   : > { %v4312_v27 = vpop.f32.mrf.mxu1 }
 0xe52   : > { %3396 = vst.msk [vmem:[%s7261_s26 + $0x30] sm:$0xff] %vm469_vm2, %v3388_v53  ;;  %v3386_v24 = vadd.f32 %v3704_v4, %v3371_v18  ;;  %v3374_v42 = vadd.f32 %v4312_v27, %v3233_v47 }
 0xe53   : > { %v3355_v20 = vpop.f32.mrf.mxu1 }
 0xe54   : > { %3394 = vst.msk [vmem:[%s7261_s26 + $0x20] sm:$0xff] %vm469_vm2, %v3386_v24  ;;  %v3389_v17 = vadd.f32 %v3704_v4, %v3374_v42  ;;  %v3372_v59 = vadd.f32 %v3355_v20, %v3231_v29 }
 0xe56   : > { %3397 = vst.msk [vmem:[%s7261_s26 + $0x38] sm:$0xff] %vm469_vm2, %v3389_v17  ;;  %v3387_v30 = vadd.f32 %v3704_v4, %v3372_v59 }
 0xe58   : > { %3395 = vst.msk [vmem:[%s7261_s26 + $0x28] sm:$0xff] %vm469_vm2, %v3387_v30 }
 0xe59 PF: > { %s18_s27 = sadd.s32 1, %s4387_s27  }
 0xe5a   : > { %p15_p4 = scmp.ge.s32.totalorder %s18_s27, 4  }
 0xe5c   :  { %17 = sbr.rel (!%p15_p4) target bundleno = 1 (0x1), region = 85 }

</bundles_post_ra>
